<compile_context>
chip_gen: v6e
topology: v6e:2x2x1
jax: 0.10.0
libtpu: 0.0.40
codegen_flags: <defaults>
</compile_context>

<pallas_src>
import jax
import jax.numpy as jnp
from jax.experimental import pallas as pl
from jax.experimental.pallas import tpu as pltpu

IN_F = (1536 + 1) * 2   # 3074
H1 = 500
H2 = 100
OUT_F = 2

# Padded, lane/MXU-friendly dims.
K1 = 3200   # 25 * 128
M1 = 512
M2 = 128
M3 = 128    # lane-dense output; real logits live in [:, :OUT_F]

TM_MAX = 256  # batch tile; sized to also fit v7x's 64 MiB VMEM comfortably


def _round_up(x, m):
    return ((x + m - 1) // m) * m


def _mlp_kernel(x_ref, w1_ref, b1_ref, w2_ref, b2_ref, w3_ref, b3_ref, o_ref):
    # BNs pre-folded into weights; Dropout is identity in eval mode.
    h = jnp.dot(x_ref[...], w1_ref[...], preferred_element_type=jnp.float32)
    h = jnp.maximum(h + b1_ref[...], 0.0).astype(jnp.bfloat16)

    h = jnp.dot(h, w2_ref[...], preferred_element_type=jnp.float32)
    h = jnp.maximum(h + b2_ref[...], 0.0).astype(jnp.bfloat16)

    out = jnp.dot(h, w3_ref[...], preferred_element_type=jnp.float32) + b3_ref[...]
    o_ref[...] = out


def _fold_bn(gamma, beta, mean, var, eps=1e-5):
    inv = gamma / jnp.sqrt(var + eps)
    return inv, beta - mean * inv


def _pad_to(a, shape):
    pads = [(0, t - s) for s, t in zip(a.shape, shape)]
    return jnp.pad(a, pads)


def _prepare_operands(params):
    """Fold BatchNorms into the Linear layers, pad, and cast weights to bf16."""
    s0, t0 = _fold_bn(*params["bn0"])
    s1, t1 = _fold_bn(*params["bn1"])
    s2, t2 = _fold_bn(*params["bn2"])
    w1, b1 = params["fc1"]
    w2, b2 = params["fc2"]
    w3, b3 = params["fc3"]

    # BN0 (input side) and BN1 (output side) fold into fc1.
    w1f = (s0[:, None] * w1) * s1[None, :]
    b1f = (t0 @ w1 + b1) * s1 + t1
    # BN2 folds into fc2.
    w2f = w2 * s2[None, :]
    b2f = b2 * s2 + t2

    w1p = _pad_to(w1f, (K1, M1)).astype(jnp.bfloat16)
    b1p = _pad_to(b1f.reshape(1, -1), (1, M1)).astype(jnp.float32)
    w2p = _pad_to(w2f, (M1, M2)).astype(jnp.bfloat16)
    b2p = _pad_to(b2f.reshape(1, -1), (1, M2)).astype(jnp.float32)
    w3p = _pad_to(w3, (M2, M3)).astype(jnp.bfloat16)
    b3p = _pad_to(b3.reshape(1, -1), (1, M3)).astype(jnp.float32)
    return w1p, b1p, w2p, b2p, w3p, b3p


def mymodel_forward(x, params):
    n = x.shape[0]
    w1p, b1p, w2p, b2p, w3p, b3p = _prepare_operands(params)

    tm = min(TM_MAX, _round_up(n, 8))
    n_pad = _round_up(n, tm)
    xp = _pad_to(x, (n_pad, K1)).astype(jnp.bfloat16)

    out = pl.pallas_call(
        _mlp_kernel,
        out_shape=jax.ShapeDtypeStruct((n_pad, M3), jnp.float32),
        grid=(n_pad // tm,),
        in_specs=[
            pl.BlockSpec((tm, K1), lambda i: (i, 0)),     # x tile (pipelined)
            pl.BlockSpec((K1, M1), lambda i: (0, 0)),     # weights: VMEM-resident
            pl.BlockSpec((1, M1), lambda i: (0, 0)),
            pl.BlockSpec((M1, M2), lambda i: (0, 0)),
            pl.BlockSpec((1, M2), lambda i: (0, 0)),
            pl.BlockSpec((M2, M3), lambda i: (0, 0)),
            pl.BlockSpec((1, M3), lambda i: (0, 0)),
        ],
        out_specs=pl.BlockSpec((tm, M3), lambda i: (i, 0)),
        compiler_params=pltpu.CompilerParams(
            dimension_semantics=("parallel",)),
    )(xp, w1p, b1p, w2p, b2p, w3p, b3p)

    return out[:n, :OUT_F]


def _init_params(key):
    # Deterministic synthetic parameters matching PyTorch module shapes.
    keys = jax.random.split(key, 12)

    def lin(kw, kb, fan_in, fan_out):
        bound = 1.0 / jnp.sqrt(fan_in)
        w = jax.random.uniform(kw, (fan_in, fan_out), jnp.float32, -bound, bound)
        b = jax.random.uniform(kb, (fan_out,), jnp.float32, -bound, bound)
        return w, b

    def bn(kg, kb, kf, f):
        gamma = 1.0 + 0.1 * jax.random.normal(kg, (f,), jnp.float32)
        beta = 0.1 * jax.random.normal(kb, (f,), jnp.float32)
        mean = 0.05 * jax.random.normal(kf, (f,), jnp.float32)
        var = jnp.ones((f,), jnp.float32)
        return gamma, beta, mean, var

    return {
        "bn0": bn(keys[0], keys[1], keys[2], IN_F),
        "fc1": lin(keys[3], keys[4], IN_F, H1),
        "bn1": bn(keys[5], keys[6], keys[2], H1),
        "fc2": lin(keys[7], keys[8], H1, H2),
        "bn2": bn(keys[9], keys[10], keys[2], H2),
        "fc3": lin(keys[11], keys[0], H2, OUT_F),
    }


def _reference_forward(x, params):
    # Pure-JAX reference following the same bf16-weight / f32-accumulate path.
    w1p, b1p, w2p, b2p, w3p, b3p = _prepare_operands(params)
    xp = _pad_to(x, (x.shape[0], K1)).astype(jnp.bfloat16).astype(jnp.float32)
    h = jnp.maximum(xp @ w1p.astype(jnp.float32) + b1p, 0.0)
    h = h.astype(jnp.bfloat16).astype(jnp.float32)
    h = jnp.maximum(h @ w2p.astype(jnp.float32) + b2p, 0.0)
    h = h.astype(jnp.bfloat16).astype(jnp.float32)
    out = h @ w3p.astype(jnp.float32) + b3p
    return out[:, :OUT_F]


if __name__ == "__main__":
    key = jax.random.PRNGKey(0)
    kx, kp = jax.random.split(key)
    batch = 8
    x = jax.random.normal(kx, (batch, IN_F), jnp.float32)
    params = _init_params(kp)

    out = mymodel_forward(x, params)
    out = jax.block_until_ready(out)

    ref = _reference_forward(x, params)
    assert out.shape == (batch, OUT_F)
    assert jnp.allclose(out, ref, atol=1e-2, rtol=1e-2), "mismatch vs reference"

    print("KERNEL_OK")
</pallas_src>

<mosaic_0001>
module attributes {stable_mosaic.version = 11 : i64} {
  func.func @_mlp_kernel(%arg0: i32, %arg1: memref<8x3200xbf16, #tpu.memory_space<vmem>>, %arg2: memref<3200x512xbf16, #tpu.memory_space<vmem>>, %arg3: memref<1x512xf32, #tpu.memory_space<vmem>>, %arg4: memref<512x128xbf16, #tpu.memory_space<vmem>>, %arg5: memref<1x128xf32, #tpu.memory_space<vmem>>, %arg6: memref<128x128xbf16, #tpu.memory_space<vmem>>, %arg7: memref<1x128xf32, #tpu.memory_space<vmem>>, %arg8: memref<8x128xf32, #tpu.memory_space<vmem>>) attributes {dimension_semantics = [#tpu.dimension_semantics<parallel>], iteration_bounds = array<i64: 1>, scalar_prefetch = 0 : i64, scratch_operands = 0 : i64, tpu.core_type = #tpu.core_type<tc>, window_params = [{transform_indices = @transform_0, window_bounds = array<i64: 8, 3200>}, {pipeline_mode = #tpu.pipeline_mode<synchronous>, transform_indices = @transform_1, window_bounds = array<i64: 3200, 512>}, {pipeline_mode = #tpu.pipeline_mode<synchronous>, transform_indices = @transform_2, window_bounds = array<i64: 1, 512>}, {pipeline_mode = #tpu.pipeline_mode<synchronous>, transform_indices = @transform_3, window_bounds = array<i64: 512, 128>}, {pipeline_mode = #tpu.pipeline_mode<synchronous>, transform_indices = @transform_4, window_bounds = array<i64: 1, 128>}, {pipeline_mode = #tpu.pipeline_mode<synchronous>, transform_indices = @transform_5, window_bounds = array<i64: 128, 128>}, {pipeline_mode = #tpu.pipeline_mode<synchronous>, transform_indices = @transform_6, window_bounds = array<i64: 1, 128>}, {transform_indices = @transform_7, window_bounds = array<i64: 8, 128>}]} {
    %c0 = arith.constant 0 : index
    %c0_0 = arith.constant 0 : index
    %0 = vector.load %arg1[%c0, %c0_0] : memref<8x3200xbf16, #tpu.memory_space<vmem>>, vector<8x3200xbf16>
    %c0_1 = arith.constant 0 : index
    %c0_2 = arith.constant 0 : index
    %1 = vector.load %arg2[%c0_1, %c0_2] : memref<3200x512xbf16, #tpu.memory_space<vmem>>, vector<3200x512xbf16>
    %cst = arith.constant dense<0.000000e+00> : vector<8x512xf32>
    %2 = tpu.matmul %0, %1, %cst {dimension_numbers = #tpu.dot_dimension_numbers<[1], [0], [0], [1], [0, 0, 1, 1], [], []>} : vector<8x3200xbf16>, vector<3200x512xbf16>, vector<8x512xf32> -> vector<8x512xf32>
    %c0_3 = arith.constant 0 : index
    %c0_4 = arith.constant 0 : index
    %3 = vector.load %arg3[%c0_3, %c0_4] : memref<1x512xf32, #tpu.memory_space<vmem>>, vector<1x512xf32>
    %4 = vector.broadcast %3 : vector<1x512xf32> to vector<8x512xf32>
    %5 = arith.addf %2, %4 : vector<8x512xf32>
    %cst_5 = arith.constant 0.000000e+00 : f32
    %6 = vector.broadcast %cst_5 : f32 to vector<8x512xf32>
    %7 = arith.maximumf %5, %6 : vector<8x512xf32>
    %8 = arith.truncf %7 : vector<8x512xf32> to vector<8x512xbf16>
    %c0_6 = arith.constant 0 : index
    %c0_7 = arith.constant 0 : index
    %9 = vector.load %arg4[%c0_6, %c0_7] : memref<512x128xbf16, #tpu.memory_space<vmem>>, vector<512x128xbf16>
    %cst_8 = arith.constant dense<0.000000e+00> : vector<8x128xf32>
    %10 = tpu.matmul %8, %9, %cst_8 {dimension_numbers = #tpu.dot_dimension_numbers<[1], [0], [0], [1], [0, 0, 1, 1], [], []>} : vector<8x512xbf16>, vector<512x128xbf16>, vector<8x128xf32> -> vector<8x128xf32>
    %c0_9 = arith.constant 0 : index
    %c0_10 = arith.constant 0 : index
    %11 = vector.load %arg5[%c0_9, %c0_10] : memref<1x128xf32, #tpu.memory_space<vmem>>, vector<1x128xf32>
    %12 = vector.broadcast %11 : vector<1x128xf32> to vector<8x128xf32>
    %13 = arith.addf %10, %12 : vector<8x128xf32>
    %cst_11 = arith.constant 0.000000e+00 : f32
    %14 = vector.broadcast %cst_11 : f32 to vector<8x128xf32>
    %15 = arith.maximumf %13, %14 : vector<8x128xf32>
    %16 = arith.truncf %15 : vector<8x128xf32> to vector<8x128xbf16>
    %c0_12 = arith.constant 0 : index
    %c0_13 = arith.constant 0 : index
    %17 = vector.load %arg6[%c0_12, %c0_13] : memref<128x128xbf16, #tpu.memory_space<vmem>>, vector<128x128xbf16>
    %cst_14 = arith.constant dense<0.000000e+00> : vector<8x128xf32>
    %18 = tpu.matmul %16, %17, %cst_14 {dimension_numbers = #tpu.dot_dimension_numbers<[1], [0], [0], [1], [0, 0, 1, 1], [], []>} : vector<8x128xbf16>, vector<128x128xbf16>, vector<8x128xf32> -> vector<8x128xf32>
    %c0_15 = arith.constant 0 : index
    %c0_16 = arith.constant 0 : index
    %19 = vector.load %arg7[%c0_15, %c0_16] : memref<1x128xf32, #tpu.memory_space<vmem>>, vector<1x128xf32>
    %20 = vector.broadcast %19 : vector<1x128xf32> to vector<8x128xf32>
    %21 = arith.addf %18, %20 : vector<8x128xf32>
    %c0_17 = arith.constant 0 : index
    %c0_18 = arith.constant 0 : index
    %22 = vector.load %arg8[%c0_17, %c0_18] : memref<8x128xf32, #tpu.memory_space<vmem>>, vector<8x128xf32>
    tpu.vector_store %arg8[%c0_17, %c0_18], %21 {strides = array<i32>} : memref<8x128xf32, #tpu.memory_space<vmem>>, vector<8x128xf32>,
    return
  }
  func.func @transform_0(%arg0: i32) -> (i32, i32) {
    %c0_i32 = arith.constant 0 : i32
    %c0_i32_0 = arith.constant 0 : i32
    return %arg0, %c0_i32 : i32, i32
  }
  func.func @transform_1(%arg0: i32) -> (i32, i32) {
    %c0_i32 = arith.constant 0 : i32
    %c0_i32_0 = arith.constant 0 : i32
    %c0_i32_1 = arith.constant 0 : i32
    return %c0_i32, %c0_i32_0 : i32, i32
  }
  func.func @transform_2(%arg0: i32) -> (i32, i32) {
    %c0_i32 = arith.constant 0 : i32
    %c0_i32_0 = arith.constant 0 : i32
    %c0_i32_1 = arith.constant 0 : i32
    return %c0_i32, %c0_i32_0 : i32, i32
  }
  func.func @transform_3(%arg0: i32) -> (i32, i32) {
    %c0_i32 = arith.constant 0 : i32
    %c0_i32_0 = arith.constant 0 : i32
    %c0_i32_1 = arith.constant 0 : i32
    return %c0_i32, %c0_i32_0 : i32, i32
  }
  func.func @transform_4(%arg0: i32) -> (i32, i32) {
    %c0_i32 = arith.constant 0 : i32
    %c0_i32_0 = arith.constant 0 : i32
    %c0_i32_1 = arith.constant 0 : i32
    return %c0_i32, %c0_i32_0 : i32, i32
  }
  func.func @transform_5(%arg0: i32) -> (i32, i32) {
    %c0_i32 = arith.constant 0 : i32
    %c0_i32_0 = arith.constant 0 : i32
    %c0_i32_1 = arith.constant 0 : i32
    return %c0_i32, %c0_i32_0 : i32, i32
  }
  func.func @transform_6(%arg0: i32) -> (i32, i32) {
    %c0_i32 = arith.constant 0 : i32
    %c0_i32_0 = arith.constant 0 : i32
    %c0_i32_1 = arith.constant 0 : i32
    return %c0_i32, %c0_i32_0 : i32, i32
  }
  func.func @transform_7(%arg0: i32) -> (i32, i32) {
    %c0_i32 = arith.constant 0 : i32
    %c0_i32_0 = arith.constant 0 : i32
    return %arg0, %c0_i32 : i32, i32
  }
}

</mosaic_0001>

<bundles_post_ra>
// kernel: tpu_custom_call.1
= control target key start
LH: loop header
LB: loop body
LE: loop exit
PB: predicated region body
PF: predicated region fallthrough
CT: control target
= control target key end

     0   :  { %12 = vsyncpa [#allocation3], 0  ;;  %s9294_s0 = inlined_call_operand.hbm [shape: bf16[8,3200], index: 0, kind: input, shape index: {}]   ;;  %s9295_s1 = inlined_call_operand.hbm [shape: bf16[3200,512], index: 1, kind: input, shape index: {}]   ;;  %s9296_s2 = inlined_call_operand.hbm [shape: f32[1,512], index: 2, kind: input, shape index: {}]   ;;  %s9297_s3 = inlined_call_operand.hbm [shape: bf16[512,128], index: 3, kind: input, shape index: {}]   ;;  %s9298_s4 = inlined_call_operand.hbm [shape: f32[1,128], index: 4, kind: input, shape index: {}]   ;;  %s9299_s5 = inlined_call_operand.hbm [shape: bf16[128,128], index: 5, kind: input, shape index: {}]   ;;  %s9300_s6 = inlined_call_operand.hbm [shape: f32[1,128], index: 6, kind: input, shape index: {}]   ;;  %s9301_s7 = inlined_call_operand.hbm [shape: f32[8,128], index: 7, kind: output, shape index: {}]  }
   0x1   :  { %13 = vsyncpa [#allocation6], 0 }
   0x2   :  { %14 = vsyncpa [#allocation9], 0 }
   0x3   :  { %15 = vsyncpa [#allocation12], 0 }
   0x4   :  { %16 = vsyncpa [#allocation4], 0  ;;  %s8979_s24 = smov [#allocation5]  }
   0x5   :  { %s32_s25 = sshll.u32 %s8979_s24, 4  ;;  %s33_s25 = int_to_ptr.vmem [resolvable:$true] %s32_s25 }
   0x6   :  { %s8817_s26 = scalar_lea.vmem %s33_s25, 102400  ;;  %p8822_p1 = scmp.lt.s32.totalorder %s33_s25, %s33_s25 }
   0x7   :  { %p8818_p0 = scmp.ne.s32.totalorder %s33_s25, %s8817_s26  ;;  %p8823_p2 = scmp.lt.s32.totalorder %s8817_s26, %s8817_s26 }
   0x9   :  { %p8824_p3 = por %p8823_p2, %p8822_p1 }
   0xb   :  { %p8825_p4 = pnand %p8824_p3, %p8818_p0 }
   0xd   :  { %8828 = shalt.err (!%p8825_p4)
}
   0xe   :  { %s8980_s27 = smov 256   ;;  %s8981_s28 = smov 16  }
   0xf   :  { %38 = dma.hbm_to_vmem [thread:$0]  %s9295_s1, 102400, %s33_s25, [#allocation6], %s8980_s27, %s8980_s27, %s8981_s28  }
  0x10   :  { %s8982_s8 = smov [#allocation8]  }
  0x11   :  { %s54_s9 = sshll.u32 %s8982_s8, 4  ;;  %s55_s9 = int_to_ptr.vmem [resolvable:$true] %s54_s9 }
  0x12   :  { %s8837_s10 = scalar_lea.vmem %s55_s9, 4096  ;;  %p8842_p6 = scmp.lt.s32.totalorder %s55_s9, %s55_s9 }
  0x13   :  { %p8838_p5 = scmp.ne.s32.totalorder %s55_s9, %s8837_s10  ;;  %p8843_p7 = scmp.lt.s32.totalorder %s8837_s10, %s8837_s10 }
  0x15   :  { %p8844_p8 = por %p8843_p7, %p8842_p6 }
  0x17   :  { %p8845_p9 = pnand %p8844_p8, %p8838_p5 }
  0x19   :  { %8848 = shalt.err (!%p8845_p9)
}
  0x1a   :  { %s8983_s11 = smov 64   ;;  %s8984_s12 = smov 4  }
  0x1b   :  { %60 = dma.hbm_to_vmem [thread:$0]  %s9297_s3, 4096, %s55_s9, [#allocation9], %s8983_s11, %s8983_s11, %s8984_s12  }
  0x1c   :  { %s8985_s15 = smov [#allocation11]   ;;  %s8986_s17 = smov [#allocation2]  }
  0x1d   :  { %s76_s16 = sshll.u32 %s8985_s15, 4  ;;  %s23_s1 = sshll.u32 %s8986_s17, 4  ;;  %s77_s16 = int_to_ptr.vmem [resolvable:$true] %s76_s16  ;;  %s24_s1 = int_to_ptr.vmem [resolvable:$true] %s23_s1 }
  0x1e   :  { %s8857_s18 = scalar_lea.vmem %s77_s16, 1024  ;;  %p8862_p11 = scmp.lt.s32.totalorder %s77_s16, %s77_s16 }
  0x1f   :  { %p8858_p10 = scmp.ne.s32.totalorder %s77_s16, %s8857_s18  ;;  %p8863_p12 = scmp.lt.s32.totalorder %s8857_s18, %s8857_s18 }
  0x21   :  { %p8864_p13 = por %p8863_p12, %p8862_p11 }
  0x23   :  { %p8865_p0 = pnand %p8864_p13, %p8858_p10 }
  0x25   :  { %8868 = shalt.err (!%p8865_p0)
}
  0x26   :  { %82 = dma.hbm_to_vmem [thread:$0]  %s9299_s5, 1024, %s77_s16, [#allocation12], %s8983_s11, %s8983_s11, %s8984_s12  }
  0x27   :  { %s8877_s21 = scalar_lea.vmem %s24_s1, 1600  ;;  %p8882_p2 = scmp.lt.s32.totalorder %s24_s1, %s24_s1 }
  0x28   :  { %p8878_p1 = scmp.ne.s32.totalorder %s24_s1, %s8877_s21  ;;  %p8883_p3 = scmp.lt.s32.totalorder %s8877_s21, %s8877_s21 }
  0x2a   :  { %p8884_p4 = por %p8883_p3, %p8882_p2 }
  0x2c   :  { %p8885_p5 = pnand %p8884_p4, %p8878_p1 }
  0x2e   :  { %8888 = shalt.err (!%p8885_p5)
}
  0x2f   :  { %26 = dma.hbm_to_vmem [thread:$0]  %s9294_s0, 1600, %s24_s1, [#allocation3]  }
  0x30   :  { %s8987_s23 = smov [#allocation7]   ;;  %s8988_s25 = smov [#allocation10]  }
  0x31   :  { %s45_s24 = sshll.u32 %s8987_s23, 4  ;;  %s67_s26 = sshll.u32 %s8988_s25, 4  ;;  %s46_s24 = int_to_ptr.vmem [resolvable:$true] %s45_s24  ;;  %s68_s26 = int_to_ptr.vmem [resolvable:$true] %s67_s26 }
  0x32   :  { %s8897_s27 = scalar_lea.vmem %s46_s24, 64  ;;  %p8902_p7 = scmp.lt.s32.totalorder %s46_s24, %s46_s24 }
  0x33   :  { %p8898_p6 = scmp.ne.s32.totalorder %s46_s24, %s8897_s27  ;;  %p8903_p8 = scmp.lt.s32.totalorder %s8897_s27, %s8897_s27 }
  0x35   :  { %p8904_p9 = por %p8903_p8, %p8902_p7 }
  0x37   :  { %p8905_p10 = pnand %p8904_p9, %p8898_p6 }
  0x39   :  { %8908 = shalt.err (!%p8905_p10)
}
  0x3a   :  { %48 = dma.hbm_to_vmem [thread:$0]  %s9296_s2, 64, %s46_s24, [#allocation6]  }
  0x3b   :  { %s8917_s29 = scalar_lea.vmem %s68_s26, 16  ;;  %s8921_s0 = scalar_lea.vmem %s68_s26, 32 }
  0x3c   :  { %p8918_p11 = scmp.ne.s32.totalorder %s68_s26, %s8917_s29  ;;  %p8922_p12 = scmp.lt.s32.totalorder %s68_s26, %s68_s26 }
  0x3d   :  { %p8923_p13 = scmp.lt.s32.totalorder %s8921_s0, %s8917_s29 }
  0x3f   :  { %p8924_p0 = por %p8923_p13, %p8922_p12 }
  0x41   :  { %p8925_p1 = pnand %p8924_p0, %p8918_p11 }
  0x43   :  { %8928 = shalt.err (!%p8925_p1)
}
  0x44   :  { %70 = dma.hbm_to_vmem [thread:$0]  %s9298_s4, 16, %s68_s26, [#allocation9]  }
  0x45   :  { %s8989_s9 = smov [#allocation13]  }
  0x46   :  { %s89_s10 = sshll.u32 %s8989_s9, 4  ;;  %s90_s10 = int_to_ptr.vmem [resolvable:$true] %s89_s10 }
  0x47   :  { %s8937_s11 = scalar_lea.vmem %s90_s10, 16  ;;  %s8941_s12 = scalar_lea.vmem %s90_s10, 32 }
  0x48   :  { %p8938_p2 = scmp.ne.s32.totalorder %s90_s10, %s8937_s11  ;;  %p8942_p3 = scmp.lt.s32.totalorder %s90_s10, %s90_s10 }
  0x49   :  { %p8943_p4 = scmp.lt.s32.totalorder %s8941_s12, %s8937_s11 }
  0x4b   :  { %p8944_p5 = por %p8943_p4, %p8942_p3 }
  0x4d   :  { %p8945_p6 = pnand %p8944_p5, %p8938_p2 }
  0x4f   :  { %8948 = shalt.err (!%p8945_p6)
}
  0x50   :  { %92 = dma.hbm_to_vmem [thread:$0]  %s9300_s6, 16, %s90_s10, [#allocation12]  }
  0x51   :  { %8969 = dma.done.wait [#allocation3], 1600  }
  0x52   :  { %8970 = vsyncadd [#allocation3], 4294965696 }
  0x53   :  { %8971 = dma.done.wait [#allocation6], 102464  }
  0x54   :  { %8972 = vsyncadd [#allocation6], 4294864832 }
  0x55   :  { %8973 = dma.done.wait [#allocation9], 4112  }
  0x56   :  { %8974 = vsyncadd [#allocation9], 4294963184 }
  0x57   :  { %8975 = dma.done.wait [#allocation12], 1040  }
  0x58   :  { %8976 = vsyncadd [#allocation12], 4294966256  ;;  %v7542_v0 = vld [vmem:[#allocation5 + $0xe4] ss:$16 sps:$4 sm:$0xff]   ;;  %v7546_v2 = vld [vmem:[#allocation5 + $0xe0] ss:$16 sps:$4 sm:$0xff]  }
  0x59   :  { %v7544_v1 = vld [vmem:[#allocation5 + $0x2e4] ss:$16 sps:$4 sm:$0xff]   ;;  %5038 = vmatprep.subr.bf16.mxu0 %v7542_v0  ;;  %v7547_v3 = vld [vmem:[#allocation5 + $0x2e0] ss:$16 sps:$4 sm:$0xff]   ;;  %vm8992_vm0 = vmmov 0   ;;  %s8993_s4 = smov [#allocation14]  }
  0x5a   :  { %5079 = vmatprep.subr.bf16.mxu1 %v7544_v1  ;;  %v7548_v4 = vld [vmem:[#allocation5 + $0xc4] ss:$16 sps:$4 sm:$0xff]   ;;  %5039 = vmatpush1.bf16.msra.mxu0 %v7546_v2  ;;  %v7552_v6 = vld [vmem:[#allocation5 + $0xc0] ss:$16 sps:$4 sm:$0xff]   ;;  %s6575_s6 = sshll.u32 %s8993_s4, 4  ;;  %s6576_s6 = int_to_ptr.vmem [resolvable:$true] %s6575_s6 }
  0x5b   :  { %5080 = vmatpush1.bf16.msra.mxu1 %v7547_v3  ;;  %v7550_v5 = vld [vmem:[#allocation5 + $0x2c4] ss:$16 sps:$4 sm:$0xff]   ;;  %5040 = vmatprep.subr.bf16.mxu0 %v7548_v4  ;;  %v7553_v7 = vld [vmem:[#allocation5 + $0x2c0] ss:$16 sps:$4 sm:$0xff]   ;;  %s8949_s14 = scalar_lea.vmem %s6576_s6, 128  ;;  %p8954_p8 = scmp.lt.s32.totalorder %s6576_s6, %s6576_s6 }
  0x5c   :  { %5081 = vmatprep.subr.bf16.mxu1 %v7550_v5  ;;  %v7554_v8 = vld [vmem:[#allocation5 + $0xa4] ss:$16 sps:$4 sm:$0xff]   ;;  %v7558_v10 = vld [vmem:[#allocation5 + $0xa0] ss:$16 sps:$4 sm:$0xff]   ;;  %p8950_p7 = scmp.ne.s32.totalorder %s6576_s6, %s8949_s14  ;;  %p8955_p9 = scmp.lt.s32.totalorder %s8949_s14, %s8949_s14 }
  0x5d   :  { %v7556_v9 = vld [vmem:[#allocation5 + $0x2a4] ss:$16 sps:$4 sm:$0xff]   ;;  %v7559_v11 = vld [vmem:[#allocation5 + $0x2a0] ss:$16 sps:$4 sm:$0xff]  }
  0x5e   :  { %5041 = vmatpush1.bf16.msra.mxu0 %v7552_v6  ;;  %v7560_v12 = vld [vmem:[#allocation5 + $0x84] ss:$16 sps:$4 sm:$0xff]   ;;  %v7564_v14 = vld [vmem:[#allocation5 + $0x80] ss:$16 sps:$4 sm:$0xff]   ;;  %p8956_p10 = por %p8955_p9, %p8954_p8 }
  0x5f   :  { %5082 = vmatpush1.bf16.msra.mxu1 %v7553_v7  ;;  %5042 = vmatprep.subr.bf16.mxu0 %v7554_v8  ;;  %v7562_v13 = vld [vmem:[#allocation5 + $0x284] ss:$16 sps:$4 sm:$0xff]   ;;  %v7565_v15 = vld [vmem:[#allocation5 + $0x280] ss:$16 sps:$4 sm:$0xff]  }
  0x60   :  { %5083 = vmatprep.subr.bf16.mxu1 %v7556_v9  ;;  %v7566_v16 = vld [vmem:[#allocation5 + $0x64] ss:$16 sps:$4 sm:$0xff]   ;;  %v7570_v18 = vld [vmem:[#allocation5 + $0x60] ss:$16 sps:$4 sm:$0xff]   ;;  %p8957_p11 = pnand %p8956_p10, %p8950_p7 }
  0x61   :  { %v7568_v17 = vld [vmem:[#allocation5 + $0x264] ss:$16 sps:$4 sm:$0xff]   ;;  %v7571_v19 = vld [vmem:[#allocation5 + $0x260] ss:$16 sps:$4 sm:$0xff]  }
  0x62   :  { %5043 = vmatpush1.bf16.msra.mxu0 %v7558_v10  ;;  %v7572_v20 = vld [vmem:[#allocation5 + $0x44] ss:$16 sps:$4 sm:$0xff]   ;;  %v7576_v22 = vld [vmem:[#allocation5 + $0x40] ss:$16 sps:$4 sm:$0xff]  }
  0x63   :  { %5084 = vmatpush1.bf16.msra.mxu1 %v7559_v11  ;;  %5044 = vmatprep.subr.bf16.mxu0 %v7560_v12  ;;  %v7574_v21 = vld [vmem:[#allocation5 + $0x244] ss:$16 sps:$4 sm:$0xff]   ;;  %v7577_v23 = vld [vmem:[#allocation5 + $0x240] ss:$16 sps:$4 sm:$0xff]  }
  0x64   :  { %5085 = vmatprep.subr.bf16.mxu1 %v7562_v13  ;;  %v7578_v24 = vld [vmem:[#allocation5 + $0x24] ss:$16 sps:$4 sm:$0xff]   ;;  %v7582_v26 = vld [vmem:[#allocation5 + $0x20] ss:$16 sps:$4 sm:$0xff]  }
  0x65   :  { %v7580_v25 = vld [vmem:[#allocation5 + $0x224] ss:$16 sps:$4 sm:$0xff]   ;;  %v7583_v27 = vld [vmem:[#allocation5 + $0x220] ss:$16 sps:$4 sm:$0xff]  }
  0x66   :  { %5045 = vmatpush1.bf16.msra.mxu0 %v7564_v14  ;;  %v7584_v28 = vld [vmem:[#allocation5 + $0x4] ss:$16 sps:$4 sm:$0xff]   ;;  %v7588_v30 = vld [vmem:[#allocation5] ss:$16 sps:$4 sm:$0xff]  }
  0x67   :  { %5086 = vmatpush1.bf16.msra.mxu1 %v7565_v15  ;;  %5046 = vmatprep.subr.bf16.mxu0 %v7566_v16  ;;  %v7586_v29 = vld [vmem:[#allocation5 + $0x204] ss:$16 sps:$4 sm:$0xff]   ;;  %v7589_v31 = vld [vmem:[#allocation5 + $0x200] ss:$16 sps:$4 sm:$0xff]  }
  0x68   :  { %5087 = vmatprep.subr.bf16.mxu1 %v7568_v17  ;;  %v7590_v32 = vld [vmem:[#allocation5 + $0x1e4] ss:$16 sps:$4 sm:$0xff]   ;;  %v7594_v34 = vld [vmem:[#allocation5 + $0x1e0] ss:$16 sps:$4 sm:$0xff]  }
  0x69   :  { %v7592_v33 = vld [vmem:[#allocation5 + $0x3e4] ss:$16 sps:$4 sm:$0xff]   ;;  %v7595_v35 = vld [vmem:[#allocation5 + $0x3e0] ss:$16 sps:$4 sm:$0xff]  }
  0x6a   :  { %5047 = vmatpush1.bf16.msra.mxu0 %v7570_v18  ;;  %v7596_v36 = vld [vmem:[#allocation5 + $0x1c4] ss:$16 sps:$4 sm:$0xff]   ;;  %v7600_v38 = vld [vmem:[#allocation5 + $0x1c0] ss:$16 sps:$4 sm:$0xff]  }
  0x6b   :  { %5088 = vmatpush1.bf16.msra.mxu1 %v7571_v19  ;;  %5048 = vmatprep.subr.bf16.mxu0 %v7572_v20  ;;  %v7598_v37 = vld [vmem:[#allocation5 + $0x3c4] ss:$16 sps:$4 sm:$0xff]   ;;  %v7601_v39 = vld [vmem:[#allocation5 + $0x3c0] ss:$16 sps:$4 sm:$0xff]  }
  0x6c   :  { %5089 = vmatprep.subr.bf16.mxu1 %v7574_v21  ;;  %v7602_v40 = vld [vmem:[#allocation5 + $0x1a4] ss:$16 sps:$4 sm:$0xff]   ;;  %v7606_v42 = vld [vmem:[#allocation5 + $0x1a0] ss:$16 sps:$4 sm:$0xff]  }
  0x6d   :  { %v7604_v41 = vld [vmem:[#allocation5 + $0x3a4] ss:$16 sps:$4 sm:$0xff]   ;;  %v7607_v43 = vld [vmem:[#allocation5 + $0x3a0] ss:$16 sps:$4 sm:$0xff]  }
  0x6e   :  { %5049 = vmatpush1.bf16.msra.mxu0 %v7576_v22  ;;  %v7608_v44 = vld [vmem:[#allocation5 + $0x184] ss:$16 sps:$4 sm:$0xff]   ;;  %v115_v46 = vld [vmem:[#allocation2] sm:$0xff] }
  0x6f   :  { %5090 = vmatpush1.bf16.msra.mxu1 %v7577_v23  ;;  %5050 = vmatprep.subr.bf16.mxu0 %v7578_v24  ;;  %v7610_v45 = vld [vmem:[#allocation5 + $0x384] ss:$16 sps:$4 sm:$0xff]   ;;  %v9055_v47 = vcombine.high %v115_v46, %v115_v46  ;;  %v7612_v49 = vld [vmem:[#allocation5 + $0x180] ss:$16 sps:$4 sm:$0xff]   ;;  %v9061_v6 = vcombine.low %v115_v46, %v115_v46 }
  0x70   :  { %5091 = vmatprep.subr.bf16.mxu1 %v7580_v25  ;;  %v116_v48 = vld [vmem:[#allocation2 + $0x8] sm:$0xff]  ;;  %v7613_v50 = vld [vmem:[#allocation5 + $0x380] ss:$16 sps:$4 sm:$0xff]  }
  0x71   :  { %v9057_v51 = vcombine.high %v116_v48, %v116_v48  ;;  %v7614_v52 = vld [vmem:[#allocation5 + $0x164] ss:$16 sps:$4 sm:$0xff]   ;;  %5070 = vmatprep.mubr.bf16.mxu0 %v9055_v47  ;;  %v7618_v54 = vld [vmem:[#allocation5 + $0x160] ss:$16 sps:$4 sm:$0xff]   ;;  %v9063_v7 = vcombine.low %v116_v48, %v116_v48 }
  0x72   :  { %5051 = vmatpush1.bf16.msra.mxu0 %v7582_v26  ;;  %v7616_v53 = vld [vmem:[#allocation5 + $0x364] ss:$16 sps:$4 sm:$0xff]   ;;  %v7619_v55 = vld [vmem:[#allocation5 + $0x360] ss:$16 sps:$4 sm:$0xff]  }
  0x73   :  { %5092 = vmatpush1.bf16.msra.mxu1 %v7583_v27  ;;  %5052 = vmatprep.subr.bf16.mxu0 %v7584_v28  ;;  %v7620_v56 = vld [vmem:[#allocation5 + $0x144] ss:$16 sps:$4 sm:$0xff]   ;;  %v7624_v58 = vld [vmem:[#allocation5 + $0x140] ss:$16 sps:$4 sm:$0xff]  }
  0x74   :  { %5093 = vmatprep.subr.bf16.mxu1 %v7586_v29  ;;  %5111 = vmatprep.mubr.bf16.mxu1 %v9057_v51  ;;  %v7622_v57 = vld [vmem:[#allocation5 + $0x344] ss:$16 sps:$4 sm:$0xff]   ;;  %v7625_v59 = vld [vmem:[#allocation5 + $0x340] ss:$16 sps:$4 sm:$0xff]  }
  0x75   :  { %v7626_v60 = vld [vmem:[#allocation5 + $0x124] ss:$16 sps:$4 sm:$0xff]   ;;  %v7630_v62 = vld [vmem:[#allocation5 + $0x120] ss:$16 sps:$4 sm:$0xff]  }
  0x76   :  { %5053 = vmatpush1.bf16.msra.mxu0 %v7588_v30  ;;  %v7628_v61 = vld [vmem:[#allocation5 + $0x324] ss:$16 sps:$4 sm:$0xff]   ;;  %v7631_v63 = vld [vmem:[#allocation5 + $0x320] ss:$16 sps:$4 sm:$0xff]  }
  0x77   :  { %5094 = vmatpush1.bf16.msra.mxu1 %v7589_v31  ;;  %5054 = vmatprep.subr.bf16.mxu0 %v7590_v32  ;;  %v7632_v0 = vld [vmem:[#allocation5 + $0x104] ss:$16 sps:$4 sm:$0xff]   ;;  %v7636_v2 = vld [vmem:[#allocation5 + $0x100] ss:$16 sps:$4 sm:$0xff]  }
  0x78   :  { %5095 = vmatprep.subr.bf16.mxu1 %v7592_v33  ;;  %v7634_v1 = vld [vmem:[#allocation5 + $0x304] ss:$16 sps:$4 sm:$0xff]   ;;  %v7637_v3 = vld [vmem:[#allocation5 + $0x300] ss:$16 sps:$4 sm:$0xff]  }
  0x79   :  { %v7644_v4 = vld [vmem:[#allocation5 + $0x4e4] ss:$16 sps:$4 sm:$0xff]   ;;  %v7642_v8 = vld [vmem:[#allocation5 + $0x4e0] ss:$16 sps:$4 sm:$0xff]  }
  0x7a   :  { %5055 = vmatpush2.bf16.msra.mxu0 %v7594_v34  ;;  %v7647_v5 = vld [vmem:[#allocation5 + $0x6e4] ss:$16 sps:$4 sm:$0xff]   ;;  %v7645_v9 = vld [vmem:[#allocation5 + $0x6e0] ss:$16 sps:$4 sm:$0xff]  }
  0x7b   :  { %5096 = vmatpush2.bf16.msra.mxu1 %v7595_v35  ;;  %5056 = vmatprep.subr.bf16.mxu0 %v7596_v36  ;;  %v7650_v10 = vld [vmem:[#allocation5 + $0x4c4] ss:$16 sps:$4 sm:$0xff]   ;;  %v7648_v12 = vld [vmem:[#allocation5 + $0x4c0] ss:$16 sps:$4 sm:$0xff]  }
  0x7c   :  { %5097 = vmatprep.subr.bf16.mxu1 %v7598_v37  ;;  %v7653_v11 = vld [vmem:[#allocation5 + $0x6c4] ss:$16 sps:$4 sm:$0xff]   ;;  %v7651_v13 = vld [vmem:[#allocation5 + $0x6c0] ss:$16 sps:$4 sm:$0xff]  }
  0x7d   :  { %v7656_v14 = vld [vmem:[#allocation5 + $0x4a4] ss:$16 sps:$4 sm:$0xff]   ;;  %v7654_v16 = vld [vmem:[#allocation5 + $0x4a0] ss:$16 sps:$4 sm:$0xff]  }
  0x7e   :  { %5057 = vmatpush2.bf16.msra.mxu0 %v7600_v38  ;;  %v7659_v15 = vld [vmem:[#allocation5 + $0x6a4] ss:$16 sps:$4 sm:$0xff]   ;;  %v7657_v17 = vld [vmem:[#allocation5 + $0x6a0] ss:$16 sps:$4 sm:$0xff]  }
  0x7f   :  { %5098 = vmatpush2.bf16.msra.mxu1 %v7601_v39  ;;  %5058 = vmatprep.subr.bf16.mxu0 %v7602_v40  ;;  %v7662_v18 = vld [vmem:[#allocation5 + $0x484] ss:$16 sps:$4 sm:$0xff]   ;;  %v7660_v20 = vld [vmem:[#allocation5 + $0x480] ss:$16 sps:$4 sm:$0xff]  }
  0x80   :  { %5099 = vmatprep.subr.bf16.mxu1 %v7604_v41  ;;  %v7665_v19 = vld [vmem:[#allocation5 + $0x684] ss:$16 sps:$4 sm:$0xff]   ;;  %v7663_v21 = vld [vmem:[#allocation5 + $0x680] ss:$16 sps:$4 sm:$0xff]  }
  0x81   :  { %v7668_v22 = vld [vmem:[#allocation5 + $0x464] ss:$16 sps:$4 sm:$0xff]   ;;  %v7666_v24 = vld [vmem:[#allocation5 + $0x460] ss:$16 sps:$4 sm:$0xff]  }
  0x82   :  { %5059 = vmatpush2.bf16.msra.mxu0 %v7606_v42  ;;  %v7671_v23 = vld [vmem:[#allocation5 + $0x664] ss:$16 sps:$4 sm:$0xff]   ;;  %v7669_v25 = vld [vmem:[#allocation5 + $0x660] ss:$16 sps:$4 sm:$0xff]  }
  0x83   :  { %5100 = vmatpush2.bf16.msra.mxu1 %v7607_v43  ;;  %5060 = vmatprep.subr.bf16.mxu0 %v7608_v44  ;;  %v7674_v26 = vld [vmem:[#allocation5 + $0x444] ss:$16 sps:$4 sm:$0xff]   ;;  %v7672_v28 = vld [vmem:[#allocation5 + $0x440] ss:$16 sps:$4 sm:$0xff]  }
  0x84   :  { %5101 = vmatprep.subr.bf16.mxu1 %v7610_v45  ;;  %v7677_v27 = vld [vmem:[#allocation5 + $0x644] ss:$16 sps:$4 sm:$0xff]   ;;  %v7675_v29 = vld [vmem:[#allocation5 + $0x640] ss:$16 sps:$4 sm:$0xff]  }
  0x85   :  { %v7680_v30 = vld [vmem:[#allocation5 + $0x424] ss:$16 sps:$4 sm:$0xff]   ;;  %v9067_v32 = vld [vmem:[#allocation2 + $0x10] sm:$0xff] }
  0x86   :  { %5061 = vmatpush2.bf16.msra.mxu0 %v7612_v49  ;;  %v7683_v31 = vld [vmem:[#allocation5 + $0x624] ss:$16 sps:$4 sm:$0xff]   ;;  %v7678_v34 = vld [vmem:[#allocation5 + $0x420] ss:$16 sps:$4 sm:$0xff]   ;;  %v9073_v36 = vcombine.high %v9067_v32, %v9067_v32 }
  0x87   :  { %5102 = vmatpush2.bf16.msra.mxu1 %v7613_v50  ;;  %5062 = vmatprep.subr.bf16.mxu0 %v7614_v52  ;;  %v9069_v33 = vld [vmem:[#allocation2 + $0x18] sm:$0xff]  ;;  %v7681_v35 = vld [vmem:[#allocation5 + $0x620] ss:$16 sps:$4 sm:$0xff]  }
  0x88   :  { %5103 = vmatprep.subr.bf16.mxu1 %v7616_v53  ;;  %v9077_v37 = vcombine.high %v9069_v33, %v9069_v33  ;;  %v7686_v38 = vld [vmem:[#allocation5 + $0x404] ss:$16 sps:$4 sm:$0xff]   ;;  %v7684_v40 = vld [vmem:[#allocation5 + $0x400] ss:$16 sps:$4 sm:$0xff]  }
  0x89   :  { %v7689_v39 = vld [vmem:[#allocation5 + $0x604] ss:$16 sps:$4 sm:$0xff]   ;;  %v7687_v41 = vld [vmem:[#allocation5 + $0x600] ss:$16 sps:$4 sm:$0xff]  }
  0x8a   :  { %5063 = vmatpush2.bf16.msra.mxu0 %v7618_v54  ;;  %v7692_v42 = vld [vmem:[#allocation5 + $0x5e4] ss:$16 sps:$4 sm:$0xff]   ;;  %v7690_v44 = vld [vmem:[#allocation5 + $0x5e0] ss:$16 sps:$4 sm:$0xff]  }
  0x8b   :  { %5104 = vmatpush2.bf16.msra.mxu1 %v7619_v55  ;;  %5064 = vmatprep.subr.bf16.mxu0 %v7620_v56  ;;  %v7695_v43 = vld [vmem:[#allocation5 + $0x7e4] ss:$16 sps:$4 sm:$0xff]   ;;  %v7693_v45 = vld [vmem:[#allocation5 + $0x7e0] ss:$16 sps:$4 sm:$0xff]  }
  0x8c   :  { %5105 = vmatprep.subr.bf16.mxu1 %v7622_v57  ;;  %v7698_v46 = vld [vmem:[#allocation5 + $0x5c4] ss:$16 sps:$4 sm:$0xff]   ;;  %v7696_v49 = vld [vmem:[#allocation5 + $0x5c0] ss:$16 sps:$4 sm:$0xff]  }
  0x8d   :  { %v7701_v48 = vld [vmem:[#allocation5 + $0x7c4] ss:$16 sps:$4 sm:$0xff]   ;;  %v7699_v50 = vld [vmem:[#allocation5 + $0x7c0] ss:$16 sps:$4 sm:$0xff]  }
  0x8e   :  { %5065 = vmatpush2.bf16.msra.mxu0 %v7624_v58  ;;  %v7704_v52 = vld [vmem:[#allocation5 + $0x5a4] ss:$16 sps:$4 sm:$0xff]   ;;  %v7702_v54 = vld [vmem:[#allocation5 + $0x5a0] ss:$16 sps:$4 sm:$0xff]  }
  0x8f   :  { %5106 = vmatpush2.bf16.msra.mxu1 %v7625_v59  ;;  %5066 = vmatprep.subr.bf16.mxu0 %v7626_v60  ;;  %v7707_v53 = vld [vmem:[#allocation5 + $0x7a4] ss:$16 sps:$4 sm:$0xff]   ;;  %v7705_v55 = vld [vmem:[#allocation5 + $0x7a0] ss:$16 sps:$4 sm:$0xff]  }
  0x90   :  { %5107 = vmatprep.subr.bf16.mxu1 %v7628_v61  ;;  %v7710_v56 = vld [vmem:[#allocation5 + $0x584] ss:$16 sps:$4 sm:$0xff]   ;;  %v7708_v58 = vld [vmem:[#allocation5 + $0x580] ss:$16 sps:$4 sm:$0xff]  }
  0x91   :  { %v7713_v57 = vld [vmem:[#allocation5 + $0x784] ss:$16 sps:$4 sm:$0xff]   ;;  %v7711_v59 = vld [vmem:[#allocation5 + $0x780] ss:$16 sps:$4 sm:$0xff]  }
  0x92   :  { %5067 = vmatpush2.bf16.msra.mxu0 %v7630_v62  ;;  %v7716_v60 = vld [vmem:[#allocation5 + $0x564] ss:$16 sps:$4 sm:$0xff]   ;;  %v7714_v62 = vld [vmem:[#allocation5 + $0x560] ss:$16 sps:$4 sm:$0xff]  }
  0x93   :  { %5108 = vmatpush2.bf16.msra.mxu1 %v7631_v63  ;;  %5068 = vmatprep.subr.bf16.mxu0 %v7632_v0  ;;  %v7719_v61 = vld [vmem:[#allocation5 + $0x764] ss:$16 sps:$4 sm:$0xff]   ;;  %v7717_v63 = vld [vmem:[#allocation5 + $0x760] ss:$16 sps:$4 sm:$0xff]  }
  0x94   :  { %5109 = vmatprep.subr.bf16.mxu1 %v7634_v1  ;;  %v7722_v0 = vld [vmem:[#allocation5 + $0x544] ss:$16 sps:$4 sm:$0xff]  }
  0x95   :  { %v7725_v1 = vld [vmem:[#allocation5 + $0x744] ss:$16 sps:$4 sm:$0xff]  }
  0x96   :  { %5069 = vmatpush2.bf16.msra.mxu0 %v7636_v2  ;;  %v7720_v2 = vld [vmem:[#allocation5 + $0x540] ss:$16 sps:$4 sm:$0xff]  }
  0x97   :  { %5110 = vmatpush2.bf16.msra.mxu1 %v7637_v3  ;;  %5120 = vmatprep.subr.bf16.mxu0 %v7644_v4  ;;  %v7723_v3 = vld [vmem:[#allocation5 + $0x740] ss:$16 sps:$4 sm:$0xff]   ;;  %v7728_v4 = vld [vmem:[#allocation5 + $0x524] ss:$16 sps:$4 sm:$0xff]  }
  0x98   :  { %5161 = vmatprep.subr.bf16.mxu1 %v7647_v5  ;;  %v7731_v5 = vld [vmem:[#allocation5 + $0x724] ss:$16 sps:$4 sm:$0xff]  }
  0x99   :  { %5071 = vmatmul.mubr.bf16.vlgmr.msra.gmra.mxu0 %v9061_v6 }
  0x9a   :  { %5112 = vmatmul.mubr.bf16.vlgmr.msra.gmra.mxu1 %v9063_v7  ;;  %5121 = vmatpush1.bf16.msra.mxu0 %v7642_v8  ;;  %v7726_v8 = vld [vmem:[#allocation5 + $0x520] ss:$16 sps:$4 sm:$0xff]  }
  0x9b   :  { %5162 = vmatpush1.bf16.msra.mxu1 %v7645_v9  ;;  %5122 = vmatprep.subr.bf16.mxu0 %v7650_v10  ;;  %v7729_v9 = vld [vmem:[#allocation5 + $0x720] ss:$16 sps:$4 sm:$0xff]   ;;  %v7734_v10 = vld [vmem:[#allocation5 + $0x504] ss:$16 sps:$4 sm:$0xff]  }
  0x9c   :  { %5163 = vmatprep.subr.bf16.mxu1 %v7653_v11  ;;  %5152 = vmatprep.mubr.bf16.mxu0 %v9073_v36  ;;  %v7737_v11 = vld [vmem:[#allocation5 + $0x704] ss:$16 sps:$4 sm:$0xff]  }
  0x9d   :  { %5193 = vmatprep.mubr.bf16.mxu1 %v9077_v37 }
  0x9e   :  { %5123 = vmatpush1.bf16.msra.mxu0 %v7648_v12  ;;  %v7732_v12 = vld [vmem:[#allocation5 + $0x500] ss:$16 sps:$4 sm:$0xff]  }
  0x9f   :  { %5164 = vmatpush1.bf16.msra.mxu1 %v7651_v13  ;;  %5124 = vmatprep.subr.bf16.mxu0 %v7656_v14  ;;  %v7735_v13 = vld [vmem:[#allocation5 + $0x700] ss:$16 sps:$4 sm:$0xff]   ;;  %v7744_v14 = vld [vmem:[#allocation5 + $0x8e4] ss:$16 sps:$4 sm:$0xff]  }
  0xa0   :  { %5165 = vmatprep.subr.bf16.mxu1 %v7659_v15  ;;  %v7747_v15 = vld [vmem:[#allocation5 + $0xae4] ss:$16 sps:$4 sm:$0xff]  }
  0xa2   :  { %5125 = vmatpush1.bf16.msra.mxu0 %v7654_v16  ;;  %v9083_v16 = vcombine.low %v9067_v32, %v9067_v32  ;;  %v7762_v32 = vld [vmem:[#allocation5 + $0x884] ss:$16 sps:$4 sm:$0xff]  }
  0xa3   :  { %5166 = vmatpush1.bf16.msra.mxu1 %v7657_v17  ;;  %5126 = vmatprep.subr.bf16.mxu0 %v7662_v18  ;;  %v9087_v17 = vcombine.low %v9069_v33, %v9069_v33  ;;  %v7742_v18 = vld [vmem:[#allocation5 + $0x8e0] ss:$16 sps:$4 sm:$0xff]   ;;  %v7765_v33 = vld [vmem:[#allocation5 + $0xa84] ss:$16 sps:$4 sm:$0xff]  }
  0xa4   :  { %5167 = vmatprep.subr.bf16.mxu1 %v7665_v19  ;;  %v7745_v19 = vld [vmem:[#allocation5 + $0xae0] ss:$16 sps:$4 sm:$0xff]  }
  0xa6   :  { %5127 = vmatpush1.bf16.msra.mxu0 %v7660_v20  ;;  %v7750_v20 = vld [vmem:[#allocation5 + $0x8c4] ss:$16 sps:$4 sm:$0xff]  }
  0xa7   :  { %5168 = vmatpush1.bf16.msra.mxu1 %v7663_v21  ;;  %5128 = vmatprep.subr.bf16.mxu0 %v7668_v22  ;;  %v7753_v21 = vld [vmem:[#allocation5 + $0xac4] ss:$16 sps:$4 sm:$0xff]   ;;  %v9089_v22 = vld [vmem:[#allocation2 + $0x20] sm:$0xff] }
  0xa8   :  { %5169 = vmatprep.subr.bf16.mxu1 %v7671_v23  ;;  %v9091_v23 = vld [vmem:[#allocation2 + $0x28] sm:$0xff] }
  0xaa   :  { %5129 = vmatpush1.bf16.msra.mxu0 %v7666_v24  ;;  %v9095_v24 = vcombine.high %v9089_v22, %v9089_v22 }
  0xab   :  { %5170 = vmatpush1.bf16.msra.mxu1 %v7669_v25  ;;  %5130 = vmatprep.subr.bf16.mxu0 %v7674_v26  ;;  %v9099_v25 = vcombine.high %v9091_v23, %v9091_v23  ;;  %v7748_v26 = vld [vmem:[#allocation5 + $0x8c0] ss:$16 sps:$4 sm:$0xff]  }
  0xac   :  { %5171 = vmatprep.subr.bf16.mxu1 %v7677_v27  ;;  %v7751_v27 = vld [vmem:[#allocation5 + $0xac0] ss:$16 sps:$4 sm:$0xff]  }
  0xae   :  { %5131 = vmatpush1.bf16.msra.mxu0 %v7672_v28  ;;  %v7756_v28 = vld [vmem:[#allocation5 + $0x8a4] ss:$16 sps:$4 sm:$0xff]  }
  0xaf   :  { %5172 = vmatpush1.bf16.msra.mxu1 %v7675_v29  ;;  %5132 = vmatprep.subr.bf16.mxu0 %v7680_v30  ;;  %v7759_v29 = vld [vmem:[#allocation5 + $0xaa4] ss:$16 sps:$4 sm:$0xff]   ;;  %v7754_v30 = vld [vmem:[#allocation5 + $0x8a0] ss:$16 sps:$4 sm:$0xff]  }
  0xb0   :  { %5173 = vmatprep.subr.bf16.mxu1 %v7683_v31  ;;  %v7757_v31 = vld [vmem:[#allocation5 + $0xaa0] ss:$16 sps:$4 sm:$0xff]  }
  0xb2   :  { %5133 = vmatpush1.bf16.msra.mxu0 %v7678_v34  ;;  %v7760_v34 = vld [vmem:[#allocation5 + $0x880] ss:$16 sps:$4 sm:$0xff]  }
  0xb3   :  { %5174 = vmatpush1.bf16.msra.mxu1 %v7681_v35  ;;  %5134 = vmatprep.subr.bf16.mxu0 %v7686_v38  ;;  %v7763_v35 = vld [vmem:[#allocation5 + $0xa80] ss:$16 sps:$4 sm:$0xff]   ;;  %v7768_v38 = vld [vmem:[#allocation5 + $0x864] ss:$16 sps:$4 sm:$0xff]  }
  0xb4   :  { %5175 = vmatprep.subr.bf16.mxu1 %v7689_v39  ;;  %v7771_v39 = vld [vmem:[#allocation5 + $0xa64] ss:$16 sps:$4 sm:$0xff]  }
  0xb6   :  { %5135 = vmatpush1.bf16.msra.mxu0 %v7684_v40  ;;  %v7766_v40 = vld [vmem:[#allocation5 + $0x860] ss:$16 sps:$4 sm:$0xff]  }
  0xb7   :  { %5176 = vmatpush1.bf16.msra.mxu1 %v7687_v41  ;;  %5136 = vmatprep.subr.bf16.mxu0 %v7692_v42  ;;  %v7769_v41 = vld [vmem:[#allocation5 + $0xa60] ss:$16 sps:$4 sm:$0xff]   ;;  %v7774_v42 = vld [vmem:[#allocation5 + $0x844] ss:$16 sps:$4 sm:$0xff]  }
  0xb8   :  { %5177 = vmatprep.subr.bf16.mxu1 %v7695_v43  ;;  %v7777_v43 = vld [vmem:[#allocation5 + $0xa44] ss:$16 sps:$4 sm:$0xff]  }
  0xba   :  { %5137 = vmatpush2.bf16.msra.mxu0 %v7690_v44  ;;  %v7772_v44 = vld [vmem:[#allocation5 + $0x840] ss:$16 sps:$4 sm:$0xff]  }
  0xbb   :  { %5178 = vmatpush2.bf16.msra.mxu1 %v7693_v45  ;;  %5138 = vmatprep.subr.bf16.mxu0 %v7698_v46  ;;  %v7775_v45 = vld [vmem:[#allocation5 + $0xa40] ss:$16 sps:$4 sm:$0xff]   ;;  %v7780_v46 = vld [vmem:[#allocation5 + $0x824] ss:$16 sps:$4 sm:$0xff]  }
  0xbc   :  { %5179 = vmatprep.subr.bf16.mxu1 %v7701_v48  ;;  %v7783_v48 = vld [vmem:[#allocation5 + $0xa24] ss:$16 sps:$4 sm:$0xff]  }
  0xbe   :  { %5139 = vmatpush2.bf16.msra.mxu0 %v7696_v49  ;;  %v7778_v49 = vld [vmem:[#allocation5 + $0x820] ss:$16 sps:$4 sm:$0xff]  }
  0xbf   :  { %5180 = vmatpush2.bf16.msra.mxu1 %v7699_v50  ;;  %5140 = vmatprep.subr.bf16.mxu0 %v7704_v52  ;;  %v7781_v50 = vld [vmem:[#allocation5 + $0xa20] ss:$16 sps:$4 sm:$0xff]   ;;  %v7786_v52 = vld [vmem:[#allocation5 + $0x804] ss:$16 sps:$4 sm:$0xff]  }
  0xc0   :  { %5181 = vmatprep.subr.bf16.mxu1 %v7707_v53  ;;  %v7789_v53 = vld [vmem:[#allocation5 + $0xa04] ss:$16 sps:$4 sm:$0xff]  }
  0xc2   :  { %5141 = vmatpush2.bf16.msra.mxu0 %v7702_v54  ;;  %v7784_v54 = vld [vmem:[#allocation5 + $0x800] ss:$16 sps:$4 sm:$0xff]  }
  0xc3   :  { %5182 = vmatpush2.bf16.msra.mxu1 %v7705_v55  ;;  %5142 = vmatprep.subr.bf16.mxu0 %v7710_v56  ;;  %v7787_v55 = vld [vmem:[#allocation5 + $0xa00] ss:$16 sps:$4 sm:$0xff]   ;;  %v7792_v56 = vld [vmem:[#allocation5 + $0x9e4] ss:$16 sps:$4 sm:$0xff]  }
  0xc4   :  { %5183 = vmatprep.subr.bf16.mxu1 %v7713_v57  ;;  %v7795_v57 = vld [vmem:[#allocation5 + $0xbe4] ss:$16 sps:$4 sm:$0xff]  }
  0xc6   :  { %5143 = vmatpush2.bf16.msra.mxu0 %v7708_v58  ;;  %v7790_v58 = vld [vmem:[#allocation5 + $0x9e0] ss:$16 sps:$4 sm:$0xff]  }
  0xc7   :  { %5184 = vmatpush2.bf16.msra.mxu1 %v7711_v59  ;;  %5144 = vmatprep.subr.bf16.mxu0 %v7716_v60  ;;  %v7793_v59 = vld [vmem:[#allocation5 + $0xbe0] ss:$16 sps:$4 sm:$0xff]   ;;  %v7798_v60 = vld [vmem:[#allocation5 + $0x9c4] ss:$16 sps:$4 sm:$0xff]  }
  0xc8   :  { %5185 = vmatprep.subr.bf16.mxu1 %v7719_v61  ;;  %v7801_v61 = vld [vmem:[#allocation5 + $0xbc4] ss:$16 sps:$4 sm:$0xff]  }
  0xca   :  { %5145 = vmatpush2.bf16.msra.mxu0 %v7714_v62  ;;  %v7796_v62 = vld [vmem:[#allocation5 + $0x9c0] ss:$16 sps:$4 sm:$0xff]  }
  0xcb   :  { %5186 = vmatpush2.bf16.msra.mxu1 %v7717_v63  ;;  %5146 = vmatprep.subr.bf16.mxu0 %v7722_v0  ;;  %v7799_v63 = vld [vmem:[#allocation5 + $0xbc0] ss:$16 sps:$4 sm:$0xff]   ;;  %v7804_v0 = vld [vmem:[#allocation5 + $0x9a4] ss:$16 sps:$4 sm:$0xff]  }
  0xcc   :  { %5187 = vmatprep.subr.bf16.mxu1 %v7725_v1  ;;  %v7807_v1 = vld [vmem:[#allocation5 + $0xba4] ss:$16 sps:$4 sm:$0xff]  }
  0xce   :  { %5147 = vmatpush2.bf16.msra.mxu0 %v7720_v2  ;;  %v7802_v2 = vld [vmem:[#allocation5 + $0x9a0] ss:$16 sps:$4 sm:$0xff]  }
  0xcf   :  { %5188 = vmatpush2.bf16.msra.mxu1 %v7723_v3  ;;  %5148 = vmatprep.subr.bf16.mxu0 %v7728_v4  ;;  %v7805_v3 = vld [vmem:[#allocation5 + $0xba0] ss:$16 sps:$4 sm:$0xff]   ;;  %v7810_v4 = vld [vmem:[#allocation5 + $0x984] ss:$16 sps:$4 sm:$0xff]  }
  0xd0   :  { %5189 = vmatprep.subr.bf16.mxu1 %v7731_v5  ;;  %v7813_v5 = vld [vmem:[#allocation5 + $0xb84] ss:$16 sps:$4 sm:$0xff]  }
  0xd2   :  { %5149 = vmatpush2.bf16.msra.mxu0 %v7726_v8  ;;  %v7808_v8 = vld [vmem:[#allocation5 + $0x980] ss:$16 sps:$4 sm:$0xff]  }
  0xd3   :  { %5190 = vmatpush2.bf16.msra.mxu1 %v7729_v9  ;;  %5150 = vmatprep.subr.bf16.mxu0 %v7734_v10  ;;  %v7811_v9 = vld [vmem:[#allocation5 + $0xb80] ss:$16 sps:$4 sm:$0xff]   ;;  %v7816_v10 = vld [vmem:[#allocation5 + $0x964] ss:$16 sps:$4 sm:$0xff]  }
  0xd4   :  { %5191 = vmatprep.subr.bf16.mxu1 %v7737_v11  ;;  %v7819_v11 = vld [vmem:[#allocation5 + $0xb64] ss:$16 sps:$4 sm:$0xff]  }
  0xd6   :  { %5151 = vmatpush2.bf16.msra.mxu0 %v7732_v12  ;;  %v7814_v12 = vld [vmem:[#allocation5 + $0x960] ss:$16 sps:$4 sm:$0xff]  }
  0xd7   :  { %5192 = vmatpush2.bf16.msra.mxu1 %v7735_v13  ;;  %5202 = vmatprep.subr.bf16.mxu0 %v7744_v14  ;;  %v7817_v13 = vld [vmem:[#allocation5 + $0xb60] ss:$16 sps:$4 sm:$0xff]   ;;  %v7822_v14 = vld [vmem:[#allocation5 + $0x944] ss:$16 sps:$4 sm:$0xff]  }
  0xd8   :  { %5243 = vmatprep.subr.bf16.mxu1 %v7747_v15  ;;  %v7825_v15 = vld [vmem:[#allocation5 + $0xb44] ss:$16 sps:$4 sm:$0xff]  }
  0xd9   :  { %5153 = vmatmul.mubr.bf16.vlgmr.msra.gmra.mxu0 %v9083_v16 }
  0xda   :  { %5194 = vmatmul.mubr.bf16.vlgmr.msra.gmra.mxu1 %v9087_v17  ;;  %5203 = vmatpush1.bf16.msra.mxu0 %v7742_v18  ;;  %v7820_v18 = vld [vmem:[#allocation5 + $0x940] ss:$16 sps:$4 sm:$0xff]  }
  0xdb   :  { %5244 = vmatpush1.bf16.msra.mxu1 %v7745_v19  ;;  %5204 = vmatprep.subr.bf16.mxu0 %v7750_v20  ;;  %v7823_v19 = vld [vmem:[#allocation5 + $0xb40] ss:$16 sps:$4 sm:$0xff]   ;;  %v7828_v20 = vld [vmem:[#allocation5 + $0x924] ss:$16 sps:$4 sm:$0xff]  }
  0xdc   :  { %5245 = vmatprep.subr.bf16.mxu1 %v7753_v21  ;;  %5234 = vmatprep.mubr.bf16.mxu0 %v9095_v24  ;;  %v7831_v21 = vld [vmem:[#allocation5 + $0xb24] ss:$16 sps:$4 sm:$0xff]  }
  0xdd   :  { %5275 = vmatprep.mubr.bf16.mxu1 %v9099_v25 }
  0xde   :  { %5205 = vmatpush1.bf16.msra.mxu0 %v7748_v26  ;;  %v7826_v26 = vld [vmem:[#allocation5 + $0x920] ss:$16 sps:$4 sm:$0xff]  }
  0xdf   :  { %5246 = vmatpush1.bf16.msra.mxu1 %v7751_v27  ;;  %5206 = vmatprep.subr.bf16.mxu0 %v7756_v28  ;;  %v7829_v27 = vld [vmem:[#allocation5 + $0xb20] ss:$16 sps:$4 sm:$0xff]   ;;  %v7834_v28 = vld [vmem:[#allocation5 + $0x904] ss:$16 sps:$4 sm:$0xff]  }
  0xe0   :  { %5247 = vmatprep.subr.bf16.mxu1 %v7759_v29  ;;  %v7837_v29 = vld [vmem:[#allocation5 + $0xb04] ss:$16 sps:$4 sm:$0xff]  }
  0xe2   :  { %5207 = vmatpush1.bf16.msra.mxu0 %v7754_v30  ;;  %v7832_v30 = vld [vmem:[#allocation5 + $0x900] ss:$16 sps:$4 sm:$0xff]  }
  0xe3   :  { %5248 = vmatpush1.bf16.msra.mxu1 %v7757_v31  ;;  %5208 = vmatprep.subr.bf16.mxu0 %v7762_v32  ;;  %v7835_v31 = vld [vmem:[#allocation5 + $0xb00] ss:$16 sps:$4 sm:$0xff]   ;;  %v7844_v32 = vld [vmem:[#allocation5 + $0xce4] ss:$16 sps:$4 sm:$0xff]  }
  0xe4   :  { %5249 = vmatprep.subr.bf16.mxu1 %v7765_v33  ;;  %v7847_v33 = vld [vmem:[#allocation5 + $0xee4] ss:$16 sps:$4 sm:$0xff]  }
  0xe6   :  { %5209 = vmatpush1.bf16.msra.mxu0 %v7760_v34  ;;  %v7842_v34 = vld [vmem:[#allocation5 + $0xce0] ss:$16 sps:$4 sm:$0xff]  }
  0xe7   :  { %5250 = vmatpush1.bf16.msra.mxu1 %v7763_v35  ;;  %5210 = vmatprep.subr.bf16.mxu0 %v7768_v38  ;;  %v9105_v35 = vld [vmem:[#allocation2 + $0x30] sm:$0xff]  ;;  %v9109_v38 = vcombine.low %v9089_v22, %v9089_v22 }
  0xe8   :  { %5251 = vmatprep.subr.bf16.mxu1 %v7771_v39  ;;  %v9113_v39 = vcombine.low %v9091_v23, %v9091_v23  ;;  %v7848_v23 = vld [vmem:[#allocation5 + $0xcc0] ss:$16 sps:$4 sm:$0xff]  }
  0xea   :  { %5211 = vmatpush1.bf16.msra.mxu0 %v7766_v40  ;;  %v9115_v40 = vld [vmem:[#allocation2 + $0x38] sm:$0xff] }
  0xeb   :  { %5252 = vmatpush1.bf16.msra.mxu1 %v7769_v41  ;;  %5212 = vmatprep.subr.bf16.mxu0 %v7774_v42  ;;  %v7845_v41 = vld [vmem:[#allocation5 + $0xee0] ss:$16 sps:$4 sm:$0xff]   ;;  %v7850_v42 = vld [vmem:[#allocation5 + $0xcc4] ss:$16 sps:$4 sm:$0xff]   ;;  %v9123_v22 = vcombine.high %v9115_v40, %v9115_v40 }
  0xec   :  { %5253 = vmatprep.subr.bf16.mxu1 %v7777_v43  ;;  %v7853_v43 = vld [vmem:[#allocation5 + $0xec4] ss:$16 sps:$4 sm:$0xff]  }
  0xee   :  { %5213 = vmatpush1.bf16.msra.mxu0 %v7772_v44  ;;  %v9119_v44 = vcombine.high %v9105_v35, %v9105_v35 }
  0xef   :  { %5254 = vmatpush1.bf16.msra.mxu1 %v7775_v45  ;;  %5214 = vmatprep.subr.bf16.mxu0 %v7780_v46  ;;  %v7851_v45 = vld [vmem:[#allocation5 + $0xec0] ss:$16 sps:$4 sm:$0xff]   ;;  %v7856_v46 = vld [vmem:[#allocation5 + $0xca4] ss:$16 sps:$4 sm:$0xff]  }
  0xf0   :  { %5255 = vmatprep.subr.bf16.mxu1 %v7783_v48  ;;  %v7859_v48 = vld [vmem:[#allocation5 + $0xea4] ss:$16 sps:$4 sm:$0xff]  }
  0xf2   :  { %5215 = vmatpush1.bf16.msra.mxu0 %v7778_v49  ;;  %v7854_v49 = vld [vmem:[#allocation5 + $0xca0] ss:$16 sps:$4 sm:$0xff]  }
  0xf3   :  { %5256 = vmatpush1.bf16.msra.mxu1 %v7781_v50  ;;  %5216 = vmatprep.subr.bf16.mxu0 %v7786_v52  ;;  %v7857_v50 = vld [vmem:[#allocation5 + $0xea0] ss:$16 sps:$4 sm:$0xff]   ;;  %v7862_v52 = vld [vmem:[#allocation5 + $0xc84] ss:$16 sps:$4 sm:$0xff]  }
  0xf4   :  { %5257 = vmatprep.subr.bf16.mxu1 %v7789_v53  ;;  %v7865_v53 = vld [vmem:[#allocation5 + $0xe84] ss:$16 sps:$4 sm:$0xff]  }
  0xf6   :  { %5217 = vmatpush1.bf16.msra.mxu0 %v7784_v54  ;;  %v7860_v54 = vld [vmem:[#allocation5 + $0xc80] ss:$16 sps:$4 sm:$0xff]  }
  0xf7   :  { %5258 = vmatpush1.bf16.msra.mxu1 %v7787_v55  ;;  %5218 = vmatprep.subr.bf16.mxu0 %v7792_v56  ;;  %v7863_v55 = vld [vmem:[#allocation5 + $0xe80] ss:$16 sps:$4 sm:$0xff]   ;;  %v7868_v56 = vld [vmem:[#allocation5 + $0xc64] ss:$16 sps:$4 sm:$0xff]  }
  0xf8   :  { %5259 = vmatprep.subr.bf16.mxu1 %v7795_v57  ;;  %v7871_v57 = vld [vmem:[#allocation5 + $0xe64] ss:$16 sps:$4 sm:$0xff]  }
  0xfa   :  { %5219 = vmatpush2.bf16.msra.mxu0 %v7790_v58  ;;  %v7866_v58 = vld [vmem:[#allocation5 + $0xc60] ss:$16 sps:$4 sm:$0xff]  }
  0xfb   :  { %5260 = vmatpush2.bf16.msra.mxu1 %v7793_v59  ;;  %5220 = vmatprep.subr.bf16.mxu0 %v7798_v60  ;;  %v7869_v59 = vld [vmem:[#allocation5 + $0xe60] ss:$16 sps:$4 sm:$0xff]   ;;  %v7874_v60 = vld [vmem:[#allocation5 + $0xc44] ss:$16 sps:$4 sm:$0xff]  }
  0xfc   :  { %5261 = vmatprep.subr.bf16.mxu1 %v7801_v61  ;;  %v7877_v61 = vld [vmem:[#allocation5 + $0xe44] ss:$16 sps:$4 sm:$0xff]  }
  0xfe   :  { %5221 = vmatpush2.bf16.msra.mxu0 %v7796_v62  ;;  %v7872_v62 = vld [vmem:[#allocation5 + $0xc40] ss:$16 sps:$4 sm:$0xff]  }
  0xff   :  { %5262 = vmatpush2.bf16.msra.mxu1 %v7799_v63  ;;  %5222 = vmatprep.subr.bf16.mxu0 %v7804_v0  ;;  %v7875_v63 = vld [vmem:[#allocation5 + $0xe40] ss:$16 sps:$4 sm:$0xff]   ;;  %v7880_v0 = vld [vmem:[#allocation5 + $0xc24] ss:$16 sps:$4 sm:$0xff]  }
 0x100   :  { %5263 = vmatprep.subr.bf16.mxu1 %v7807_v1  ;;  %v7883_v1 = vld [vmem:[#allocation5 + $0xe24] ss:$16 sps:$4 sm:$0xff]  }
 0x102   :  { %5223 = vmatpush2.bf16.msra.mxu0 %v7802_v2  ;;  %v7878_v2 = vld [vmem:[#allocation5 + $0xc20] ss:$16 sps:$4 sm:$0xff]  }
 0x103   :  { %5264 = vmatpush2.bf16.msra.mxu1 %v7805_v3  ;;  %5224 = vmatprep.subr.bf16.mxu0 %v7810_v4  ;;  %v7881_v3 = vld [vmem:[#allocation5 + $0xe20] ss:$16 sps:$4 sm:$0xff]   ;;  %v7886_v4 = vld [vmem:[#allocation5 + $0xc04] ss:$16 sps:$4 sm:$0xff]  }
 0x104   :  { %5265 = vmatprep.subr.bf16.mxu1 %v7813_v5  ;;  %v7889_v5 = vld [vmem:[#allocation5 + $0xe04] ss:$16 sps:$4 sm:$0xff]  }
 0x106   :  { %5225 = vmatpush2.bf16.msra.mxu0 %v7808_v8  ;;  %v7884_v8 = vld [vmem:[#allocation5 + $0xc00] ss:$16 sps:$4 sm:$0xff]  }
 0x107   :  { %5266 = vmatpush2.bf16.msra.mxu1 %v7811_v9  ;;  %5226 = vmatprep.subr.bf16.mxu0 %v7816_v10  ;;  %v7887_v9 = vld [vmem:[#allocation5 + $0xe00] ss:$16 sps:$4 sm:$0xff]   ;;  %v7892_v10 = vld [vmem:[#allocation5 + $0xde4] ss:$16 sps:$4 sm:$0xff]  }
 0x108   :  { %5267 = vmatprep.subr.bf16.mxu1 %v7819_v11  ;;  %v7895_v11 = vld [vmem:[#allocation5 + $0xfe4] ss:$16 sps:$4 sm:$0xff]  }
 0x10a   :  { %5227 = vmatpush2.bf16.msra.mxu0 %v7814_v12  ;;  %v7890_v12 = vld [vmem:[#allocation5 + $0xde0] ss:$16 sps:$4 sm:$0xff]  }
 0x10b   :  { %5268 = vmatpush2.bf16.msra.mxu1 %v7817_v13  ;;  %5228 = vmatprep.subr.bf16.mxu0 %v7822_v14  ;;  %v7893_v13 = vld [vmem:[#allocation5 + $0xfe0] ss:$16 sps:$4 sm:$0xff]   ;;  %v7898_v14 = vld [vmem:[#allocation5 + $0xdc4] ss:$16 sps:$4 sm:$0xff]  }
 0x10c   :  { %5269 = vmatprep.subr.bf16.mxu1 %v7825_v15  ;;  %v7901_v15 = vld [vmem:[#allocation5 + $0xfc4] ss:$16 sps:$4 sm:$0xff]  }
 0x10e   :  { %5229 = vmatpush2.bf16.msra.mxu0 %v7820_v18  ;;  %v7896_v18 = vld [vmem:[#allocation5 + $0xdc0] ss:$16 sps:$4 sm:$0xff]  }
 0x10f   :  { %5270 = vmatpush2.bf16.msra.mxu1 %v7823_v19  ;;  %5230 = vmatprep.subr.bf16.mxu0 %v7828_v20  ;;  %v7899_v19 = vld [vmem:[#allocation5 + $0xfc0] ss:$16 sps:$4 sm:$0xff]   ;;  %v7904_v20 = vld [vmem:[#allocation5 + $0xda4] ss:$16 sps:$4 sm:$0xff]  }
 0x110   :  { %5271 = vmatprep.subr.bf16.mxu1 %v7831_v21  ;;  %v7907_v21 = vld [vmem:[#allocation5 + $0xfa4] ss:$16 sps:$4 sm:$0xff]  }
 0x112   :  { %5231 = vmatpush2.bf16.msra.mxu0 %v7826_v26  ;;  %v7902_v26 = vld [vmem:[#allocation5 + $0xda0] ss:$16 sps:$4 sm:$0xff]  }
 0x113   :  { %5272 = vmatpush2.bf16.msra.mxu1 %v7829_v27  ;;  %5232 = vmatprep.subr.bf16.mxu0 %v7834_v28  ;;  %v7905_v27 = vld [vmem:[#allocation5 + $0xfa0] ss:$16 sps:$4 sm:$0xff]   ;;  %v7910_v28 = vld [vmem:[#allocation5 + $0xd84] ss:$16 sps:$4 sm:$0xff]  }
 0x114   :  { %5273 = vmatprep.subr.bf16.mxu1 %v7837_v29  ;;  %v7913_v29 = vld [vmem:[#allocation5 + $0xf84] ss:$16 sps:$4 sm:$0xff]  }
 0x116   :  { %5233 = vmatpush2.bf16.msra.mxu0 %v7832_v30  ;;  %v7908_v30 = vld [vmem:[#allocation5 + $0xd80] ss:$16 sps:$4 sm:$0xff]  }
 0x117   :  { %5274 = vmatpush2.bf16.msra.mxu1 %v7835_v31  ;;  %5284 = vmatprep.subr.bf16.mxu0 %v7844_v32  ;;  %v7911_v31 = vld [vmem:[#allocation5 + $0xf80] ss:$16 sps:$4 sm:$0xff]   ;;  %v7916_v32 = vld [vmem:[#allocation5 + $0xd64] ss:$16 sps:$4 sm:$0xff]  }
 0x118   :  { %5325 = vmatprep.subr.bf16.mxu1 %v7847_v33  ;;  %v7919_v33 = vld [vmem:[#allocation5 + $0xf64] ss:$16 sps:$4 sm:$0xff]  }
 0x119   :  { %5235 = vmatmul.mubr.bf16.vlgmr.msra.gmra.mxu0 %v9109_v38 }
 0x11a   :  { %5276 = vmatmul.mubr.bf16.vlgmr.msra.gmra.mxu1 %v9113_v39  ;;  %5285 = vmatpush1.bf16.msra.mxu0 %v7842_v34  ;;  %v7914_v34 = vld [vmem:[#allocation5 + $0xd60] ss:$16 sps:$4 sm:$0xff]  }
 0x11b   :  { %5326 = vmatpush1.bf16.msra.mxu1 %v7845_v41  ;;  %5286 = vmatprep.subr.bf16.mxu0 %v7850_v42  ;;  %v7917_v41 = vld [vmem:[#allocation5 + $0xf60] ss:$16 sps:$4 sm:$0xff]   ;;  %v7922_v42 = vld [vmem:[#allocation5 + $0xd44] ss:$16 sps:$4 sm:$0xff]  }
 0x11c   :  { %5327 = vmatprep.subr.bf16.mxu1 %v7853_v43  ;;  %5316 = vmatprep.mubr.bf16.mxu0 %v9119_v44  ;;  %v7925_v43 = vld [vmem:[#allocation5 + $0xf44] ss:$16 sps:$4 sm:$0xff]  }
 0x11d   :  { %5357 = vmatprep.mubr.bf16.mxu1 %v9123_v22 }
 0x11e   :  { %5287 = vmatpush1.bf16.msra.mxu0 %v7848_v23  ;;  %v7920_v23 = vld [vmem:[#allocation5 + $0xd40] ss:$16 sps:$4 sm:$0xff]  }
 0x11f   :  { %5328 = vmatpush1.bf16.msra.mxu1 %v7851_v45  ;;  %5288 = vmatprep.subr.bf16.mxu0 %v7856_v46  ;;  %v7923_v45 = vld [vmem:[#allocation5 + $0xf40] ss:$16 sps:$4 sm:$0xff]   ;;  %v7928_v46 = vld [vmem:[#allocation5 + $0xd24] ss:$16 sps:$4 sm:$0xff]  }
 0x120   :  { %5329 = vmatprep.subr.bf16.mxu1 %v7859_v48  ;;  %v930_v48 = vlaneseq }
 0x122   :  { %5289 = vmatpush1.bf16.msra.mxu0 %v7854_v49  ;;  %v7931_v49 = vld [vmem:[#allocation5 + $0xf24] ss:$16 sps:$4 sm:$0xff]  }
 0x123   :  { %5330 = vmatpush1.bf16.msra.mxu1 %v7857_v50  ;;  %5290 = vmatprep.subr.bf16.mxu0 %v7862_v52  ;;  %v7926_v50 = vld [vmem:[#allocation5 + $0xd20] ss:$16 sps:$4 sm:$0xff]  }
 0x124   :  { %5331 = vmatprep.subr.bf16.mxu1 %v7865_v53  ;;  %v7929_v52 = vld [vmem:[#allocation5 + $0xf20] ss:$16 sps:$4 sm:$0xff]   ;;  %v7934_v53 = vld [vmem:[#allocation5 + $0xd04] ss:$16 sps:$4 sm:$0xff]  }
 0x126   :  { %5291 = vmatpush1.bf16.msra.mxu0 %v7860_v54  ;;  %v9129_v54 = vshrl.u32 %v930_v48, 7  ;;  %v7966_v48 = vld [vmem:[#allocation5 + $0x1060] ss:$16 sps:$4 sm:$0xff]  }
 0x127   :  { %5332 = vmatpush1.bf16.msra.mxu1 %v7863_v55  ;;  %5292 = vmatprep.subr.bf16.mxu0 %v7868_v56  ;;  %v7937_v55 = vld [vmem:[#allocation5 + $0xf04] ss:$16 sps:$4 sm:$0xff]   ;;  %v7932_v56 = vld [vmem:[#allocation5 + $0xd00] ss:$16 sps:$4 sm:$0xff]  }
 0x128   :  { %5333 = vmatprep.subr.bf16.mxu1 %v7871_v57  ;;  %v7935_v57 = vld [vmem:[#allocation5 + $0xf00] ss:$16 sps:$4 sm:$0xff]  }
 0x12a   :  { %5293 = vmatpush1.bf16.msra.mxu0 %v7866_v58  ;;  %v928_v58 = vld [vmem:[#allocation7] sm:$0xf] }
 0x12b   :  { %5334 = vmatpush1.bf16.msra.mxu1 %v7869_v59  ;;  %5294 = vmatprep.subr.bf16.mxu0 %v7874_v60  ;;  %v932_v59 = vsub.s32 0, %v9129_v54  ;;  %v7944_v60 = vld [vmem:[#allocation5 + $0x10e4] ss:$16 sps:$4 sm:$0xff]  }
 0x12c   :  { %5335 = vmatprep.subr.bf16.mxu1 %v7877_v61  ;;  %v7947_v61 = vld [vmem:[#allocation5 + $0x12e4] ss:$16 sps:$4 sm:$0xff]  }
 0x12e   :  { %5295 = vmatpush1.bf16.msra.mxu0 %v7872_v62  ;;  %v7942_v62 = vld [vmem:[#allocation5 + $0x10e0] ss:$16 sps:$4 sm:$0xff]  }
 0x12f   :  { %5336 = vmatpush1.bf16.msra.mxu1 %v7875_v63  ;;  %5296 = vmatprep.subr.bf16.mxu0 %v7880_v0  ;;  %v936_v63 = vsub.s32 1, %v9129_v54  ;;  %v9135_v0 = vcombine.low %v9105_v35, %v9105_v35 }
 0x130   :  { %5337 = vmatprep.subr.bf16.mxu1 %v7883_v1  ;;  %v9139_v1 = vcombine.low %v9115_v40, %v9115_v40 }
 0x132   :  { %5297 = vmatpush1.bf16.msra.mxu0 %v7878_v2  ;;  %v9141_v2 = vld [vmem:[#allocation2 + $0x40] sm:$0xff] }
 0x133   :  { %5338 = vmatpush1.bf16.msra.mxu1 %v7881_v3  ;;  %5298 = vmatprep.subr.bf16.mxu0 %v7886_v4  ;;  %v9143_v3 = vld [vmem:[#allocation2 + $0x48] sm:$0xff]  ;;  %v933_v4 = vrot.slane %v928_v58, %v932_v59  ;;  %v9147_v35 = vcombine.high %v9141_v2, %v9141_v2  ;;  %v7981_v59 = vld [vmem:[#allocation5 + $0x1220] ss:$16 sps:$4 sm:$0xff]  }
 0x134   :  { %5339 = vmatprep.subr.bf16.mxu1 %v7889_v5  ;;  %v7945_v5 = vld [vmem:[#allocation5 + $0x12e0] ss:$16 sps:$4 sm:$0xff]   ;;  %v9151_v40 = vcombine.high %v9143_v3, %v9143_v3 }
 0x136   :  { %5299 = vmatpush1.bf16.msra.mxu0 %v7884_v8  ;;  %v7950_v8 = vld [vmem:[#allocation5 + $0x10c4] ss:$16 sps:$4 sm:$0xff]  }
 0x137   :  { %5340 = vmatpush1.bf16.msra.mxu1 %v7887_v9  ;;  %5300 = vmatprep.subr.bf16.mxu0 %v7892_v10  ;;  %v7953_v9 = vld [vmem:[#allocation5 + $0x12c4] ss:$16 sps:$4 sm:$0xff]   ;;  %v937_v10 = vrot.slane %v928_v58, %v936_v63  ;;  %v7978_v58 = vld [vmem:[#allocation5 + $0x1020] ss:$16 sps:$4 sm:$0xff]  }
 0x138   :  { %5341 = vmatprep.subr.bf16.mxu1 %v7895_v11  ;;  %v7987_v63 = vld [vmem:[#allocation5 + $0x1200] ss:$16 sps:$4 sm:$0xff]  }
 0x13a   :  { %5301 = vmatpush2.bf16.msra.mxu0 %v7890_v12 }
 0x13b   :  { %5342 = vmatpush2.bf16.msra.mxu1 %v7893_v13  ;;  %5302 = vmatprep.subr.bf16.mxu0 %v7898_v14  ;;  %v7948_v13 = vld [vmem:[#allocation5 + $0x10c0] ss:$16 sps:$4 sm:$0xff]  }
 0x13c   :  { %5343 = vmatprep.subr.bf16.mxu1 %v7901_v15  ;;  %v7951_v15 = vld [vmem:[#allocation5 + $0x12c0] ss:$16 sps:$4 sm:$0xff]  }
 0x13e   :  { %5303 = vmatpush2.bf16.msra.mxu0 %v7896_v18 }
 0x13f   :  { %5344 = vmatpush2.bf16.msra.mxu1 %v7899_v19  ;;  %5304 = vmatprep.subr.bf16.mxu0 %v7904_v20  ;;  %v7956_v20 = vld [vmem:[#allocation5 + $0x10a4] ss:$16 sps:$4 sm:$0xff]  }
 0x140   :  { %5345 = vmatprep.subr.bf16.mxu1 %v7907_v21  ;;  %v7959_v21 = vld [vmem:[#allocation5 + $0x12a4] ss:$16 sps:$4 sm:$0xff]  }
 0x142   :  { %5305 = vmatpush2.bf16.msra.mxu0 %v7902_v26 }
 0x143   :  { %5346 = vmatpush2.bf16.msra.mxu1 %v7905_v27  ;;  %5306 = vmatprep.subr.bf16.mxu0 %v7910_v28 }
 0x144   :  { %5347 = vmatprep.subr.bf16.mxu1 %v7913_v29 }
 0x146   :  { %5307 = vmatpush2.bf16.msra.mxu0 %v7908_v30  ;;  %v7954_v30 = vld [vmem:[#allocation5 + $0x10a0] ss:$16 sps:$4 sm:$0xff]  }
 0x147   :  { %5348 = vmatpush2.bf16.msra.mxu1 %v7911_v31  ;;  %5308 = vmatprep.subr.bf16.mxu0 %v7916_v32  ;;  %v7957_v32 = vld [vmem:[#allocation5 + $0x12a0] ss:$16 sps:$4 sm:$0xff]  }
 0x148   :  { %5349 = vmatprep.subr.bf16.mxu1 %v7919_v33 }
 0x14a   :  { %5309 = vmatpush2.bf16.msra.mxu0 %v7914_v34 }
 0x14b   :  { %5350 = vmatpush2.bf16.msra.mxu1 %v7917_v41  ;;  %5310 = vmatprep.subr.bf16.mxu0 %v7922_v42  ;;  %v7962_v41 = vld [vmem:[#allocation5 + $0x1084] ss:$16 sps:$4 sm:$0xff]  }
 0x14c   :  { %5351 = vmatprep.subr.bf16.mxu1 %v7925_v43  ;;  %v7965_v42 = vld [vmem:[#allocation5 + $0x1284] ss:$16 sps:$4 sm:$0xff]   ;;  %v7960_v43 = vld [vmem:[#allocation5 + $0x1080] ss:$16 sps:$4 sm:$0xff]  }
 0x14e   :  { %5311 = vmatpush2.bf16.msra.mxu0 %v7920_v23  ;;  %v7963_v23 = vld [vmem:[#allocation5 + $0x1280] ss:$16 sps:$4 sm:$0xff]  }
 0x14f   :  { %5352 = vmatpush2.bf16.msra.mxu1 %v7923_v45  ;;  %5312 = vmatprep.subr.bf16.mxu0 %v7928_v46  ;;  %v7968_v45 = vld [vmem:[#allocation5 + $0x1064] ss:$16 sps:$4 sm:$0xff]  }
 0x150   :  { %5353 = vmatprep.subr.bf16.mxu1 %v7931_v49  ;;  %v7971_v46 = vld [vmem:[#allocation5 + $0x1264] ss:$16 sps:$4 sm:$0xff]   ;;  %v7969_v49 = vld [vmem:[#allocation5 + $0x1260] ss:$16 sps:$4 sm:$0xff]  }
 0x152   :  { %5313 = vmatpush2.bf16.msra.mxu0 %v7926_v50  ;;  %v7974_v50 = vld [vmem:[#allocation5 + $0x1044] ss:$16 sps:$4 sm:$0xff]  }
 0x153   :  { %5354 = vmatpush2.bf16.msra.mxu1 %v7929_v52  ;;  %5314 = vmatprep.subr.bf16.mxu0 %v7934_v53  ;;  %v7977_v52 = vld [vmem:[#allocation5 + $0x1244] ss:$16 sps:$4 sm:$0xff]   ;;  %v7972_v53 = vld [vmem:[#allocation5 + $0x1040] ss:$16 sps:$4 sm:$0xff]  }
 0x154   :  { %5355 = vmatprep.subr.bf16.mxu1 %v7937_v55  ;;  %v7975_v55 = vld [vmem:[#allocation5 + $0x1240] ss:$16 sps:$4 sm:$0xff]  }
 0x156   :  { %5315 = vmatpush2.bf16.msra.mxu0 %v7932_v56  ;;  %v7980_v56 = vld [vmem:[#allocation5 + $0x1024] ss:$16 sps:$4 sm:$0xff]  }
 0x157   :  { %5356 = vmatpush2.bf16.msra.mxu1 %v7935_v57  ;;  %5366 = vmatprep.subr.bf16.mxu0 %v7944_v60  ;;  %v7983_v57 = vld [vmem:[#allocation5 + $0x1224] ss:$16 sps:$4 sm:$0xff]  }
 0x158   :  { %5407 = vmatprep.subr.bf16.mxu1 %v7947_v61  ;;  %v7986_v60 = vld [vmem:[#allocation5 + $0x1004] ss:$16 sps:$4 sm:$0xff]  }
 0x159   :  { %v5072_v11 = vpop.f32.mrf.mxu0  ;;  %5317 = vmatmul.mubr.bf16.vlgmr.msra.gmra.mxu0 %v9135_v0  ;;  %v7989_v61 = vld [vmem:[#allocation5 + $0x1204] ss:$16 sps:$4 sm:$0xff]  }
 0x15a   :  { %v5113_v12 = vpop.f32.mrf.mxu1  ;;  %5358 = vmatmul.mubr.bf16.vlgmr.msra.gmra.mxu1 %v9139_v1  ;;  %v5073_v14 = vadd.f32 %v5072_v11, %v933_v4  ;;  %5367 = vmatpush1.bf16.msra.mxu0 %v7942_v62  ;;  %v7984_v62 = vld [vmem:[#allocation5 + $0x1000] ss:$16 sps:$4 sm:$0xff]   ;;  %v7992_v4 = vld [vmem:[#allocation5 + $0x11e4] ss:$16 sps:$4 sm:$0xff]  }
 0x15b   :  { %5408 = vmatpush1.bf16.msra.mxu1 %v7945_v5  ;;  %v5074_v18 = vpop.f32.mrf.mxu0  ;;  %5368 = vmatprep.subr.bf16.mxu0 %v7950_v8  ;;  %v7995_v5 = vld [vmem:[#allocation5 + $0x13e4] ss:$16 sps:$4 sm:$0xff]   ;;  %v7990_v8 = vld [vmem:[#allocation5 + $0x11e0] ss:$16 sps:$4 sm:$0xff]  }
 0x15c   :  { %v5115_v19 = vpop.f32.mrf.mxu1  ;;  %5409 = vmatprep.subr.bf16.mxu1 %v7953_v9  ;;  %v9155_v26 = vadd.f32 %v5113_v12, %v5073_v14  ;;  %v5075_v27 = vadd.f32 %v5074_v18, %v937_v10  ;;  %5398 = vmatprep.mubr.bf16.mxu0 %v9147_v35  ;;  %v7993_v9 = vld [vmem:[#allocation5 + $0x13e0] ss:$16 sps:$4 sm:$0xff]   ;;  %v7998_v10 = vld [vmem:[#allocation5 + $0x11c4] ss:$16 sps:$4 sm:$0xff]  }
 0x15d   :  { %5439 = vmatprep.mubr.bf16.mxu1 %v9151_v40  ;;  %v5076_v28 = vpop.f32.mrf.mxu0  ;;  %v8001_v11 = vld [vmem:[#allocation5 + $0x13c4] ss:$16 sps:$4 sm:$0xff]   ;;  %v7996_v12 = vld [vmem:[#allocation5 + $0x11c0] ss:$16 sps:$4 sm:$0xff]  }
 0x15e   :  { %v5117_v29 = vpop.f32.mrf.mxu1  ;;  %v9159_v31 = vadd.f32 %v5115_v19, %v5075_v27  ;;  %5369 = vmatpush1.bf16.msra.mxu0 %v7948_v13  ;;  %v7999_v13 = vld [vmem:[#allocation5 + $0x13c0] ss:$16 sps:$4 sm:$0xff]   ;;  %v8004_v14 = vld [vmem:[#allocation5 + $0x11a4] ss:$16 sps:$4 sm:$0xff]  }
 0x15f   :  { %5410 = vmatpush1.bf16.msra.mxu1 %v7951_v15  ;;  %v5077_v33 = vpop.f32.mrf.mxu0  ;;  %5370 = vmatprep.subr.bf16.mxu0 %v7956_v20  ;;  %v8007_v15 = vld [vmem:[#allocation5 + $0x13a4] ss:$16 sps:$4 sm:$0xff]   ;;  %v8002_v18 = vld [vmem:[#allocation5 + $0x11a0] ss:$16 sps:$4 sm:$0xff]  }
 0x160   :  { %v5118_v34 = vpop.f32.mrf.mxu1  ;;  %5411 = vmatprep.subr.bf16.mxu1 %v7959_v21  ;;  %v8005_v19 = vld [vmem:[#allocation5 + $0x13a0] ss:$16 sps:$4 sm:$0xff]   ;;  %v8010_v20 = vld [vmem:[#allocation5 + $0x1184] ss:$16 sps:$4 sm:$0xff]  }
 0x161   :  { %v8013_v21 = vld [vmem:[#allocation5 + $0x1384] ss:$16 sps:$4 sm:$0xff]   ;;  %v8008_v27 = vld [vmem:[#allocation5 + $0x1180] ss:$16 sps:$4 sm:$0xff]  }
 0x162   :  { %5371 = vmatpush1.bf16.msra.mxu0 %v7954_v30  ;;  %v8011_v28 = vld [vmem:[#allocation5 + $0x1380] ss:$16 sps:$4 sm:$0xff]   ;;  %v8016_v29 = vld [vmem:[#allocation5 + $0x1164] ss:$16 sps:$4 sm:$0xff]  }
 0x163   :  { %5412 = vmatpush1.bf16.msra.mxu1 %v7957_v32  ;;  %5372 = vmatprep.subr.bf16.mxu0 %v7962_v41  ;;  %v8019_v30 = vld [vmem:[#allocation5 + $0x1364] ss:$16 sps:$4 sm:$0xff]   ;;  %v8014_v32 = vld [vmem:[#allocation5 + $0x1160] ss:$16 sps:$4 sm:$0xff]  }
 0x164   :  { %5413 = vmatprep.subr.bf16.mxu1 %v7965_v42  ;;  %v8017_v33 = vld [vmem:[#allocation5 + $0x1360] ss:$16 sps:$4 sm:$0xff]   ;;  %v8022_v34 = vld [vmem:[#allocation5 + $0x1144] ss:$16 sps:$4 sm:$0xff]  }
 0x165   :  { %v8025_v41 = vld [vmem:[#allocation5 + $0x1344] ss:$16 sps:$4 sm:$0xff]   ;;  %v8020_v42 = vld [vmem:[#allocation5 + $0x1140] ss:$16 sps:$4 sm:$0xff]  }
 0x166   :  { %5373 = vmatpush1.bf16.msra.mxu0 %v7960_v43  ;;  %v8023_v43 = vld [vmem:[#allocation5 + $0x1340] ss:$16 sps:$4 sm:$0xff]  }
 0x167   :  { %5414 = vmatpush1.bf16.msra.mxu1 %v7963_v23  ;;  %5374 = vmatprep.subr.bf16.mxu0 %v7968_v45  ;;  %v8028_v23 = vld [vmem:[#allocation5 + $0x1124] ss:$16 sps:$4 sm:$0xff]  }
 0x168   :  { %5415 = vmatprep.subr.bf16.mxu1 %v7971_v46  ;;  %v8031_v45 = vld [vmem:[#allocation5 + $0x1324] ss:$16 sps:$4 sm:$0xff]   ;;  %v8026_v46 = vld [vmem:[#allocation5 + $0x1120] ss:$16 sps:$4 sm:$0xff]  }
 0x16a   :  { %5375 = vmatpush1.bf16.msra.mxu0 %v7966_v48  ;;  %v8029_v48 = vld [vmem:[#allocation5 + $0x1320] ss:$16 sps:$4 sm:$0xff]  }
 0x16b   :  { %5416 = vmatpush1.bf16.msra.mxu1 %v7969_v49  ;;  %5376 = vmatprep.subr.bf16.mxu0 %v7974_v50  ;;  %v8034_v49 = vld [vmem:[#allocation5 + $0x1104] ss:$16 sps:$4 sm:$0xff]  }
 0x16c   :  { %5417 = vmatprep.subr.bf16.mxu1 %v7977_v52  ;;  %v8037_v50 = vld [vmem:[#allocation5 + $0x1304] ss:$16 sps:$4 sm:$0xff]   ;;  %v8032_v52 = vld [vmem:[#allocation5 + $0x1100] ss:$16 sps:$4 sm:$0xff]  }
 0x16e   :  { %5377 = vmatpush1.bf16.msra.mxu0 %v7972_v53  ;;  %v8035_v53 = vld [vmem:[#allocation5 + $0x1300] ss:$16 sps:$4 sm:$0xff]  }
 0x16f   :  { %5418 = vmatpush1.bf16.msra.mxu1 %v7975_v55  ;;  %5378 = vmatprep.subr.bf16.mxu0 %v7980_v56  ;;  %v8044_v55 = vld [vmem:[#allocation5 + $0x14e4] ss:$16 sps:$4 sm:$0xff]  }
 0x170   :  { %5419 = vmatprep.subr.bf16.mxu1 %v7983_v57  ;;  %v8047_v56 = vld [vmem:[#allocation5 + $0x16e4] ss:$16 sps:$4 sm:$0xff]   ;;  %v9161_v57 = vld [vmem:[#allocation2 + $0x50] sm:$0xff] }
 0x172   :  { %5379 = vmatpush1.bf16.msra.mxu0 %v7978_v58  ;;  %v9163_v58 = vld [vmem:[#allocation2 + $0x58] sm:$0xff] }
 0x173   :  { %5420 = vmatpush1.bf16.msra.mxu1 %v7981_v59  ;;  %5380 = vmatprep.subr.bf16.mxu0 %v7986_v60  ;;  %v8042_v59 = vld [vmem:[#allocation5 + $0x14e0] ss:$16 sps:$4 sm:$0xff]  }
 0x174   :  { %5421 = vmatprep.subr.bf16.mxu1 %v7989_v61  ;;  %v8045_v60 = vld [vmem:[#allocation5 + $0x16e0] ss:$16 sps:$4 sm:$0xff]   ;;  %v9167_v61 = vcombine.low %v9141_v2, %v9141_v2  ;;  %v9179_v2 = vcombine.high %v9163_v58, %v9163_v58 }
 0x176   :  { %5381 = vmatpush1.bf16.msra.mxu0 %v7984_v62  ;;  %v9171_v62 = vcombine.low %v9143_v3, %v9143_v3 }
 0x177   :  { %5422 = vmatpush1.bf16.msra.mxu1 %v7987_v63  ;;  %5382 = vmatprep.subr.bf16.mxu0 %v7992_v4  ;;  %v8050_v63 = vld [vmem:[#allocation5 + $0x14c4] ss:$16 sps:$4 sm:$0xff]  }
 0x178   :  { %5423 = vmatprep.subr.bf16.mxu1 %v7995_v5  ;;  %v8053_v4 = vld [vmem:[#allocation5 + $0x16c4] ss:$16 sps:$4 sm:$0xff]   ;;  %v8048_v5 = vld [vmem:[#allocation5 + $0x14c0] ss:$16 sps:$4 sm:$0xff]  }
 0x17a   :  { %5383 = vmatpush2.bf16.msra.mxu0 %v7990_v8  ;;  %v8051_v8 = vld [vmem:[#allocation5 + $0x16c0] ss:$16 sps:$4 sm:$0xff]  }
 0x17b   :  { %5424 = vmatpush2.bf16.msra.mxu1 %v7993_v9  ;;  %5384 = vmatprep.subr.bf16.mxu0 %v7998_v10  ;;  %v9175_v9 = vcombine.high %v9161_v57, %v9161_v57 }
 0x17c   :  { %5425 = vmatprep.subr.bf16.mxu1 %v8001_v11 }
 0x17e   :  { %5385 = vmatpush2.bf16.msra.mxu0 %v7996_v12 }
 0x17f   :  { %5426 = vmatpush2.bf16.msra.mxu1 %v7999_v13  ;;  %5386 = vmatprep.subr.bf16.mxu0 %v8004_v14  ;;  %v8056_v14 = vld [vmem:[#allocation5 + $0x14a4] ss:$16 sps:$4 sm:$0xff]  }
 0x180   :  { %5427 = vmatprep.subr.bf16.mxu1 %v8007_v15  ;;  %v8059_v15 = vld [vmem:[#allocation5 + $0x16a4] ss:$16 sps:$4 sm:$0xff]  }
 0x182   :  { %5387 = vmatpush2.bf16.msra.mxu0 %v8002_v18 }
 0x183   :  { %5428 = vmatpush2.bf16.msra.mxu1 %v8005_v19  ;;  %5388 = vmatprep.subr.bf16.mxu0 %v8010_v20  ;;  %v8054_v20 = vld [vmem:[#allocation5 + $0x14a0] ss:$16 sps:$4 sm:$0xff]  }
 0x184   :  { %5429 = vmatprep.subr.bf16.mxu1 %v8013_v21  ;;  %v8057_v21 = vld [vmem:[#allocation5 + $0x16a0] ss:$16 sps:$4 sm:$0xff]  }
 0x186   :  { %5389 = vmatpush2.bf16.msra.mxu0 %v8008_v27 }
 0x187   :  { %5430 = vmatpush2.bf16.msra.mxu1 %v8011_v28  ;;  %5390 = vmatprep.subr.bf16.mxu0 %v8016_v29 }
 0x188   :  { %5431 = vmatprep.subr.bf16.mxu1 %v8019_v30 }
 0x18a   :  { %5391 = vmatpush2.bf16.msra.mxu0 %v8014_v32  ;;  %v8062_v32 = vld [vmem:[#allocation5 + $0x1484] ss:$16 sps:$4 sm:$0xff]  }
 0x18b   :  { %5432 = vmatpush2.bf16.msra.mxu1 %v8017_v33  ;;  %5392 = vmatprep.subr.bf16.mxu0 %v8022_v34  ;;  %v8065_v33 = vld [vmem:[#allocation5 + $0x1684] ss:$16 sps:$4 sm:$0xff]   ;;  %v8063_v34 = vld [vmem:[#allocation5 + $0x1680] ss:$16 sps:$4 sm:$0xff]  }
 0x18c   :  { %5433 = vmatprep.subr.bf16.mxu1 %v8025_v41  ;;  %v8068_v41 = vld [vmem:[#allocation5 + $0x1464] ss:$16 sps:$4 sm:$0xff]  }
 0x18e   :  { %5393 = vmatpush2.bf16.msra.mxu0 %v8020_v42  ;;  %v8071_v42 = vld [vmem:[#allocation5 + $0x1664] ss:$16 sps:$4 sm:$0xff]  }
 0x18f   :  { %5434 = vmatpush2.bf16.msra.mxu1 %v8023_v43  ;;  %5394 = vmatprep.subr.bf16.mxu0 %v8028_v23  ;;  %v8066_v43 = vld [vmem:[#allocation5 + $0x1460] ss:$16 sps:$4 sm:$0xff]  }
 0x190   :  { %5435 = vmatprep.subr.bf16.mxu1 %v8031_v45  ;;  %v8069_v23 = vld [vmem:[#allocation5 + $0x1660] ss:$16 sps:$4 sm:$0xff]   ;;  %v8074_v45 = vld [vmem:[#allocation5 + $0x1444] ss:$16 sps:$4 sm:$0xff]  }
 0x192   :  { %5395 = vmatpush2.bf16.msra.mxu0 %v8026_v46  ;;  %v8077_v46 = vld [vmem:[#allocation5 + $0x1644] ss:$16 sps:$4 sm:$0xff]  }
 0x193   :  { %5436 = vmatpush2.bf16.msra.mxu1 %v8029_v48  ;;  %5396 = vmatprep.subr.bf16.mxu0 %v8034_v49  ;;  %v8072_v48 = vld [vmem:[#allocation5 + $0x1440] ss:$16 sps:$4 sm:$0xff]  }
 0x194   :  { %5437 = vmatprep.subr.bf16.mxu1 %v8037_v50  ;;  %v8075_v49 = vld [vmem:[#allocation5 + $0x1640] ss:$16 sps:$4 sm:$0xff]   ;;  %v8080_v50 = vld [vmem:[#allocation5 + $0x1424] ss:$16 sps:$4 sm:$0xff]  }
 0x196   :  { %5397 = vmatpush2.bf16.msra.mxu0 %v8032_v52  ;;  %v8083_v52 = vld [vmem:[#allocation5 + $0x1624] ss:$16 sps:$4 sm:$0xff]  }
 0x197   :  { %5438 = vmatpush2.bf16.msra.mxu1 %v8035_v53  ;;  %5448 = vmatprep.subr.bf16.mxu0 %v8044_v55  ;;  %v8078_v53 = vld [vmem:[#allocation5 + $0x1420] ss:$16 sps:$4 sm:$0xff]  }
 0x198   :  { %5489 = vmatprep.subr.bf16.mxu1 %v8047_v56  ;;  %v8081_v55 = vld [vmem:[#allocation5 + $0x1620] ss:$16 sps:$4 sm:$0xff]   ;;  %v8086_v56 = vld [vmem:[#allocation5 + $0x1404] ss:$16 sps:$4 sm:$0xff]  }
 0x199   :  { %v5154_v10 = vpop.f32.mrf.mxu0  ;;  %5399 = vmatmul.mubr.bf16.vlgmr.msra.gmra.mxu0 %v9167_v61 }
 0x19a   :  { %v5195_v11 = vpop.f32.mrf.mxu1  ;;  %5440 = vmatmul.mubr.bf16.vlgmr.msra.gmra.mxu1 %v9171_v62  ;;  %v5155_v3 = vadd.f32 %v5154_v10, %v9155_v26  ;;  %5449 = vmatpush1.bf16.msra.mxu0 %v8042_v59  ;;  %v8089_v59 = vld [vmem:[#allocation5 + $0x1604] ss:$16 sps:$4 sm:$0xff]   ;;  %v8093_v10 = vld [vmem:[#allocation5 + $0x17e0] ss:$16 sps:$4 sm:$0xff]  }
 0x19b   :  { %5490 = vmatpush1.bf16.msra.mxu1 %v8045_v60  ;;  %v5156_v12 = vpop.f32.mrf.mxu0  ;;  %5450 = vmatprep.subr.bf16.mxu0 %v8050_v63  ;;  %v8084_v60 = vld [vmem:[#allocation5 + $0x1400] ss:$16 sps:$4 sm:$0xff]  }
 0x19c   :  { %v5197_v13 = vpop.f32.mrf.mxu1  ;;  %5491 = vmatprep.subr.bf16.mxu1 %v8053_v4  ;;  %v9184_v18 = vadd.f32 %v5195_v11, %v5155_v3  ;;  %v5157_v19 = vadd.f32 %v5156_v12, %v9159_v31  ;;  %5480 = vmatprep.mubr.bf16.mxu0 %v9175_v9  ;;  %v8060_v31 = vld [vmem:[#allocation5 + $0x1480] ss:$16 sps:$4 sm:$0xff]   ;;  %v8092_v4 = vld [vmem:[#allocation5 + $0x15e4] ss:$16 sps:$4 sm:$0xff]  }
 0x19d   :  { %5521 = vmatprep.mubr.bf16.mxu1 %v9179_v2  ;;  %v5158_v27 = vpop.f32.mrf.mxu0  ;;  %v8087_v63 = vld [vmem:[#allocation5 + $0x1600] ss:$16 sps:$4 sm:$0xff]   ;;  %v8098_v11 = vld [vmem:[#allocation5 + $0x15c4] ss:$16 sps:$4 sm:$0xff]  }
 0x19e   :  { %v5199_v26 = vpop.f32.mrf.mxu1  ;;  %v9189_v28 = vadd.f32 %v5197_v13, %v5157_v19  ;;  %5451 = vmatpush1.bf16.msra.mxu0 %v8048_v5  ;;  %v8095_v5 = vld [vmem:[#allocation5 + $0x17e4] ss:$16 sps:$4 sm:$0xff]   ;;  %v8096_v12 = vld [vmem:[#allocation5 + $0x15c0] ss:$16 sps:$4 sm:$0xff]  }
 0x19f   :  { %5492 = vmatpush1.bf16.msra.mxu1 %v8051_v8  ;;  %v5159_v29 = vpop.f32.mrf.mxu0  ;;  %5452 = vmatprep.subr.bf16.mxu0 %v8056_v14  ;;  %v8090_v8 = vld [vmem:[#allocation5 + $0x15e0] ss:$16 sps:$4 sm:$0xff]   ;;  %v8101_v3 = vld [vmem:[#allocation5 + $0x17c4] ss:$16 sps:$4 sm:$0xff]  }
 0x1a0   :  { %v5200_v30 = vpop.f32.mrf.mxu1  ;;  %5493 = vmatprep.subr.bf16.mxu1 %v8059_v15  ;;  %v8099_v13 = vld [vmem:[#allocation5 + $0x17c0] ss:$16 sps:$4 sm:$0xff]   ;;  %v8104_v14 = vld [vmem:[#allocation5 + $0x15a4] ss:$16 sps:$4 sm:$0xff]  }
 0x1a1   :  { %v8107_v15 = vld [vmem:[#allocation5 + $0x17a4] ss:$16 sps:$4 sm:$0xff]   ;;  %v8102_v19 = vld [vmem:[#allocation5 + $0x15a0] ss:$16 sps:$4 sm:$0xff]  }
 0x1a2   :  { %5453 = vmatpush1.bf16.msra.mxu0 %v8054_v20  ;;  %v8105_v20 = vld [vmem:[#allocation5 + $0x17a0] ss:$16 sps:$4 sm:$0xff]   ;;  %v8113_v27 = vld [vmem:[#allocation5 + $0x1784] ss:$16 sps:$4 sm:$0xff]  }
 0x1a3   :  { %5494 = vmatpush1.bf16.msra.mxu1 %v8057_v21  ;;  %5454 = vmatprep.subr.bf16.mxu0 %v8062_v32  ;;  %v8110_v21 = vld [vmem:[#allocation5 + $0x1584] ss:$16 sps:$4 sm:$0xff]   ;;  %v8108_v26 = vld [vmem:[#allocation5 + $0x1580] ss:$16 sps:$4 sm:$0xff]  }
 0x1a4   :  { %5495 = vmatprep.subr.bf16.mxu1 %v8065_v33  ;;  %v8111_v29 = vld [vmem:[#allocation5 + $0x1780] ss:$16 sps:$4 sm:$0xff]   ;;  %v8116_v30 = vld [vmem:[#allocation5 + $0x1564] ss:$16 sps:$4 sm:$0xff]  }
 0x1a5   :  { %v8119_v32 = vld [vmem:[#allocation5 + $0x1764] ss:$16 sps:$4 sm:$0xff]   ;;  %v8114_v33 = vld [vmem:[#allocation5 + $0x1560] ss:$16 sps:$4 sm:$0xff]  }
 0x1a6   :  { %5455 = vmatpush1.bf16.msra.mxu0 %v8060_v31  ;;  %v8117_v31 = vld [vmem:[#allocation5 + $0x1760] ss:$16 sps:$4 sm:$0xff]  }
 0x1a7   :  { %5496 = vmatpush1.bf16.msra.mxu1 %v8063_v34  ;;  %5456 = vmatprep.subr.bf16.mxu0 %v8068_v41  ;;  %v8122_v34 = vld [vmem:[#allocation5 + $0x1544] ss:$16 sps:$4 sm:$0xff]  }
 0x1a8   :  { %5497 = vmatprep.subr.bf16.mxu1 %v8071_v42  ;;  %v8125_v41 = vld [vmem:[#allocation5 + $0x1744] ss:$16 sps:$4 sm:$0xff]   ;;  %v8120_v42 = vld [vmem:[#allocation5 + $0x1540] ss:$16 sps:$4 sm:$0xff]  }
 0x1aa   :  { %5457 = vmatpush1.bf16.msra.mxu0 %v8066_v43  ;;  %v8123_v43 = vld [vmem:[#allocation5 + $0x1740] ss:$16 sps:$4 sm:$0xff]  }
 0x1ab   :  { %5498 = vmatpush1.bf16.msra.mxu1 %v8069_v23  ;;  %5458 = vmatprep.subr.bf16.mxu0 %v8074_v45  ;;  %v8128_v23 = vld [vmem:[#allocation5 + $0x1524] ss:$16 sps:$4 sm:$0xff]  }
 0x1ac   :  { %5499 = vmatprep.subr.bf16.mxu1 %v8077_v46  ;;  %v8131_v45 = vld [vmem:[#allocation5 + $0x1724] ss:$16 sps:$4 sm:$0xff]   ;;  %v8126_v46 = vld [vmem:[#allocation5 + $0x1520] ss:$16 sps:$4 sm:$0xff]  }
 0x1ae   :  { %5459 = vmatpush1.bf16.msra.mxu0 %v8072_v48  ;;  %v8129_v48 = vld [vmem:[#allocation5 + $0x1720] ss:$16 sps:$4 sm:$0xff]  }
 0x1af   :  { %5500 = vmatpush1.bf16.msra.mxu1 %v8075_v49  ;;  %5460 = vmatprep.subr.bf16.mxu0 %v8080_v50  ;;  %v8134_v49 = vld [vmem:[#allocation5 + $0x1504] ss:$16 sps:$4 sm:$0xff]  }
 0x1b0   :  { %5501 = vmatprep.subr.bf16.mxu1 %v8083_v52  ;;  %v8137_v50 = vld [vmem:[#allocation5 + $0x1704] ss:$16 sps:$4 sm:$0xff]   ;;  %v8132_v52 = vld [vmem:[#allocation5 + $0x1500] ss:$16 sps:$4 sm:$0xff]  }
 0x1b2   :  { %5461 = vmatpush1.bf16.msra.mxu0 %v8078_v53  ;;  %v8135_v53 = vld [vmem:[#allocation5 + $0x1700] ss:$16 sps:$4 sm:$0xff]  }
 0x1b3   :  { %5502 = vmatpush1.bf16.msra.mxu1 %v8081_v55  ;;  %5462 = vmatprep.subr.bf16.mxu0 %v8086_v56  ;;  %v8144_v55 = vld [vmem:[#allocation5 + $0x18e4] ss:$16 sps:$4 sm:$0xff]   ;;  %v8147_v56 = vld [vmem:[#allocation5 + $0xec] ss:$16 sps:$4 sm:$0xff]  }
 0x1b4   :  { %5503 = vmatprep.subr.bf16.mxu1 %v8089_v59  ;;  %v8142_v59 = vld [vmem:[#allocation5 + $0x18e0] ss:$16 sps:$4 sm:$0xff]  }
 0x1b6   :  { %5463 = vmatpush1.bf16.msra.mxu0 %v8084_v60  ;;  %v8145_v60 = vld [vmem:[#allocation5 + $0xe8] ss:$16 sps:$4 sm:$0xff]  }
 0x1b7   :  { %5504 = vmatpush1.bf16.msra.mxu1 %v8087_v63  ;;  %5464 = vmatprep.subr.bf16.mxu0 %v8092_v4  ;;  %v9193_v63 = vcombine.low %v9161_v57, %v9161_v57  ;;  %v9197_v4 = vcombine.low %v9163_v58, %v9163_v58 }
 0x1b8   :  { %5505 = vmatprep.subr.bf16.mxu1 %v8095_v5  ;;  %v8150_v5 = vld [vmem:[#allocation5 + $0x18c4] ss:$16 sps:$4 sm:$0xff]  }
 0x1ba   :  { %5465 = vmatpush2.bf16.msra.mxu0 %v8090_v8  ;;  %v8153_v8 = vld [vmem:[#allocation5 + $0xcc] ss:$16 sps:$4 sm:$0xff]  }
 0x1bb   :  { %5506 = vmatpush2.bf16.msra.mxu1 %v8093_v10  ;;  %5466 = vmatprep.subr.bf16.mxu0 %v8098_v11  ;;  %v8148_v10 = vld [vmem:[#allocation5 + $0x18c0] ss:$16 sps:$4 sm:$0xff]   ;;  %v8151_v11 = vld [vmem:[#allocation5 + $0xc8] ss:$16 sps:$4 sm:$0xff]  }
 0x1bc   :  { %5507 = vmatprep.subr.bf16.mxu1 %v8101_v3 }
 0x1be   :  { %5467 = vmatpush2.bf16.msra.mxu0 %v8096_v12 }
 0x1bf   :  { %5508 = vmatpush2.bf16.msra.mxu1 %v8099_v13  ;;  %5468 = vmatprep.subr.bf16.mxu0 %v8104_v14  ;;  %v8156_v14 = vld [vmem:[#allocation5 + $0x18a4] ss:$16 sps:$4 sm:$0xff]  }
 0x1c0   :  { %5509 = vmatprep.subr.bf16.mxu1 %v8107_v15  ;;  %v8159_v15 = vld [vmem:[#allocation5 + $0xac] ss:$16 sps:$4 sm:$0xff]  }
 0x1c2   :  { %5469 = vmatpush2.bf16.msra.mxu0 %v8102_v19 }
 0x1c3   :  { %5510 = vmatpush2.bf16.msra.mxu1 %v8105_v20  ;;  %5470 = vmatprep.subr.bf16.mxu0 %v8110_v21  ;;  %v8154_v21 = vld [vmem:[#allocation5 + $0x18a0] ss:$16 sps:$4 sm:$0xff]  }
 0x1c4   :  { %5511 = vmatprep.subr.bf16.mxu1 %v8113_v27  ;;  %v8157_v27 = vld [vmem:[#allocation5 + $0xa8] ss:$16 sps:$4 sm:$0xff]  }
 0x1c6   :  { %5471 = vmatpush2.bf16.msra.mxu0 %v8108_v26  ;;  %v8990_v26 = vmov 0  }
 0x1c7   :  { %5512 = vmatpush2.bf16.msra.mxu1 %v8111_v29  ;;  %5472 = vmatprep.subr.bf16.mxu0 %v8116_v30 }
 0x1c8   :  { %5513 = vmatprep.subr.bf16.mxu1 %v8119_v32 }
 0x1ca   :  { %5473 = vmatpush2.bf16.msra.mxu0 %v8114_v33 }
 0x1cb   :  { %5514 = vmatpush2.bf16.msra.mxu1 %v8117_v31  ;;  %5474 = vmatprep.subr.bf16.mxu0 %v8122_v34  ;;  %v8162_v31 = vld [vmem:[#allocation5 + $0x1884] ss:$16 sps:$4 sm:$0xff]   ;;  %v8165_v34 = vld [vmem:[#allocation5 + $0x8c] ss:$16 sps:$4 sm:$0xff]  }
 0x1cc   :  { %5515 = vmatprep.subr.bf16.mxu1 %v8125_v41  ;;  %v8163_v41 = vld [vmem:[#allocation5 + $0x88] ss:$16 sps:$4 sm:$0xff]  }
 0x1ce   :  { %5475 = vmatpush2.bf16.msra.mxu0 %v8120_v42  ;;  %v8168_v42 = vld [vmem:[#allocation5 + $0x1864] ss:$16 sps:$4 sm:$0xff]  }
 0x1cf   :  { %5516 = vmatpush2.bf16.msra.mxu1 %v8123_v43  ;;  %5476 = vmatprep.subr.bf16.mxu0 %v8128_v23  ;;  %v8166_v43 = vld [vmem:[#allocation5 + $0x1860] ss:$16 sps:$4 sm:$0xff]   ;;  %v8169_v23 = vld [vmem:[#allocation5 + $0x68] ss:$16 sps:$4 sm:$0xff]  }
 0x1d0   :  { %5517 = vmatprep.subr.bf16.mxu1 %v8131_v45  ;;  %v8174_v45 = vld [vmem:[#allocation5 + $0x1844] ss:$16 sps:$4 sm:$0xff]  }
 0x1d2   :  { %5477 = vmatpush2.bf16.msra.mxu0 %v8126_v46  ;;  %v8177_v46 = vld [vmem:[#allocation5 + $0x4c] ss:$16 sps:$4 sm:$0xff]  }
 0x1d3   :  { %5518 = vmatpush2.bf16.msra.mxu1 %v8129_v48  ;;  %5478 = vmatprep.subr.bf16.mxu0 %v8134_v49  ;;  %v8172_v48 = vld [vmem:[#allocation5 + $0x1840] ss:$16 sps:$4 sm:$0xff]   ;;  %v8175_v49 = vld [vmem:[#allocation5 + $0x48] ss:$16 sps:$4 sm:$0xff]  }
 0x1d4   :  { %5519 = vmatprep.subr.bf16.mxu1 %v8137_v50  ;;  %v8180_v50 = vld [vmem:[#allocation5 + $0x1824] ss:$16 sps:$4 sm:$0xff]  }
 0x1d6   :  { %5479 = vmatpush2.bf16.msra.mxu0 %v8132_v52  ;;  %v8183_v52 = vld [vmem:[#allocation5 + $0x2c] ss:$16 sps:$4 sm:$0xff]  }
 0x1d7   :  { %5520 = vmatpush2.bf16.msra.mxu1 %v8135_v53  ;;  %5530 = vmatprep.subr.bf16.mxu0 %v8144_v55  ;;  %v8178_v53 = vld [vmem:[#allocation5 + $0x1820] ss:$16 sps:$4 sm:$0xff]   ;;  %v8181_v55 = vld [vmem:[#allocation5 + $0x28] ss:$16 sps:$4 sm:$0xff]  }
 0x1d8   :  { %5571 = vmatprep.subr.bf16.mxu1 %v8147_v56  ;;  %v8186_v56 = vld [vmem:[#allocation5 + $0x1804] ss:$16 sps:$4 sm:$0xff]  }
 0x1d9   :  { %v5236_v3 = vpop.f32.mrf.mxu0  ;;  %5481 = vmatmul.mubr.bf16.vlgmr.msra.gmra.mxu0 %v9193_v63 }
 0x1da   :  { %v5277_v12 = vpop.f32.mrf.mxu1  ;;  %5522 = vmatmul.mubr.bf16.vlgmr.msra.gmra.mxu1 %v9197_v4  ;;  %v5237_v57 = vadd.f32 %v5236_v3, %v9184_v18  ;;  %5531 = vmatpush1.bf16.msra.mxu0 %v8142_v59  ;;  %v8189_v59 = vld [vmem:[#allocation5 + $0xc] ss:$16 sps:$4 sm:$0xff]   ;;  %v8191_v3 = vld [vmem:[#allocation5 + $0x1e8] ss:$16 sps:$4 sm:$0xff]  }
 0x1db   :  { %5572 = vmatpush1.bf16.msra.mxu1 %v8145_v60  ;;  %v5238_v58 = vpop.f32.mrf.mxu0  ;;  %5532 = vmatprep.subr.bf16.mxu0 %v8150_v5  ;;  %v8184_v60 = vld [vmem:[#allocation5 + $0x1800] ss:$16 sps:$4 sm:$0xff]   ;;  %v8187_v5 = vld [vmem:[#allocation5 + $0x8] ss:$16 sps:$4 sm:$0xff]  }
 0x1dc   :  { %v5279_v13 = vpop.f32.mrf.mxu1  ;;  %5573 = vmatprep.subr.bf16.mxu1 %v8153_v8  ;;  %v9202_v19 = vadd.f32 %v5277_v12, %v5237_v57  ;;  %v5239_v20 = vadd.f32 %v5238_v58, %v9189_v28  ;;  %5562 = vmatprep.mubr.bf16.mxu0 %v8990_v26  ;;  %v8160_v28 = vld [vmem:[#allocation5 + $0x1880] ss:$16 sps:$4 sm:$0xff]   ;;  %v8190_v8 = vld [vmem:[#allocation2 + $0x60] ss:$0 sps:$4 sm:$0xff]   ;;  %v8194_v12 = vld [vmem:[#allocation5 + $0x2e8] ss:$16 sps:$4 sm:$0xff]  }
 0x1dd   :  { %5603 = vmatprep.mubr.bf16.mxu1 %v9055_v47  ;;  %v5240_v18 = vpop.f32.mrf.mxu0  ;;  %v8171_v47 = vld [vmem:[#allocation5 + $0x6c] ss:$16 sps:$4 sm:$0xff]  }
 0x1de   :  { %v5281_v29 = vpop.f32.mrf.mxu1  ;;  %v9207_v30 = vadd.f32 %v5279_v13, %v5239_v20  ;;  %5533 = vmatpush1.bf16.msra.mxu0 %v8148_v10  ;;  %v8193_v10 = vld [vmem:[#allocation5 + $0x1ec] ss:$16 sps:$4 sm:$0xff]   ;;  %v8197_v13 = vld [vmem:[#allocation5 + $0x1c8] ss:$16 sps:$4 sm:$0xff]  }
 0x1df   :  { %5574 = vmatpush1.bf16.msra.mxu1 %v8151_v11  ;;  %v5241_v32 = vpop.f32.mrf.mxu0  ;;  %5534 = vmatprep.subr.bf16.mxu0 %v8156_v14  ;;  %v8196_v11 = vld [vmem:[#allocation5 + $0x2ec] ss:$16 sps:$4 sm:$0xff]   ;;  %v8200_v14 = vld [vmem:[#allocation5 + $0x2c8] ss:$16 sps:$4 sm:$0xff]  }
 0x1e0   :  { %v5282_v33 = vpop.f32.mrf.mxu1  ;;  %5575 = vmatprep.subr.bf16.mxu1 %v8159_v15  ;;  %v8199_v57 = vld [vmem:[#allocation5 + $0x1cc] ss:$16 sps:$4 sm:$0xff]   ;;  %v8209_v32 = vld [vmem:[#allocation5 + $0x188] ss:$16 sps:$4 sm:$0xff]  }
 0x1e1   :  { %v8202_v58 = vld [vmem:[#allocation5 + $0x2cc] ss:$16 sps:$4 sm:$0xff]   ;;  %v8212_v33 = vld [vmem:[#allocation5 + $0x288] ss:$16 sps:$4 sm:$0xff]  }
 0x1e2   :  { %5535 = vmatpush1.bf16.msra.mxu0 %v8154_v21  ;;  %v8205_v15 = vld [vmem:[#allocation5 + $0x1ac] ss:$16 sps:$4 sm:$0xff]   ;;  %v8203_v21 = vld [vmem:[#allocation5 + $0x1a8] ss:$16 sps:$4 sm:$0xff]  }
 0x1e3   :  { %5576 = vmatpush1.bf16.msra.mxu1 %v8157_v27  ;;  %5536 = vmatprep.subr.bf16.mxu0 %v8162_v31  ;;  %v8208_v20 = vld [vmem:[#allocation5 + $0x2ac] ss:$16 sps:$4 sm:$0xff]   ;;  %v8206_v27 = vld [vmem:[#allocation5 + $0x2a8] ss:$16 sps:$4 sm:$0xff]  }
 0x1e4   :  { %5577 = vmatprep.subr.bf16.mxu1 %v8165_v34  ;;  %v8211_v18 = vld [vmem:[#allocation5 + $0x18c] ss:$16 sps:$4 sm:$0xff]  }
 0x1e5   :  { %v8214_v29 = vld [vmem:[#allocation5 + $0x28c] ss:$16 sps:$4 sm:$0xff]  }
 0x1e6   :  { %5537 = vmatpush1.bf16.msra.mxu0 %v8160_v28  ;;  %v8217_v31 = vld [vmem:[#allocation5 + $0x16c] ss:$16 sps:$4 sm:$0xff]   ;;  %v8215_v28 = vld [vmem:[#allocation5 + $0x168] ss:$16 sps:$4 sm:$0xff]  }
 0x1e7   :  { %5578 = vmatpush1.bf16.msra.mxu1 %v8163_v41  ;;  %5538 = vmatprep.subr.bf16.mxu0 %v8168_v42  ;;  %v8220_v34 = vld [vmem:[#allocation5 + $0x26c] ss:$16 sps:$4 sm:$0xff]  }
 0x1e8   :  { %5579 = vmatprep.subr.bf16.mxu1 %v8171_v47  ;;  %v8223_v41 = vld [vmem:[#allocation5 + $0x14c] ss:$16 sps:$4 sm:$0xff]   ;;  %v8221_v47 = vld [vmem:[#allocation5 + $0x148] ss:$16 sps:$4 sm:$0xff]  }
 0x1e9   :  { %v8226_v42 = vld [vmem:[#allocation5 + $0x24c] ss:$16 sps:$4 sm:$0xff]  }
 0x1ea   :  { %5539 = vmatpush1.bf16.msra.mxu0 %v8166_v43  ;;  %v8224_v43 = vld [vmem:[#allocation5 + $0x248] ss:$16 sps:$4 sm:$0xff]  }
 0x1eb   :  { %5580 = vmatpush1.bf16.msra.mxu1 %v8169_v23  ;;  %5540 = vmatprep.subr.bf16.mxu0 %v8174_v45  ;;  %v8229_v23 = vld [vmem:[#allocation5 + $0x12c] ss:$16 sps:$4 sm:$0xff]  }
 0x1ec   :  { %5581 = vmatprep.subr.bf16.mxu1 %v8177_v46  ;;  %v8232_v45 = vld [vmem:[#allocation5 + $0x22c] ss:$16 sps:$4 sm:$0xff]   ;;  %v8227_v46 = vld [vmem:[#allocation5 + $0x128] ss:$16 sps:$4 sm:$0xff]  }
 0x1ee   :  { %5541 = vmatpush1.bf16.msra.mxu0 %v8172_v48  ;;  %v8230_v48 = vld [vmem:[#allocation5 + $0x228] ss:$16 sps:$4 sm:$0xff]  }
 0x1ef   :  { %5582 = vmatpush1.bf16.msra.mxu1 %v8175_v49  ;;  %5542 = vmatprep.subr.bf16.mxu0 %v8180_v50  ;;  %v8235_v49 = vld [vmem:[#allocation5 + $0x10c] ss:$16 sps:$4 sm:$0xff]  }
 0x1f0   :  { %5583 = vmatprep.subr.bf16.mxu1 %v8183_v52  ;;  %v8238_v50 = vld [vmem:[#allocation5 + $0x20c] ss:$16 sps:$4 sm:$0xff]   ;;  %v8233_v52 = vld [vmem:[#allocation5 + $0x108] ss:$16 sps:$4 sm:$0xff]  }
 0x1f2   :  { %5543 = vmatpush1.bf16.msra.mxu0 %v8178_v53  ;;  %v8236_v53 = vld [vmem:[#allocation5 + $0x208] ss:$16 sps:$4 sm:$0xff]  }
 0x1f3   :  { %5584 = vmatpush1.bf16.msra.mxu1 %v8181_v55  ;;  %5544 = vmatprep.subr.bf16.mxu0 %v8186_v56  ;;  %v8241_v55 = vld [vmem:[#allocation5 + $0x3ec] ss:$16 sps:$4 sm:$0xff]  }
 0x1f4   :  { %5585 = vmatprep.subr.bf16.mxu1 %v8189_v59  ;;  %v8244_v56 = vld [vmem:[#allocation5 + $0x4ec] ss:$16 sps:$4 sm:$0xff]   ;;  %v8239_v59 = vld [vmem:[#allocation5 + $0x3e8] ss:$16 sps:$4 sm:$0xff]  }
 0x1f6   :  { %5545 = vmatpush1.bf16.msra.mxu0 %v8184_v60  ;;  %v8242_v60 = vld [vmem:[#allocation5 + $0x4e8] ss:$16 sps:$4 sm:$0xff]  }
 0x1f7   :  { %5586 = vmatpush1.bf16.msra.mxu1 %v8187_v5  ;;  %5612 = vmatprep.subr.bf16.mxu0 %v8196_v11  ;;  %v8247_v5 = vld [vmem:[#allocation5 + $0x3cc] ss:$16 sps:$4 sm:$0xff]   ;;  %v8248_v11 = vld [vmem:[#allocation5 + $0x4c8] ss:$16 sps:$4 sm:$0xff]  }
 0x1f8   :  { %5587 = vmatprep.subr.bf16.mxu1 %v8193_v10  ;;  %v8245_v10 = vld [vmem:[#allocation5 + $0x3c8] ss:$16 sps:$4 sm:$0xff]  }
 0x1f9   :  { %5563 = vmatmul.mubr.bf16.vlgmr.msra.gmra.mxu0 %v8190_v8  ;;  %v8250_v8 = vld [vmem:[#allocation5 + $0x4cc] ss:$16 sps:$4 sm:$0xff]  }
 0x1fa   :  { %5613 = vmatpush1.bf16.msra.mxu0 %v8194_v12  ;;  %5644 = vmatprep.mubr.bf16.mxu0 %v9057_v51  ;;  %v8218_v51 = vld [vmem:[#allocation5 + $0x268] ss:$16 sps:$4 sm:$0xff]  }
 0x1fb   :  { %5588 = vmatpush2.bf16.msra.mxu1 %v8191_v3  ;;  %5614 = vmatprep.subr.bf16.mxu0 %v8202_v58 }
 0x1fc   :  { %5589 = vmatprep.subr.bf16.mxu1 %v8199_v57 }
 0x1fe   :  { %5615 = vmatpush1.bf16.msra.mxu0 %v8200_v14  ;;  %v8253_v14 = vld [vmem:[#allocation5 + $0x3ac] ss:$16 sps:$4 sm:$0xff]  }
 0x1ff   :  { %5590 = vmatpush2.bf16.msra.mxu1 %v8197_v13  ;;  %5616 = vmatprep.subr.bf16.mxu0 %v8208_v20 }
 0x200   :  { %5591 = vmatprep.subr.bf16.mxu1 %v8205_v15  ;;  %v8256_v15 = vld [vmem:[#allocation5 + $0x4ac] ss:$16 sps:$4 sm:$0xff]  }
 0x202   :  { %5617 = vmatpush1.bf16.msra.mxu0 %v8206_v27  ;;  %v8251_v27 = vld [vmem:[#allocation5 + $0x3a8] ss:$16 sps:$4 sm:$0xff]  }
 0x203   :  { %5592 = vmatpush2.bf16.msra.mxu1 %v8203_v21  ;;  %5618 = vmatprep.subr.bf16.mxu0 %v8214_v29 }
 0x204   :  { %5593 = vmatprep.subr.bf16.mxu1 %v8211_v18  ;;  %v8254_v18 = vld [vmem:[#allocation5 + $0x4a8] ss:$16 sps:$4 sm:$0xff]  }
 0x206   :  { %5619 = vmatpush1.bf16.msra.mxu0 %v8212_v33 }
 0x207   :  { %5594 = vmatpush2.bf16.msra.mxu1 %v8209_v32  ;;  %5620 = vmatprep.subr.bf16.mxu0 %v8220_v34  ;;  %v8262_v34 = vld [vmem:[#allocation5 + $0x48c] ss:$16 sps:$4 sm:$0xff]  }
 0x208   :  { %5595 = vmatprep.subr.bf16.mxu1 %v8217_v31  ;;  %v8259_v31 = vld [vmem:[#allocation5 + $0x38c] ss:$16 sps:$4 sm:$0xff]  }
 0x20a   :  { %5621 = vmatpush1.bf16.msra.mxu0 %v8218_v51  ;;  %v8265_v51 = vld [vmem:[#allocation5 + $0x36c] ss:$16 sps:$4 sm:$0xff]  }
 0x20b   :  { %5596 = vmatpush2.bf16.msra.mxu1 %v8215_v28  ;;  %5622 = vmatprep.subr.bf16.mxu0 %v8226_v42  ;;  %v8257_v28 = vld [vmem:[#allocation5 + $0x388] ss:$16 sps:$4 sm:$0xff]  }
 0x20c   :  { %5597 = vmatprep.subr.bf16.mxu1 %v8223_v41  ;;  %v8263_v41 = vld [vmem:[#allocation5 + $0x368] ss:$16 sps:$4 sm:$0xff]  }
 0x20d   :  { %v8266_v42 = vld [vmem:[#allocation5 + $0x468] ss:$16 sps:$4 sm:$0xff]  }
 0x20e   :  { %5623 = vmatpush1.bf16.msra.mxu0 %v8224_v43  ;;  %v8274_v43 = vld [vmem:[#allocation5 + $0x44c] ss:$16 sps:$4 sm:$0xff]  }
 0x20f   :  { %5598 = vmatpush2.bf16.msra.mxu1 %v8221_v47  ;;  %5624 = vmatprep.subr.bf16.mxu0 %v8232_v45  ;;  %v8271_v47 = vld [vmem:[#allocation5 + $0x34c] ss:$16 sps:$4 sm:$0xff]   ;;  %v8272_v45 = vld [vmem:[#allocation5 + $0x448] ss:$16 sps:$4 sm:$0xff]  }
 0x210   :  { %5599 = vmatprep.subr.bf16.mxu1 %v8229_v23  ;;  %v8269_v23 = vld [vmem:[#allocation5 + $0x348] ss:$16 sps:$4 sm:$0xff]  }
 0x212   :  { %5625 = vmatpush1.bf16.msra.mxu0 %v8230_v48  ;;  %v8280_v48 = vld [vmem:[#allocation5 + $0x42c] ss:$16 sps:$4 sm:$0xff]  }
 0x213   :  { %5600 = vmatpush2.bf16.msra.mxu1 %v8227_v46  ;;  %5626 = vmatprep.subr.bf16.mxu0 %v8238_v50  ;;  %v8277_v46 = vld [vmem:[#allocation5 + $0x32c] ss:$16 sps:$4 sm:$0xff]   ;;  %v8278_v50 = vld [vmem:[#allocation5 + $0x428] ss:$16 sps:$4 sm:$0xff]  }
 0x214   :  { %5601 = vmatprep.subr.bf16.mxu1 %v8235_v49  ;;  %v8275_v49 = vld [vmem:[#allocation5 + $0x328] ss:$16 sps:$4 sm:$0xff]  }
 0x216   :  { %5627 = vmatpush1.bf16.msra.mxu0 %v8236_v53  ;;  %v8286_v53 = vld [vmem:[#allocation5 + $0x40c] ss:$16 sps:$4 sm:$0xff]  }
 0x217   :  { %5602 = vmatpush2.bf16.msra.mxu1 %v8233_v52  ;;  %5628 = vmatprep.subr.bf16.mxu0 %v8241_v55  ;;  %v8283_v52 = vld [vmem:[#allocation5 + $0x30c] ss:$16 sps:$4 sm:$0xff]   ;;  %v8281_v55 = vld [vmem:[#allocation5 + $0x308] ss:$16 sps:$4 sm:$0xff]  }
 0x218   :  { %5653 = vmatprep.subr.bf16.mxu1 %v8244_v56  ;;  %v8284_v56 = vld [vmem:[#allocation5 + $0x408] ss:$16 sps:$4 sm:$0xff]  }
 0x219   :  { %v5318_v3 = vpop.f32.mrf.mxu0 }
 0x21a   :  { %v5359_v12 = vpop.f32.mrf.mxu1  ;;  %5604 = vmatmul.mubr.bf16.vlgmr.msra.gmra.mxu1 %v9061_v6  ;;  %v5319_v57 = vadd.f32 %v5318_v3, %v9202_v19  ;;  %5629 = vmatpush2.bf16.msra.mxu0 %v8239_v59  ;;  %v8289_v59 = vld [vmem:[#allocation5 + $0x5ec] ss:$16 sps:$4 sm:$0xff]   ;;  %v8293_v3 = vld [vmem:[#allocation5 + $0x5c8] ss:$16 sps:$4 sm:$0xff]  }
 0x21b   :  { %5654 = vmatpush1.bf16.msra.mxu1 %v8242_v60  ;;  %v5320_v58 = vpop.f32.mrf.mxu0  ;;  %5630 = vmatprep.subr.bf16.mxu0 %v8247_v5  ;;  %v8292_v60 = vld [vmem:[#allocation5 + $0x6ec] ss:$16 sps:$4 sm:$0xff]   ;;  %v8287_v5 = vld [vmem:[#allocation5 + $0x5e8] ss:$16 sps:$4 sm:$0xff]  }
 0x21c   :  { %v5361_v13 = vpop.f32.mrf.mxu1  ;;  %5655 = vmatprep.subr.bf16.mxu1 %v8250_v8  ;;  %v9212_v20 = vadd.f32 %v5359_v12, %v5319_v57  ;;  %v5321_v21 = vadd.f32 %v5320_v58, %v9207_v30  ;;  %5685 = vmatprep.mubr.bf16.mxu1 %v9073_v36  ;;  %v8260_v30 = vld [vmem:[#allocation5 + $0x488] ss:$16 sps:$4 sm:$0xff]   ;;  %v8268_v36 = vld [vmem:[#allocation5 + $0x46c] ss:$16 sps:$4 sm:$0xff]  }
 0x21d   :  { %v5322_v29 = vpop.f32.mrf.mxu0  ;;  %v8290_v8 = vld [vmem:[#allocation5 + $0x6e8] ss:$16 sps:$4 sm:$0xff]   ;;  %v8301_v57 = vld [vmem:[#allocation5 + $0x5ac] ss:$16 sps:$4 sm:$0xff]  }
 0x21e   :  { %v5363_v6 = vpop.f32.mrf.mxu1  ;;  %v9216_v32 = vadd.f32 %v5361_v13, %v5321_v21  ;;  %5631 = vmatpush2.bf16.msra.mxu0 %v8245_v10  ;;  %v8295_v10 = vld [vmem:[#allocation5 + $0x5cc] ss:$16 sps:$4 sm:$0xff]   ;;  %v8296_v12 = vld [vmem:[#allocation5 + $0x6c8] ss:$16 sps:$4 sm:$0xff]  }
 0x21f   :  { %5656 = vmatpush1.bf16.msra.mxu1 %v8248_v11  ;;  %v5323_v19 = vpop.f32.mrf.mxu0  ;;  %5632 = vmatprep.subr.bf16.mxu0 %v8253_v14  ;;  %v8298_v11 = vld [vmem:[#allocation5 + $0x6cc] ss:$16 sps:$4 sm:$0xff]   ;;  %v8299_v13 = vld [vmem:[#allocation5 + $0x5a8] ss:$16 sps:$4 sm:$0xff]  }
 0x220   :  { %v5364_v33 = vpop.f32.mrf.mxu1  ;;  %5657 = vmatprep.subr.bf16.mxu1 %v8256_v15  ;;  %v8304_v58 = vld [vmem:[#allocation5 + $0x6ac] ss:$16 sps:$4 sm:$0xff]   ;;  %v8302_v14 = vld [vmem:[#allocation5 + $0x6a8] ss:$16 sps:$4 sm:$0xff]  }
 0x221   :  { %v8307_v15 = vld [vmem:[#allocation5 + $0x58c] ss:$16 sps:$4 sm:$0xff]   ;;  %v8311_v6 = vld [vmem:[#allocation5 + $0x568] ss:$16 sps:$4 sm:$0xff]  }
 0x222   :  { %5633 = vmatpush2.bf16.msra.mxu0 %v8251_v27  ;;  %v8310_v21 = vld [vmem:[#allocation5 + $0x68c] ss:$16 sps:$4 sm:$0xff]   ;;  %v8305_v27 = vld [vmem:[#allocation5 + $0x588] ss:$16 sps:$4 sm:$0xff]  }
 0x223   :  { %5658 = vmatpush1.bf16.msra.mxu1 %v8254_v18  ;;  %5634 = vmatprep.subr.bf16.mxu0 %v8259_v31  ;;  %v8313_v18 = vld [vmem:[#allocation5 + $0x56c] ss:$16 sps:$4 sm:$0xff]   ;;  %v8314_v19 = vld [vmem:[#allocation5 + $0x668] ss:$16 sps:$4 sm:$0xff]  }
 0x224   :  { %5659 = vmatprep.subr.bf16.mxu1 %v8262_v34  ;;  %v8316_v29 = vld [vmem:[#allocation5 + $0x66c] ss:$16 sps:$4 sm:$0xff]   ;;  %v8317_v31 = vld [vmem:[#allocation5 + $0x548] ss:$16 sps:$4 sm:$0xff]  }
 0x225   :  { %v8322_v33 = vld [vmem:[#allocation5 + $0x64c] ss:$16 sps:$4 sm:$0xff]   ;;  %v8320_v34 = vld [vmem:[#allocation5 + $0x648] ss:$16 sps:$4 sm:$0xff]  }
 0x226   :  { %5635 = vmatpush2.bf16.msra.mxu0 %v8257_v28  ;;  %v8325_v28 = vld [vmem:[#allocation5 + $0x52c] ss:$16 sps:$4 sm:$0xff]  }
 0x227   :  { %5660 = vmatpush1.bf16.msra.mxu1 %v8260_v30  ;;  %5636 = vmatprep.subr.bf16.mxu0 %v8265_v51  ;;  %v8328_v30 = vld [vmem:[#allocation5 + $0x62c] ss:$16 sps:$4 sm:$0xff]   ;;  %v8323_v51 = vld [vmem:[#allocation5 + $0x528] ss:$16 sps:$4 sm:$0xff]  }
 0x228   :  { %5661 = vmatprep.subr.bf16.mxu1 %v8268_v36  ;;  %v8326_v36 = vld [vmem:[#allocation5 + $0x628] ss:$16 sps:$4 sm:$0xff]  }
 0x22a   :  { %5637 = vmatpush2.bf16.msra.mxu0 %v8263_v41  ;;  %v8331_v41 = vld [vmem:[#allocation5 + $0x50c] ss:$16 sps:$4 sm:$0xff]  }
 0x22b   :  { %5662 = vmatpush1.bf16.msra.mxu1 %v8266_v42  ;;  %5638 = vmatprep.subr.bf16.mxu0 %v8271_v47  ;;  %v8334_v42 = vld [vmem:[#allocation5 + $0x60c] ss:$16 sps:$4 sm:$0xff]   ;;  %v8329_v47 = vld [vmem:[#allocation5 + $0x508] ss:$16 sps:$4 sm:$0xff]  }
 0x22c   :  { %5663 = vmatprep.subr.bf16.mxu1 %v8274_v43  ;;  %v8332_v43 = vld [vmem:[#allocation5 + $0x608] ss:$16 sps:$4 sm:$0xff]  }
 0x22e   :  { %5639 = vmatpush2.bf16.msra.mxu0 %v8269_v23  ;;  %v8337_v23 = vld [vmem:[#allocation5 + $0x7ec] ss:$16 sps:$4 sm:$0xff]  }
 0x22f   :  { %5664 = vmatpush1.bf16.msra.mxu1 %v8272_v45  ;;  %5640 = vmatprep.subr.bf16.mxu0 %v8277_v46  ;;  %v8340_v45 = vld [vmem:[#allocation5 + $0x8ec] ss:$16 sps:$4 sm:$0xff]   ;;  %v8335_v46 = vld [vmem:[#allocation5 + $0x7e8] ss:$16 sps:$4 sm:$0xff]  }
 0x230   :  { %5665 = vmatprep.subr.bf16.mxu1 %v8280_v48  ;;  %v8338_v48 = vld [vmem:[#allocation5 + $0x8e8] ss:$16 sps:$4 sm:$0xff]  }
 0x232   :  { %5641 = vmatpush2.bf16.msra.mxu0 %v8275_v49  ;;  %v8343_v49 = vld [vmem:[#allocation5 + $0x7cc] ss:$16 sps:$4 sm:$0xff]  }
 0x233   :  { %5666 = vmatpush1.bf16.msra.mxu1 %v8278_v50  ;;  %5642 = vmatprep.subr.bf16.mxu0 %v8283_v52  ;;  %v8346_v50 = vld [vmem:[#allocation5 + $0x8cc] ss:$16 sps:$4 sm:$0xff]  }
 0x234   :  { %5667 = vmatprep.subr.bf16.mxu1 %v8286_v53 }
 0x236   :  { %5643 = vmatpush2.bf16.msra.mxu0 %v8281_v55 }
 0x237   :  { %5668 = vmatpush1.bf16.msra.mxu1 %v8284_v56  ;;  %5694 = vmatprep.subr.bf16.mxu0 %v8292_v60  ;;  %v8341_v56 = vld [vmem:[#allocation5 + $0x7c8] ss:$16 sps:$4 sm:$0xff]  }
 0x238   :  { %5669 = vmatprep.subr.bf16.mxu1 %v8289_v59  ;;  %v8344_v59 = vld [vmem:[#allocation5 + $0x8c8] ss:$16 sps:$4 sm:$0xff]  }
 0x239   :  { %5645 = vmatmul.mubr.bf16.vlgmr.msra.gmra.mxu0 %v9063_v7  ;;  %v8308_v7 = vld [vmem:[#allocation5 + $0x688] ss:$16 sps:$4 sm:$0xff]  }
 0x23a   :  { %5695 = vmatpush1.bf16.msra.mxu0 %v8290_v8  ;;  %5726 = vmatprep.mubr.bf16.mxu0 %v9077_v37  ;;  %v8319_v37 = vld [vmem:[#allocation5 + $0x54c] ss:$16 sps:$4 sm:$0xff]  }
 0x23b   :  { %5670 = vmatpush2.bf16.msra.mxu1 %v8287_v5  ;;  %5696 = vmatprep.subr.bf16.mxu0 %v8298_v11  ;;  %v8349_v8 = vld [vmem:[#allocation5 + $0x7ac] ss:$16 sps:$4 sm:$0xff]  }
 0x23c   :  { %5671 = vmatprep.subr.bf16.mxu1 %v8295_v10  ;;  %v8352_v10 = vld [vmem:[#allocation5 + $0x8ac] ss:$16 sps:$4 sm:$0xff]  }
 0x23e   :  { %5697 = vmatpush1.bf16.msra.mxu0 %v8296_v12 }
 0x23f   :  { %5672 = vmatpush2.bf16.msra.mxu1 %v8293_v3  ;;  %5698 = vmatprep.subr.bf16.mxu0 %v8304_v58  ;;  %v8350_v58 = vld [vmem:[#allocation5 + $0x8a8] ss:$16 sps:$4 sm:$0xff]  }
 0x240   :  { %5673 = vmatprep.subr.bf16.mxu1 %v8301_v57 }
 0x242   :  { %5699 = vmatpush1.bf16.msra.mxu0 %v8302_v14 }
 0x243   :  { %5674 = vmatpush2.bf16.msra.mxu1 %v8299_v13  ;;  %5700 = vmatprep.subr.bf16.mxu0 %v8310_v21  ;;  %v8358_v21 = vld [vmem:[#allocation5 + $0x88c] ss:$16 sps:$4 sm:$0xff]  }
 0x244   :  { %5675 = vmatprep.subr.bf16.mxu1 %v8307_v15  ;;  %v8355_v15 = vld [vmem:[#allocation5 + $0x78c] ss:$16 sps:$4 sm:$0xff]  }
 0x246   :  { %5701 = vmatpush1.bf16.msra.mxu0 %v8308_v7  ;;  %v8364_v7 = vld [vmem:[#allocation5 + $0x86c] ss:$16 sps:$4 sm:$0xff]  }
 0x247   :  { %5676 = vmatpush2.bf16.msra.mxu1 %v8305_v27  ;;  %5702 = vmatprep.subr.bf16.mxu0 %v8316_v29  ;;  %v8353_v27 = vld [vmem:[#allocation5 + $0x788] ss:$16 sps:$4 sm:$0xff]  }
 0x248   :  { %5677 = vmatprep.subr.bf16.mxu1 %v8313_v18  ;;  %v8359_v18 = vld [vmem:[#allocation5 + $0x768] ss:$16 sps:$4 sm:$0xff]  }
 0x249   :  { %v8362_v29 = vld [vmem:[#allocation5 + $0x868] ss:$16 sps:$4 sm:$0xff]  }
 0x24a   :  { %5703 = vmatpush1.bf16.msra.mxu0 %v8314_v19  ;;  %v8370_v19 = vld [vmem:[#allocation5 + $0x84c] ss:$16 sps:$4 sm:$0xff]  }
 0x24b   :  { %5678 = vmatpush2.bf16.msra.mxu1 %v8311_v6  ;;  %5704 = vmatprep.subr.bf16.mxu0 %v8322_v33  ;;  %v8367_v6 = vld [vmem:[#allocation5 + $0x74c] ss:$16 sps:$4 sm:$0xff]   ;;  %v8368_v33 = vld [vmem:[#allocation5 + $0x848] ss:$16 sps:$4 sm:$0xff]  }
 0x24c   :  { %5679 = vmatprep.subr.bf16.mxu1 %v8319_v37  ;;  %v8365_v37 = vld [vmem:[#allocation5 + $0x748] ss:$16 sps:$4 sm:$0xff]  }
 0x24e   :  { %5705 = vmatpush1.bf16.msra.mxu0 %v8320_v34  ;;  %v8376_v34 = vld [vmem:[#allocation5 + $0x82c] ss:$16 sps:$4 sm:$0xff]  }
 0x24f   :  { %5680 = vmatpush2.bf16.msra.mxu1 %v8317_v31  ;;  %5706 = vmatprep.subr.bf16.mxu0 %v8328_v30  ;;  %v8373_v31 = vld [vmem:[#allocation5 + $0x72c] ss:$16 sps:$4 sm:$0xff]   ;;  %v8374_v30 = vld [vmem:[#allocation5 + $0x828] ss:$16 sps:$4 sm:$0xff]  }
 0x250   :  { %5681 = vmatprep.subr.bf16.mxu1 %v8325_v28  ;;  %v8371_v28 = vld [vmem:[#allocation5 + $0x728] ss:$16 sps:$4 sm:$0xff]  }
 0x252   :  { %5707 = vmatpush1.bf16.msra.mxu0 %v8326_v36  ;;  %v8382_v36 = vld [vmem:[#allocation5 + $0x80c] ss:$16 sps:$4 sm:$0xff]  }
 0x253   :  { %5682 = vmatpush2.bf16.msra.mxu1 %v8323_v51  ;;  %5708 = vmatprep.subr.bf16.mxu0 %v8334_v42  ;;  %v8379_v51 = vld [vmem:[#allocation5 + $0x70c] ss:$16 sps:$4 sm:$0xff]   ;;  %v8380_v42 = vld [vmem:[#allocation5 + $0x808] ss:$16 sps:$4 sm:$0xff]  }
 0x254   :  { %5683 = vmatprep.subr.bf16.mxu1 %v8331_v41  ;;  %v8377_v41 = vld [vmem:[#allocation5 + $0x708] ss:$16 sps:$4 sm:$0xff]  }
 0x256   :  { %5709 = vmatpush1.bf16.msra.mxu0 %v8332_v43  ;;  %v8388_v43 = vld [vmem:[#allocation5 + $0xaec] ss:$16 sps:$4 sm:$0xff]  }
 0x257   :  { %5684 = vmatpush2.bf16.msra.mxu1 %v8329_v47  ;;  %5710 = vmatprep.subr.bf16.mxu0 %v8337_v23  ;;  %v8385_v47 = vld [vmem:[#allocation5 + $0x9ec] ss:$16 sps:$4 sm:$0xff]   ;;  %v8383_v23 = vld [vmem:[#allocation5 + $0x9e8] ss:$16 sps:$4 sm:$0xff]  }
 0x258   :  { %5735 = vmatprep.subr.bf16.mxu1 %v8340_v45  ;;  %v8386_v45 = vld [vmem:[#allocation5 + $0xae8] ss:$16 sps:$4 sm:$0xff]  }
 0x259   :  { %v5400_v52 = vpop.f32.mrf.mxu0 }
 0x25a   :  { %v5441_v53 = vpop.f32.mrf.mxu1  ;;  %5686 = vmatmul.mubr.bf16.vlgmr.msra.gmra.mxu1 %v9083_v16  ;;  %v5401_v55 = vadd.f32 %v5400_v52, %v9212_v20  ;;  %5711 = vmatpush2.bf16.msra.mxu0 %v8335_v46  ;;  %v8347_v20 = vld [vmem:[#allocation5 + $0x7a8] ss:$16 sps:$4 sm:$0xff]   ;;  %v8391_v46 = vld [vmem:[#allocation5 + $0x9cc] ss:$16 sps:$4 sm:$0xff]  }
 0x25b   :  { %5736 = vmatpush1.bf16.msra.mxu1 %v8338_v48  ;;  %v5402_v60 = vpop.f32.mrf.mxu0  ;;  %5712 = vmatprep.subr.bf16.mxu0 %v8343_v49  ;;  %v8394_v48 = vld [vmem:[#allocation5 + $0xacc] ss:$16 sps:$4 sm:$0xff]   ;;  %v8389_v49 = vld [vmem:[#allocation5 + $0x9c8] ss:$16 sps:$4 sm:$0xff]  }
 0x25c   :  { %v5443_v5 = vpop.f32.mrf.mxu1  ;;  %5737 = vmatprep.subr.bf16.mxu1 %v8346_v50  ;;  %v9222_v11 = vadd.f32 %v5441_v53, %v5401_v55  ;;  %v5403_v3 = vadd.f32 %v5402_v60, %v9216_v32  ;;  %5767 = vmatprep.mubr.bf16.mxu1 %v9095_v24  ;;  %v8356_v32 = vld [vmem:[#allocation5 + $0x888] ss:$16 sps:$4 sm:$0xff]   ;;  %v8361_v24 = vld [vmem:[#allocation5 + $0x76c] ss:$16 sps:$4 sm:$0xff]  }
 0x25d   :  { %v5404_v12 = vpop.f32.mrf.mxu0  ;;  %v8392_v50 = vld [vmem:[#allocation5 + $0xac8] ss:$16 sps:$4 sm:$0xff]   ;;  %v8397_v52 = vld [vmem:[#allocation5 + $0x9ac] ss:$16 sps:$4 sm:$0xff]  }
 0x25e   :  { %v5445_v16 = vpop.f32.mrf.mxu1  ;;  %v9226_v57 = vadd.f32 %v5443_v5, %v5403_v3  ;;  %5713 = vmatpush2.bf16.msra.mxu0 %v8341_v56  ;;  %v8400_v53 = vld [vmem:[#allocation5 + $0xaac] ss:$16 sps:$4 sm:$0xff]   ;;  %v8395_v55 = vld [vmem:[#allocation5 + $0x9a8] ss:$16 sps:$4 sm:$0xff]  }
 0x25f   :  { %5738 = vmatpush1.bf16.msra.mxu1 %v8344_v59  ;;  %v5405_v13 = vpop.f32.mrf.mxu0  ;;  %5714 = vmatprep.subr.bf16.mxu0 %v8349_v8  ;;  %v8398_v56 = vld [vmem:[#allocation5 + $0xaa8] ss:$16 sps:$4 sm:$0xff]   ;;  %v8403_v59 = vld [vmem:[#allocation5 + $0x98c] ss:$16 sps:$4 sm:$0xff]  }
 0x260   :  { %v5446_v14 = vpop.f32.mrf.mxu1  ;;  %5739 = vmatprep.subr.bf16.mxu1 %v8352_v10  ;;  %v8406_v60 = vld [vmem:[#allocation5 + $0xa8c] ss:$16 sps:$4 sm:$0xff]   ;;  %v8404_v5 = vld [vmem:[#allocation5 + $0xa88] ss:$16 sps:$4 sm:$0xff]  }
 0x261   :  { %v8409_v8 = vld [vmem:[#allocation5 + $0x96c] ss:$16 sps:$4 sm:$0xff]   ;;  %v8407_v3 = vld [vmem:[#allocation5 + $0x968] ss:$16 sps:$4 sm:$0xff]  }
 0x262   :  { %5715 = vmatpush2.bf16.msra.mxu0 %v8347_v20  ;;  %v8412_v10 = vld [vmem:[#allocation5 + $0xa6c] ss:$16 sps:$4 sm:$0xff]   ;;  %v8413_v20 = vld [vmem:[#allocation5 + $0x948] ss:$16 sps:$4 sm:$0xff]  }
 0x263   :  { %5740 = vmatpush1.bf16.msra.mxu1 %v8350_v58  ;;  %5716 = vmatprep.subr.bf16.mxu0 %v8355_v15  ;;  %v8415_v12 = vld [vmem:[#allocation5 + $0x94c] ss:$16 sps:$4 sm:$0xff]   ;;  %v8416_v58 = vld [vmem:[#allocation5 + $0xa48] ss:$16 sps:$4 sm:$0xff]  }
 0x264   :  { %5741 = vmatprep.subr.bf16.mxu1 %v8358_v21  ;;  %v8418_v16 = vld [vmem:[#allocation5 + $0xa4c] ss:$16 sps:$4 sm:$0xff]   ;;  %v8419_v15 = vld [vmem:[#allocation5 + $0x928] ss:$16 sps:$4 sm:$0xff]  }
 0x265   :  { %v8421_v13 = vld [vmem:[#allocation5 + $0x92c] ss:$16 sps:$4 sm:$0xff]   ;;  %v8422_v21 = vld [vmem:[#allocation5 + $0xa28] ss:$16 sps:$4 sm:$0xff]  }
 0x266   :  { %5717 = vmatpush2.bf16.msra.mxu0 %v8353_v27  ;;  %v8424_v14 = vld [vmem:[#allocation5 + $0xa2c] ss:$16 sps:$4 sm:$0xff]  }
 0x267   :  { %5742 = vmatpush1.bf16.msra.mxu1 %v8356_v32  ;;  %5718 = vmatprep.subr.bf16.mxu0 %v8361_v24  ;;  %v8427_v27 = vld [vmem:[#allocation5 + $0x90c] ss:$16 sps:$4 sm:$0xff]   ;;  %v8425_v24 = vld [vmem:[#allocation5 + $0x908] ss:$16 sps:$4 sm:$0xff]  }
 0x268   :  { %5743 = vmatprep.subr.bf16.mxu1 %v8364_v7  ;;  %v8430_v32 = vld [vmem:[#allocation5 + $0xa0c] ss:$16 sps:$4 sm:$0xff]   ;;  %v8428_v7 = vld [vmem:[#allocation5 + $0xa08] ss:$16 sps:$4 sm:$0xff]  }
 0x26a   :  { %5719 = vmatpush2.bf16.msra.mxu0 %v8359_v18  ;;  %v8433_v18 = vld [vmem:[#allocation5 + $0xbec] ss:$16 sps:$4 sm:$0xff]  }
 0x26b   :  { %5744 = vmatpush1.bf16.msra.mxu1 %v8362_v29  ;;  %5720 = vmatprep.subr.bf16.mxu0 %v8367_v6  ;;  %v8436_v29 = vld [vmem:[#allocation5 + $0xcec] ss:$16 sps:$4 sm:$0xff]   ;;  %v8431_v6 = vld [vmem:[#allocation5 + $0xbe8] ss:$16 sps:$4 sm:$0xff]  }
 0x26c   :  { %5745 = vmatprep.subr.bf16.mxu1 %v8370_v19  ;;  %v8434_v19 = vld [vmem:[#allocation5 + $0xce8] ss:$16 sps:$4 sm:$0xff]  }
 0x26e   :  { %5721 = vmatpush2.bf16.msra.mxu0 %v8365_v37  ;;  %v8439_v37 = vld [vmem:[#allocation5 + $0xbcc] ss:$16 sps:$4 sm:$0xff]  }
 0x26f   :  { %5746 = vmatpush1.bf16.msra.mxu1 %v8368_v33  ;;  %5722 = vmatprep.subr.bf16.mxu0 %v8373_v31  ;;  %v8442_v33 = vld [vmem:[#allocation5 + $0xccc] ss:$16 sps:$4 sm:$0xff]  }
 0x270   :  { %5747 = vmatprep.subr.bf16.mxu1 %v8376_v34 }
 0x272   :  { %5723 = vmatpush2.bf16.msra.mxu0 %v8371_v28 }
 0x273   :  { %5748 = vmatpush1.bf16.msra.mxu1 %v8374_v30  ;;  %5724 = vmatprep.subr.bf16.mxu0 %v8379_v51  ;;  %v8437_v30 = vld [vmem:[#allocation5 + $0xbc8] ss:$16 sps:$4 sm:$0xff]  }
 0x274   :  { %5749 = vmatprep.subr.bf16.mxu1 %v8382_v36  ;;  %v8440_v51 = vld [vmem:[#allocation5 + $0xcc8] ss:$16 sps:$4 sm:$0xff]  }
 0x276   :  { %5725 = vmatpush2.bf16.msra.mxu0 %v8377_v41 }
 0x277   :  { %5750 = vmatpush1.bf16.msra.mxu1 %v8380_v42  ;;  %5776 = vmatprep.subr.bf16.mxu0 %v8388_v43  ;;  %v8445_v42 = vld [vmem:[#allocation5 + $0xbac] ss:$16 sps:$4 sm:$0xff]  }
 0x278   :  { %5751 = vmatprep.subr.bf16.mxu1 %v8385_v47  ;;  %v8448_v47 = vld [vmem:[#allocation5 + $0xcac] ss:$16 sps:$4 sm:$0xff]  }
 0x279   :  { %5727 = vmatmul.mubr.bf16.vlgmr.msra.gmra.mxu0 %v9087_v17  ;;  %v8401_v17 = vld [vmem:[#allocation5 + $0x988] ss:$16 sps:$4 sm:$0xff]  }
 0x27a   :  { %5777 = vmatpush1.bf16.msra.mxu0 %v8386_v45  ;;  %5808 = vmatprep.mubr.bf16.mxu0 %v9099_v25  ;;  %v8410_v25 = vld [vmem:[#allocation5 + $0xa68] ss:$16 sps:$4 sm:$0xff]  }
 0x27b   :  { %5752 = vmatpush2.bf16.msra.mxu1 %v8383_v23  ;;  %5778 = vmatprep.subr.bf16.mxu0 %v8394_v48  ;;  %v8446_v48 = vld [vmem:[#allocation5 + $0xca8] ss:$16 sps:$4 sm:$0xff]  }
 0x27c   :  { %5753 = vmatprep.subr.bf16.mxu1 %v8391_v46 }
 0x27e   :  { %5779 = vmatpush1.bf16.msra.mxu0 %v8392_v50 }
 0x27f   :  { %5754 = vmatpush2.bf16.msra.mxu1 %v8389_v49  ;;  %5780 = vmatprep.subr.bf16.mxu0 %v8400_v53  ;;  %v8454_v53 = vld [vmem:[#allocation5 + $0xc8c] ss:$16 sps:$4 sm:$0xff]  }
 0x280   :  { %5755 = vmatprep.subr.bf16.mxu1 %v8397_v52  ;;  %v8451_v52 = vld [vmem:[#allocation5 + $0xb8c] ss:$16 sps:$4 sm:$0xff]  }
 0x282   :  { %5781 = vmatpush1.bf16.msra.mxu0 %v8398_v56  ;;  %v8460_v56 = vld [vmem:[#allocation5 + $0xc6c] ss:$16 sps:$4 sm:$0xff]  }
 0x283   :  { %5756 = vmatpush2.bf16.msra.mxu1 %v8395_v55  ;;  %5782 = vmatprep.subr.bf16.mxu0 %v8406_v60  ;;  %v8449_v55 = vld [vmem:[#allocation5 + $0xb88] ss:$16 sps:$4 sm:$0xff]  }
 0x284   :  { %5757 = vmatprep.subr.bf16.mxu1 %v8403_v59  ;;  %v8455_v59 = vld [vmem:[#allocation5 + $0xb68] ss:$16 sps:$4 sm:$0xff]  }
 0x285   :  { %v8458_v60 = vld [vmem:[#allocation5 + $0xc68] ss:$16 sps:$4 sm:$0xff]  }
 0x286   :  { %5783 = vmatpush1.bf16.msra.mxu0 %v8404_v5  ;;  %v8466_v5 = vld [vmem:[#allocation5 + $0xc4c] ss:$16 sps:$4 sm:$0xff]  }
 0x287   :  { %5758 = vmatpush2.bf16.msra.mxu1 %v8401_v17  ;;  %5784 = vmatprep.subr.bf16.mxu0 %v8412_v10  ;;  %v8463_v17 = vld [vmem:[#allocation5 + $0xb4c] ss:$16 sps:$4 sm:$0xff]   ;;  %v8464_v10 = vld [vmem:[#allocation5 + $0xc48] ss:$16 sps:$4 sm:$0xff]  }
 0x288   :  { %5759 = vmatprep.subr.bf16.mxu1 %v8409_v8  ;;  %v8461_v8 = vld [vmem:[#allocation5 + $0xb48] ss:$16 sps:$4 sm:$0xff]  }
 0x28a   :  { %5785 = vmatpush1.bf16.msra.mxu0 %v8410_v25  ;;  %v8472_v25 = vld [vmem:[#allocation5 + $0xc2c] ss:$16 sps:$4 sm:$0xff]  }
 0x28b   :  { %5760 = vmatpush2.bf16.msra.mxu1 %v8407_v3  ;;  %5786 = vmatprep.subr.bf16.mxu0 %v8418_v16  ;;  %v8469_v3 = vld [vmem:[#allocation5 + $0xb2c] ss:$16 sps:$4 sm:$0xff]   ;;  %v8470_v16 = vld [vmem:[#allocation5 + $0xc28] ss:$16 sps:$4 sm:$0xff]  }
 0x28c   :  { %5761 = vmatprep.subr.bf16.mxu1 %v8415_v12  ;;  %v8467_v12 = vld [vmem:[#allocation5 + $0xb28] ss:$16 sps:$4 sm:$0xff]  }
 0x28e   :  { %5787 = vmatpush1.bf16.msra.mxu0 %v8416_v58  ;;  %v8478_v58 = vld [vmem:[#allocation5 + $0xc0c] ss:$16 sps:$4 sm:$0xff]  }
 0x28f   :  { %5762 = vmatpush2.bf16.msra.mxu1 %v8413_v20  ;;  %5788 = vmatprep.subr.bf16.mxu0 %v8424_v14  ;;  %v8475_v20 = vld [vmem:[#allocation5 + $0xb0c] ss:$16 sps:$4 sm:$0xff]   ;;  %v8476_v14 = vld [vmem:[#allocation5 + $0xc08] ss:$16 sps:$4 sm:$0xff]  }
 0x290   :  { %5763 = vmatprep.subr.bf16.mxu1 %v8421_v13  ;;  %v8473_v13 = vld [vmem:[#allocation5 + $0xb08] ss:$16 sps:$4 sm:$0xff]  }
 0x292   :  { %5789 = vmatpush1.bf16.msra.mxu0 %v8422_v21  ;;  %v8484_v21 = vld [vmem:[#allocation5 + $0xeec] ss:$16 sps:$4 sm:$0xff]  }
 0x293   :  { %5764 = vmatpush2.bf16.msra.mxu1 %v8419_v15  ;;  %5790 = vmatprep.subr.bf16.mxu0 %v8430_v32  ;;  %v8481_v15 = vld [vmem:[#allocation5 + $0xdec] ss:$16 sps:$4 sm:$0xff]   ;;  %v8482_v32 = vld [vmem:[#allocation5 + $0xee8] ss:$16 sps:$4 sm:$0xff]  }
 0x294   :  { %5765 = vmatprep.subr.bf16.mxu1 %v8427_v27  ;;  %v8479_v27 = vld [vmem:[#allocation5 + $0xde8] ss:$16 sps:$4 sm:$0xff]  }
 0x296   :  { %5791 = vmatpush1.bf16.msra.mxu0 %v8428_v7  ;;  %v8490_v7 = vld [vmem:[#allocation5 + $0xecc] ss:$16 sps:$4 sm:$0xff]  }
 0x297   :  { %5766 = vmatpush2.bf16.msra.mxu1 %v8425_v24  ;;  %5792 = vmatprep.subr.bf16.mxu0 %v8433_v18  ;;  %v8487_v24 = vld [vmem:[#allocation5 + $0xdcc] ss:$16 sps:$4 sm:$0xff]  }
 0x298   :  { %5817 = vmatprep.subr.bf16.mxu1 %v8436_v29 }
 0x299   :  { %v5482_v31 = vpop.f32.mrf.mxu0 }
 0x29a   :  { %v5523_v34 = vpop.f32.mrf.mxu1  ;;  %5768 = vmatmul.mubr.bf16.vlgmr.msra.gmra.mxu1 %v9109_v38  ;;  %v5483_v28 = vadd.f32 %v5482_v31, %v9222_v11  ;;  %5793 = vmatpush2.bf16.msra.mxu0 %v8431_v6  ;;  %v8443_v11 = vld [vmem:[#allocation5 + $0xba8] ss:$16 sps:$4 sm:$0xff]   ;;  %v8496_v31 = vld [vmem:[#allocation5 + $0xeac] ss:$16 sps:$4 sm:$0xff]  }
 0x29b   :  { %5818 = vmatpush1.bf16.msra.mxu1 %v8434_v19  ;;  %v5484_v36 = vpop.f32.mrf.mxu0  ;;  %5794 = vmatprep.subr.bf16.mxu0 %v8439_v37  ;;  %v8485_v6 = vld [vmem:[#allocation5 + $0xdc8] ss:$16 sps:$4 sm:$0xff]  }
 0x29c   :  { %v5525_v41 = vpop.f32.mrf.mxu1  ;;  %5819 = vmatprep.subr.bf16.mxu1 %v8442_v33  ;;  %v9232_v43 = vadd.f32 %v5523_v34, %v5483_v28  ;;  %v5485_v23 = vadd.f32 %v5484_v36, %v9226_v57  ;;  %5849 = vmatprep.mubr.bf16.mxu1 %v9119_v44  ;;  %v8452_v57 = vld [vmem:[#allocation5 + $0xc88] ss:$16 sps:$4 sm:$0xff]   ;;  %v8457_v44 = vld [vmem:[#allocation5 + $0xb6c] ss:$16 sps:$4 sm:$0xff]  }
 0x29d   :  { %v5486_v45 = vpop.f32.mrf.mxu0  ;;  %v8488_v19 = vld [vmem:[#allocation5 + $0xec8] ss:$16 sps:$4 sm:$0xff]   ;;  %v8493_v33 = vld [vmem:[#allocation5 + $0xdac] ss:$16 sps:$4 sm:$0xff]  }
 0x29e   :  { %v5527_v38 = vpop.f32.mrf.mxu1  ;;  %v9236_v46 = vadd.f32 %v5525_v41, %v5485_v23  ;;  %5795 = vmatpush2.bf16.msra.mxu0 %v8437_v30  ;;  %v8494_v30 = vld [vmem:[#allocation5 + $0xea8] ss:$16 sps:$4 sm:$0xff]   ;;  %v8499_v36 = vld [vmem:[#allocation5 + $0xd8c] ss:$16 sps:$4 sm:$0xff]  }
 0x29f   :  { %5820 = vmatpush1.bf16.msra.mxu1 %v8440_v51  ;;  %v5487_v49 = vpop.f32.mrf.mxu0  ;;  %5796 = vmatprep.subr.bf16.mxu0 %v8445_v42  ;;  %v8502_v41 = vld [vmem:[#allocation5 + $0xe8c] ss:$16 sps:$4 sm:$0xff]   ;;  %v8497_v42 = vld [vmem:[#allocation5 + $0xd88] ss:$16 sps:$4 sm:$0xff]  }
 0x2a0   :  { %v5528_v50 = vpop.f32.mrf.mxu1  ;;  %5821 = vmatprep.subr.bf16.mxu1 %v8448_v47  ;;  %v8500_v47 = vld [vmem:[#allocation5 + $0xe88] ss:$16 sps:$4 sm:$0xff]   ;;  %v8508_v23 = vld [vmem:[#allocation5 + $0xe6c] ss:$16 sps:$4 sm:$0xff]  }
 0x2a1   :  { %v8506_v45 = vld [vmem:[#allocation5 + $0xe68] ss:$16 sps:$4 sm:$0xff]   ;;  %v8511_v38 = vld [vmem:[#allocation5 + $0xd4c] ss:$16 sps:$4 sm:$0xff]  }
 0x2a2   :  { %5797 = vmatpush2.bf16.msra.mxu0 %v8443_v11  ;;  %v8509_v11 = vld [vmem:[#allocation5 + $0xd48] ss:$16 sps:$4 sm:$0xff]   ;;  %v8517_v49 = vld [vmem:[#allocation5 + $0xd2c] ss:$16 sps:$4 sm:$0xff]  }
 0x2a3   :  { %5822 = vmatpush1.bf16.msra.mxu1 %v8446_v48  ;;  %5798 = vmatprep.subr.bf16.mxu0 %v8451_v52  ;;  %v8512_v48 = vld [vmem:[#allocation5 + $0xe48] ss:$16 sps:$4 sm:$0xff]   ;;  %v8520_v50 = vld [vmem:[#allocation5 + $0xe2c] ss:$16 sps:$4 sm:$0xff]  }
 0x2a4   :  { %5823 = vmatprep.subr.bf16.mxu1 %v8454_v53  ;;  %v8515_v52 = vld [vmem:[#allocation5 + $0xd28] ss:$16 sps:$4 sm:$0xff]  }
 0x2a5   :  { %v8518_v53 = vld [vmem:[#allocation5 + $0xe28] ss:$16 sps:$4 sm:$0xff]  }
 0x2a6   :  { %5799 = vmatpush2.bf16.msra.mxu0 %v8449_v55  ;;  %v8523_v55 = vld [vmem:[#allocation5 + $0xd0c] ss:$16 sps:$4 sm:$0xff]  }
 0x2a7   :  { %5824 = vmatpush1.bf16.msra.mxu1 %v8452_v57  ;;  %5800 = vmatprep.subr.bf16.mxu0 %v8457_v44  ;;  %v8526_v57 = vld [vmem:[#allocation5 + $0xe0c] ss:$16 sps:$4 sm:$0xff]   ;;  %v8521_v44 = vld [vmem:[#allocation5 + $0xd08] ss:$16 sps:$4 sm:$0xff]  }
 0x2a8   :  { %5825 = vmatprep.subr.bf16.mxu1 %v8460_v56  ;;  %v8524_v56 = vld [vmem:[#allocation5 + $0xe08] ss:$16 sps:$4 sm:$0xff]  }
 0x2aa   :  { %5801 = vmatpush2.bf16.msra.mxu0 %v8455_v59  ;;  %v8529_v59 = vld [vmem:[#allocation5 + $0xfec] ss:$16 sps:$4 sm:$0xff]  }
 0x2ab   :  { %5826 = vmatpush1.bf16.msra.mxu1 %v8458_v60  ;;  %5802 = vmatprep.subr.bf16.mxu0 %v8463_v17  ;;  %v8532_v60 = vld [vmem:[#allocation5 + $0x10ec] ss:$16 sps:$4 sm:$0xff]   ;;  %v8527_v17 = vld [vmem:[#allocation5 + $0xfe8] ss:$16 sps:$4 sm:$0xff]  }
 0x2ac   :  { %5827 = vmatprep.subr.bf16.mxu1 %v8466_v5  ;;  %v8530_v5 = vld [vmem:[#allocation5 + $0x10e8] ss:$16 sps:$4 sm:$0xff]  }
 0x2ae   :  { %5803 = vmatpush2.bf16.msra.mxu0 %v8461_v8  ;;  %v8535_v8 = vld [vmem:[#allocation5 + $0xfcc] ss:$16 sps:$4 sm:$0xff]  }
 0x2af   :  { %5828 = vmatpush1.bf16.msra.mxu1 %v8464_v10  ;;  %5804 = vmatprep.subr.bf16.mxu0 %v8469_v3  ;;  %v8538_v10 = vld [vmem:[#allocation5 + $0x10cc] ss:$16 sps:$4 sm:$0xff]  }
 0x2b0   :  { %5829 = vmatprep.subr.bf16.mxu1 %v8472_v25  ;;  %v8533_v25 = vld [vmem:[#allocation5 + $0xfc8] ss:$16 sps:$4 sm:$0xff]  }
 0x2b2   :  { %5805 = vmatpush2.bf16.msra.mxu0 %v8467_v12  ;;  %v8536_v12 = vld [vmem:[#allocation5 + $0x10c8] ss:$16 sps:$4 sm:$0xff]  }
 0x2b3   :  { %5830 = vmatpush1.bf16.msra.mxu1 %v8470_v16  ;;  %5806 = vmatprep.subr.bf16.mxu0 %v8475_v20  ;;  %v8541_v20 = vld [vmem:[#allocation5 + $0xfac] ss:$16 sps:$4 sm:$0xff]  }
 0x2b4   :  { %5831 = vmatprep.subr.bf16.mxu1 %v8478_v58  ;;  %v8544_v58 = vld [vmem:[#allocation5 + $0x10ac] ss:$16 sps:$4 sm:$0xff]  }
 0x2b6   :  { %5807 = vmatpush2.bf16.msra.mxu0 %v8473_v13 }
 0x2b7   :  { %5832 = vmatpush1.bf16.msra.mxu1 %v8476_v14  ;;  %5858 = vmatprep.subr.bf16.mxu0 %v8484_v21  ;;  %v8539_v14 = vld [vmem:[#allocation5 + $0xfa8] ss:$16 sps:$4 sm:$0xff]  }
 0x2b8   :  { %5833 = vmatprep.subr.bf16.mxu1 %v8481_v15  ;;  %v8542_v15 = vld [vmem:[#allocation5 + $0x10a8] ss:$16 sps:$4 sm:$0xff]  }
 0x2b9   :  { %v5564_v18 = vpop.f32.mrf.mxu0  ;;  %5809 = vmatmul.mubr.bf16.vlgmr.msra.gmra.mxu0 %v9113_v39  ;;  %v8491_v39 = vld [vmem:[#allocation5 + $0xda8] ss:$16 sps:$4 sm:$0xff]  }
 0x2ba   :  { %v9240_v29 = vadd.f32 %v5564_v18, %v9232_v43  ;;  %5859 = vmatpush1.bf16.msra.mxu0 %v8482_v32  ;;  %5890 = vmatprep.mubr.bf16.mxu0 %v9123_v22  ;;  %v8505_v43 = vld [vmem:[#allocation5 + $0xd6c] ss:$16 sps:$4 sm:$0xff]   ;;  %v8503_v22 = vld [vmem:[#allocation5 + $0xd68] ss:$16 sps:$4 sm:$0xff]  }
 0x2bb   :  { %5834 = vmatpush2.bf16.msra.mxu1 %v8479_v27  ;;  %v5566_v37 = vpop.f32.mrf.mxu0  ;;  %5860 = vmatprep.subr.bf16.mxu0 %v8490_v7  ;;  %v8550_v27 = vld [vmem:[#allocation5 + $0x108c] ss:$16 sps:$4 sm:$0xff]   ;;  %v8545_v32 = vld [vmem:[#allocation5 + $0xf88] ss:$16 sps:$4 sm:$0xff]  }
 0x2bc   :  { %5835 = vmatprep.subr.bf16.mxu1 %v8487_v24  ;;  %v9243_v34 = vadd.f32 %v5566_v37, %v9236_v46  ;;  %v8514_v46 = vld [vmem:[#allocation5 + $0xe4c] ss:$16 sps:$4 sm:$0xff]   ;;  %v8548_v24 = vld [vmem:[#allocation5 + $0x1088] ss:$16 sps:$4 sm:$0xff]  }
 0x2bd   :  { %v5568_v28 = vpop.f32.mrf.mxu0  ;;  %v8553_v7 = vld [vmem:[#allocation5 + $0xf6c] ss:$16 sps:$4 sm:$0xff]  }
 0x2be   :  { %5861 = vmatpush1.bf16.msra.mxu0 %v8488_v19  ;;  %v8556_v18 = vld [vmem:[#allocation5 + $0x106c] ss:$16 sps:$4 sm:$0xff]  }
 0x2bf   :  { %5836 = vmatpush2.bf16.msra.mxu1 %v8485_v6  ;;  %v5569_v51 = vpop.f32.mrf.mxu0  ;;  %5862 = vmatprep.subr.bf16.mxu0 %v8496_v31  ;;  %v8554_v6 = vld [vmem:[#allocation5 + $0x1068] ss:$16 sps:$4 sm:$0xff]   ;;  %v8559_v19 = vld [vmem:[#allocation5 + $0xf4c] ss:$16 sps:$4 sm:$0xff]  }
 0x2c0   :  { %5837 = vmatprep.subr.bf16.mxu1 %v8493_v33  ;;  %v8562_v37 = vld [vmem:[#allocation5 + $0x104c] ss:$16 sps:$4 sm:$0xff]   ;;  %v8557_v33 = vld [vmem:[#allocation5 + $0xf48] ss:$16 sps:$4 sm:$0xff]  }
 0x2c1   :  { %v8560_v31 = vld [vmem:[#allocation5 + $0x1048] ss:$16 sps:$4 sm:$0xff]   ;;  %v8565_v28 = vld [vmem:[#allocation5 + $0xf2c] ss:$16 sps:$4 sm:$0xff]  }
 0x2c2   :  { %5863 = vmatpush1.bf16.msra.mxu0 %v8494_v30  ;;  %v8563_v30 = vld [vmem:[#allocation5 + $0xf28] ss:$16 sps:$4 sm:$0xff]  }
 0x2c3   :  { %5838 = vmatpush2.bf16.msra.mxu1 %v8491_v39  ;;  %5864 = vmatprep.subr.bf16.mxu0 %v8502_v41  ;;  %v8568_v39 = vld [vmem:[#allocation5 + $0x102c] ss:$16 sps:$4 sm:$0xff]   ;;  %v8566_v51 = vld [vmem:[#allocation5 + $0x1028] ss:$16 sps:$4 sm:$0xff]  }
 0x2c4   :  { %5839 = vmatprep.subr.bf16.mxu1 %v8499_v36  ;;  %v8571_v36 = vld [vmem:[#allocation5 + $0xf0c] ss:$16 sps:$4 sm:$0xff]  }
 0x2c5   :  { %v8574_v41 = vld [vmem:[#allocation5 + $0x100c] ss:$16 sps:$4 sm:$0xff]  }
 0x2c6   :  { %5865 = vmatpush1.bf16.msra.mxu0 %v8500_v47  ;;  %v944_v47 = vsub.s32 3, %v9129_v54 }
 0x2c7   :  { %5840 = vmatpush2.bf16.msra.mxu1 %v8497_v42  ;;  %5866 = vmatprep.subr.bf16.mxu0 %v8508_v23  ;;  %v940_v42 = vsub.s32 2, %v9129_v54  ;;  %v8572_v23 = vld [vmem:[#allocation5 + $0x1008] ss:$16 sps:$4 sm:$0xff]  }
 0x2c8   :  { %5841 = vmatprep.subr.bf16.mxu1 %v8505_v43  ;;  %v8569_v43 = vld [vmem:[#allocation5 + $0xf08] ss:$16 sps:$4 sm:$0xff]  }
 0x2ca   :  { %5867 = vmatpush1.bf16.msra.mxu0 %v8506_v45  ;;  %v8580_v45 = vld [vmem:[#allocation5 + $0x12ec] ss:$16 sps:$4 sm:$0xff]  }
 0x2cb   :  { %5842 = vmatpush2.bf16.msra.mxu1 %v8503_v22  ;;  %5868 = vmatprep.subr.bf16.mxu0 %v8514_v46  ;;  %v8577_v22 = vld [vmem:[#allocation5 + $0x11ec] ss:$16 sps:$4 sm:$0xff]  }
 0x2cc   :  { %5843 = vmatprep.subr.bf16.mxu1 %v8511_v38  ;;  %v8807_v38 = vld [vmem:[#allocation7] sm:$0xf] }
 0x2cd   :  { %v941_v46 = vrot.slane %v8807_v38, %v940_v42  ;;  %v8629_v42 = vld [vmem:[#allocation5 + $0x13c8] ss:$16 sps:$4 sm:$0xff]  }
 0x2ce   :  { %5869 = vmatpush1.bf16.msra.mxu0 %v8512_v48  ;;  %v8575_v48 = vld [vmem:[#allocation5 + $0x11e8] ss:$16 sps:$4 sm:$0xff]  }
 0x2cf   :  { %5844 = vmatpush2.bf16.msra.mxu1 %v8509_v11  ;;  %5870 = vmatprep.subr.bf16.mxu0 %v8520_v50  ;;  %v945_v11 = vrot.slane %v8807_v38, %v944_v47  ;;  %v8583_v50 = vld [vmem:[#allocation5 + $0x11cc] ss:$16 sps:$4 sm:$0xff]   ;;  %v8632_v47 = vld [vmem:[#allocation5 + $0x14c8] ss:$16 sps:$4 sm:$0xff]  }
 0x2d0   :  { %5845 = vmatprep.subr.bf16.mxu1 %v8517_v49  ;;  %v8578_v49 = vld [vmem:[#allocation5 + $0x12e8] ss:$16 sps:$4 sm:$0xff]  }
 0x2d2   :  { %5871 = vmatpush1.bf16.msra.mxu0 %v8518_v53 }
 0x2d3   :  { %5846 = vmatpush2.bf16.msra.mxu1 %v8515_v52  ;;  %5872 = vmatprep.subr.bf16.mxu0 %v8526_v57  ;;  %v8586_v52 = vld [vmem:[#allocation5 + $0x12cc] ss:$16 sps:$4 sm:$0xff]  }
 0x2d4   :  { %5847 = vmatprep.subr.bf16.mxu1 %v8523_v55 }
 0x2d6   :  { %5873 = vmatpush1.bf16.msra.mxu0 %v8524_v56  ;;  %v8584_v56 = vld [vmem:[#allocation5 + $0x12c8] ss:$16 sps:$4 sm:$0xff]  }
 0x2d7   :  { %5848 = vmatpush2.bf16.msra.mxu1 %v8521_v44  ;;  %5874 = vmatprep.subr.bf16.mxu0 %v8529_v59  ;;  %v8581_v44 = vld [vmem:[#allocation5 + $0x11c8] ss:$16 sps:$4 sm:$0xff]  }
 0x2d8   :  { %5899 = vmatprep.subr.bf16.mxu1 %v8532_v60  ;;  %v8589_v60 = vld [vmem:[#allocation5 + $0x11ac] ss:$16 sps:$4 sm:$0xff]  }
 0x2da   :  { %v9246_v3 = vpop.f32.mrf.mxu1  ;;  %5850 = vmatmul.mubr.bf16.vlgmr.msra.gmra.mxu1 %v9135_v0  ;;  %5875 = vmatpush2.bf16.msra.mxu0 %v8527_v17  ;;  %v8547_v0 = vld [vmem:[#allocation5 + $0xf8c] ss:$16 sps:$4 sm:$0xff]  }
 0x2db   :  { %5900 = vmatpush1.bf16.msra.mxu1 %v8530_v5  ;;  %5876 = vmatprep.subr.bf16.mxu0 %v8535_v8  ;;  %v5606_v54 = vadd.f32 %v9246_v3, %v941_v46  ;;  %v8592_v17 = vld [vmem:[#allocation5 + $0x12ac] ss:$16 sps:$4 sm:$0xff]   ;;  %v8638_v46 = vld [vmem:[#allocation5 + $0x14a8] ss:$16 sps:$4 sm:$0xff]  }
 0x2dc   :  { %v9249_v16 = vpop.f32.mrf.mxu1  ;;  %5901 = vmatprep.subr.bf16.mxu1 %v8538_v10  ;;  %5931 = vmatprep.mubr.bf16.mxu1 %v9147_v35  ;;  %v8551_v35 = vld [vmem:[#allocation5 + $0xf68] ss:$16 sps:$4 sm:$0xff]  }
 0x2dd   :  { %v5608_v55 = vadd.f32 %v9249_v16, %v945_v11  ;;  %v8590_v10 = vld [vmem:[#allocation5 + $0x12a8] ss:$16 sps:$4 sm:$0xff]  }
 0x2de   :  { %v5609_v13 = vpop.f32.mrf.mxu1  ;;  %5877 = vmatpush2.bf16.msra.mxu0 %v8533_v25  ;;  %v8595_v25 = vld [vmem:[#allocation5 + $0x118c] ss:$16 sps:$4 sm:$0xff]   ;;  %v8593_v16 = vld [vmem:[#allocation5 + $0x1188] ss:$16 sps:$4 sm:$0xff]  }
 0x2df   :  { %5902 = vmatpush1.bf16.msra.mxu1 %v8536_v12  ;;  %5878 = vmatprep.subr.bf16.mxu0 %v8541_v20  ;;  %v8598_v12 = vld [vmem:[#allocation5 + $0x128c] ss:$16 sps:$4 sm:$0xff]   ;;  %v8596_v20 = vld [vmem:[#allocation5 + $0x1288] ss:$16 sps:$4 sm:$0xff]  }
 0x2e0   :  { %v5610_v21 = vpop.f32.mrf.mxu1  ;;  %5903 = vmatprep.subr.bf16.mxu1 %v8544_v58  ;;  %v8601_v58 = vld [vmem:[#allocation5 + $0x116c] ss:$16 sps:$4 sm:$0xff]  }
 0x2e1   :  { %v8604_v13 = vld [vmem:[#allocation5 + $0x126c] ss:$16 sps:$4 sm:$0xff]  }
 0x2e2   :  { %5879 = vmatpush2.bf16.msra.mxu0 %v8539_v14  ;;  %v8602_v14 = vld [vmem:[#allocation5 + $0x1268] ss:$16 sps:$4 sm:$0xff]   ;;  %v8610_v21 = vld [vmem:[#allocation5 + $0x124c] ss:$16 sps:$4 sm:$0xff]  }
 0x2e3   :  { %5904 = vmatpush1.bf16.msra.mxu1 %v8542_v15  ;;  %5880 = vmatprep.subr.bf16.mxu0 %v8547_v0  ;;  %v8607_v15 = vld [vmem:[#allocation5 + $0x114c] ss:$16 sps:$4 sm:$0xff]   ;;  %v8605_v0 = vld [vmem:[#allocation5 + $0x1148] ss:$16 sps:$4 sm:$0xff]  }
 0x2e4   :  { %5905 = vmatprep.subr.bf16.mxu1 %v8550_v27  ;;  %v8608_v27 = vld [vmem:[#allocation5 + $0x1248] ss:$16 sps:$4 sm:$0xff]  }
 0x2e6   :  { %5881 = vmatpush2.bf16.msra.mxu0 %v8545_v32  ;;  %v8613_v32 = vld [vmem:[#allocation5 + $0x112c] ss:$16 sps:$4 sm:$0xff]  }
 0x2e7   :  { %5906 = vmatpush1.bf16.msra.mxu1 %v8548_v24  ;;  %5882 = vmatprep.subr.bf16.mxu0 %v8553_v7  ;;  %v8616_v24 = vld [vmem:[#allocation5 + $0x122c] ss:$16 sps:$4 sm:$0xff]   ;;  %v8611_v7 = vld [vmem:[#allocation5 + $0x1128] ss:$16 sps:$4 sm:$0xff]  }
 0x2e8   :  { %5907 = vmatprep.subr.bf16.mxu1 %v8556_v18  ;;  %v8614_v18 = vld [vmem:[#allocation5 + $0x1228] ss:$16 sps:$4 sm:$0xff]  }
 0x2ea   :  { %5883 = vmatpush2.bf16.msra.mxu0 %v8551_v35  ;;  %v8619_v35 = vld [vmem:[#allocation5 + $0x110c] ss:$16 sps:$4 sm:$0xff]  }
 0x2eb   :  { %5908 = vmatpush1.bf16.msra.mxu1 %v8554_v6  ;;  %5884 = vmatprep.subr.bf16.mxu0 %v8559_v19  ;;  %v8622_v6 = vld [vmem:[#allocation5 + $0x120c] ss:$16 sps:$4 sm:$0xff]   ;;  %v8617_v19 = vld [vmem:[#allocation5 + $0x1108] ss:$16 sps:$4 sm:$0xff]  }
 0x2ec   :  { %5909 = vmatprep.subr.bf16.mxu1 %v8562_v37  ;;  %v8620_v37 = vld [vmem:[#allocation5 + $0x1208] ss:$16 sps:$4 sm:$0xff]  }
 0x2ee   :  { %5885 = vmatpush2.bf16.msra.mxu0 %v8557_v33  ;;  %v8625_v33 = vld [vmem:[#allocation5 + $0x13ec] ss:$16 sps:$4 sm:$0xff]  }
 0x2ef   :  { %5910 = vmatpush1.bf16.msra.mxu1 %v8560_v31  ;;  %5886 = vmatprep.subr.bf16.mxu0 %v8565_v28  ;;  %v8628_v31 = vld [vmem:[#allocation5 + $0x14ec] ss:$16 sps:$4 sm:$0xff]   ;;  %v8623_v28 = vld [vmem:[#allocation5 + $0x13e8] ss:$16 sps:$4 sm:$0xff]  }
 0x2f0   :  { %5911 = vmatprep.subr.bf16.mxu1 %v8568_v39  ;;  %v8626_v39 = vld [vmem:[#allocation5 + $0x14e8] ss:$16 sps:$4 sm:$0xff]  }
 0x2f2   :  { %5887 = vmatpush2.bf16.msra.mxu0 %v8563_v30  ;;  %v8631_v30 = vld [vmem:[#allocation5 + $0x13cc] ss:$16 sps:$4 sm:$0xff]  }
 0x2f3   :  { %5912 = vmatpush1.bf16.msra.mxu1 %v8566_v51  ;;  %5888 = vmatprep.subr.bf16.mxu0 %v8571_v36  ;;  %v8634_v51 = vld [vmem:[#allocation5 + $0x14cc] ss:$16 sps:$4 sm:$0xff]  }
 0x2f4   :  { %5913 = vmatprep.subr.bf16.mxu1 %v8574_v41 }
 0x2f6   :  { %5889 = vmatpush2.bf16.msra.mxu0 %v8569_v43 }
 0x2f7   :  { %5914 = vmatpush1.bf16.msra.mxu1 %v8572_v23  ;;  %5940 = vmatprep.subr.bf16.mxu0 %v8580_v45  ;;  %v8637_v23 = vld [vmem:[#allocation5 + $0x13ac] ss:$16 sps:$4 sm:$0xff]  }
 0x2f8   :  { %5915 = vmatprep.subr.bf16.mxu1 %v8577_v22  ;;  %v8640_v22 = vld [vmem:[#allocation5 + $0x14ac] ss:$16 sps:$4 sm:$0xff]  }
 0x2f9   :  { %v5646_v53 = vpop.f32.mrf.mxu0  ;;  %5891 = vmatmul.mubr.bf16.vlgmr.msra.gmra.mxu0 %v9139_v1  ;;  %v8587_v1 = vld [vmem:[#allocation5 + $0x11a8] ss:$16 sps:$4 sm:$0xff]  }
 0x2fa   :  { %v9257_v57 = vadd.f32 %v5646_v53, %v5606_v54  ;;  %5941 = vmatpush1.bf16.msra.mxu0 %v8578_v49  ;;  %5972 = vmatprep.mubr.bf16.mxu0 %v9151_v40  ;;  %v8599_v40 = vld [vmem:[#allocation5 + $0x1168] ss:$16 sps:$4 sm:$0xff]   ;;  %v8646_v49 = vld [vmem:[#allocation5 + $0x148c] ss:$16 sps:$4 sm:$0xff]  }
 0x2fb   :  { %5916 = vmatpush2.bf16.msra.mxu1 %v8575_v48  ;;  %v5648_v59 = vpop.f32.mrf.mxu0  ;;  %5942 = vmatprep.subr.bf16.mxu0 %v8586_v52  ;;  %v8643_v48 = vld [vmem:[#allocation5 + $0x138c] ss:$16 sps:$4 sm:$0xff]   ;;  %v8644_v52 = vld [vmem:[#allocation5 + $0x1488] ss:$16 sps:$4 sm:$0xff]  }
 0x2fc   :  { %5917 = vmatprep.subr.bf16.mxu1 %v8583_v50  ;;  %v9259_v5 = vadd.f32 %v5648_v59, %v5608_v55  ;;  %v8641_v50 = vld [vmem:[#allocation5 + $0x1388] ss:$16 sps:$4 sm:$0xff]   ;;  %v8649_v54 = vld [vmem:[#allocation5 + $0x136c] ss:$16 sps:$4 sm:$0xff]  }
 0x2fd   :  { %v5650_v8 = vpop.f32.mrf.mxu0  ;;  %v8652_v53 = vld [vmem:[#allocation5 + $0x146c] ss:$16 sps:$4 sm:$0xff]   ;;  %v8650_v55 = vld [vmem:[#allocation5 + $0x1468] ss:$16 sps:$4 sm:$0xff]  }
 0x2fe   :  { %5943 = vmatpush1.bf16.msra.mxu0 %v8584_v56  ;;  %v8653_v56 = vld [vmem:[#allocation5 + $0x1348] ss:$16 sps:$4 sm:$0xff]  }
 0x2ff   :  { %5918 = vmatpush2.bf16.msra.mxu1 %v8581_v44  ;;  %v5651_v3 = vpop.f32.mrf.mxu0  ;;  %5944 = vmatprep.subr.bf16.mxu0 %v8592_v17  ;;  %v8658_v44 = vld [vmem:[#allocation5 + $0x144c] ss:$16 sps:$4 sm:$0xff]   ;;  %v8656_v59 = vld [vmem:[#allocation5 + $0x1448] ss:$16 sps:$4 sm:$0xff]  }
 0x300   :  { %5919 = vmatprep.subr.bf16.mxu1 %v8589_v60  ;;  %v8661_v60 = vld [vmem:[#allocation5 + $0x132c] ss:$16 sps:$4 sm:$0xff]   ;;  %v8662_v8 = vld [vmem:[#allocation5 + $0x1428] ss:$16 sps:$4 sm:$0xff]  }
 0x301   :  { %v8664_v17 = vld [vmem:[#allocation5 + $0x142c] ss:$16 sps:$4 sm:$0xff]   ;;  %v8665_v3 = vld [vmem:[#allocation5 + $0x1308] ss:$16 sps:$4 sm:$0xff]  }
 0x302   :  { %5945 = vmatpush1.bf16.msra.mxu0 %v8590_v10  ;;  %v8670_v10 = vld [vmem:[#allocation5 + $0x140c] ss:$16 sps:$4 sm:$0xff]  }
 0x303   :  { %5920 = vmatpush2.bf16.msra.mxu1 %v8587_v1  ;;  %5946 = vmatprep.subr.bf16.mxu0 %v8598_v12  ;;  %v8667_v1 = vld [vmem:[#allocation5 + $0x130c] ss:$16 sps:$4 sm:$0xff]  }
 0x304   :  { %5921 = vmatprep.subr.bf16.mxu1 %v8595_v25  ;;  %v8668_v25 = vld [vmem:[#allocation5 + $0x1408] ss:$16 sps:$4 sm:$0xff]   ;;  %v8673_v12 = vld [vmem:[#allocation5 + $0x15ec] ss:$16 sps:$4 sm:$0xff]  }
 0x306   :  { %5947 = vmatpush1.bf16.msra.mxu0 %v8596_v20  ;;  %v8671_v20 = vld [vmem:[#allocation5 + $0x15e8] ss:$16 sps:$4 sm:$0xff]  }
 0x307   :  { %5922 = vmatpush2.bf16.msra.mxu1 %v8593_v16  ;;  %5948 = vmatprep.subr.bf16.mxu0 %v8604_v13  ;;  %v8676_v16 = vld [vmem:[#allocation5 + $0x16ec] ss:$16 sps:$4 sm:$0xff]  }
 0x308   :  { %5923 = vmatprep.subr.bf16.mxu1 %v8601_v58  ;;  %v8674_v58 = vld [vmem:[#allocation5 + $0x16e8] ss:$16 sps:$4 sm:$0xff]   ;;  %v8679_v13 = vld [vmem:[#allocation5 + $0x15cc] ss:$16 sps:$4 sm:$0xff]  }
 0x30a   :  { %5949 = vmatpush1.bf16.msra.mxu0 %v8602_v14 }
 0x30b   :  { %5924 = vmatpush2.bf16.msra.mxu1 %v8599_v40  ;;  %5950 = vmatprep.subr.bf16.mxu0 %v8610_v21  ;;  %v8682_v40 = vld [vmem:[#allocation5 + $0x16cc] ss:$16 sps:$4 sm:$0xff]   ;;  %v8677_v21 = vld [vmem:[#allocation5 + $0x15c8] ss:$16 sps:$4 sm:$0xff]  }
 0x30c   :  { %5925 = vmatprep.subr.bf16.mxu1 %v8607_v15 }
 0x30e   :  { %5951 = vmatpush1.bf16.msra.mxu0 %v8608_v27 }
 0x30f   :  { %5926 = vmatpush2.bf16.msra.mxu1 %v8605_v0  ;;  %5952 = vmatprep.subr.bf16.mxu0 %v8616_v24  ;;  %v8680_v0 = vld [vmem:[#allocation5 + $0x16c8] ss:$16 sps:$4 sm:$0xff]   ;;  %v8688_v24 = vld [vmem:[#allocation5 + $0x16ac] ss:$16 sps:$4 sm:$0xff]  }
 0x310   :  { %5927 = vmatprep.subr.bf16.mxu1 %v8613_v32  ;;  %v8685_v32 = vld [vmem:[#allocation5 + $0x15ac] ss:$16 sps:$4 sm:$0xff]  }
 0x312   :  { %5953 = vmatpush1.bf16.msra.mxu0 %v8614_v18 }
 0x313   :  { %5928 = vmatpush2.bf16.msra.mxu1 %v8611_v7  ;;  %5954 = vmatprep.subr.bf16.mxu0 %v8622_v6 }
 0x314   :  { %5929 = vmatprep.subr.bf16.mxu1 %v8619_v35  ;;  %v8686_v35 = vld [vmem:[#allocation5 + $0x16a8] ss:$16 sps:$4 sm:$0xff]  }
 0x316   :  { %5955 = vmatpush1.bf16.msra.mxu0 %v8620_v37  ;;  %v8694_v37 = vld [vmem:[#allocation5 + $0x168c] ss:$16 sps:$4 sm:$0xff]  }
 0x317   :  { %5930 = vmatpush2.bf16.msra.mxu1 %v8617_v19  ;;  %5956 = vmatprep.subr.bf16.mxu0 %v8625_v33  ;;  %v8691_v19 = vld [vmem:[#allocation5 + $0x158c] ss:$16 sps:$4 sm:$0xff]   ;;  %v8689_v33 = vld [vmem:[#allocation5 + $0x1588] ss:$16 sps:$4 sm:$0xff]  }
 0x318   :  { %5981 = vmatprep.subr.bf16.mxu1 %v8628_v31  ;;  %v8692_v31 = vld [vmem:[#allocation5 + $0x1688] ss:$16 sps:$4 sm:$0xff]  }
 0x31a   :  { %v5687_v36 = vpop.f32.mrf.mxu1  ;;  %5932 = vmatmul.mubr.bf16.vlgmr.msra.gmra.mxu1 %v9167_v61  ;;  %5957 = vmatpush2.bf16.msra.mxu0 %v8623_v28  ;;  %v8635_v61 = vld [vmem:[#allocation5 + $0x13a8] ss:$16 sps:$4 sm:$0xff]   ;;  %v8697_v28 = vld [vmem:[#allocation5 + $0x156c] ss:$16 sps:$4 sm:$0xff]  }
 0x31b   :  { %v9264_v41 = vadd.f32 %v5687_v36, %v9257_v57  ;;  %5982 = vmatpush1.bf16.msra.mxu1 %v8626_v39  ;;  %5958 = vmatprep.subr.bf16.mxu0 %v8631_v30  ;;  %v8655_v57 = vld [vmem:[#allocation5 + $0x134c] ss:$16 sps:$4 sm:$0xff]   ;;  %v8698_v30 = vld [vmem:[#allocation5 + $0x1668] ss:$16 sps:$4 sm:$0xff]  }
 0x31c   :  { %v5689_v43 = vpop.f32.mrf.mxu1  ;;  %5983 = vmatprep.subr.bf16.mxu1 %v8634_v51  ;;  %6013 = vmatprep.mubr.bf16.mxu1 %v9175_v9  ;;  %v8647_v9 = vld [vmem:[#allocation5 + $0x1368] ss:$16 sps:$4 sm:$0xff]   ;;  %v8700_v39 = vld [vmem:[#allocation5 + $0x166c] ss:$16 sps:$4 sm:$0xff]  }
 0x31d   :  { %v9267_v45 = vadd.f32 %v5689_v43, %v9259_v5  ;;  %v8659_v5 = vld [vmem:[#allocation5 + $0x1328] ss:$16 sps:$4 sm:$0xff]   ;;  %v8703_v51 = vld [vmem:[#allocation5 + $0x154c] ss:$16 sps:$4 sm:$0xff]  }
 0x31e   :  { %v5691_v38 = vpop.f32.mrf.mxu1  ;;  %5959 = vmatpush2.bf16.msra.mxu0 %v8629_v42  ;;  %v8706_v36 = vld [vmem:[#allocation5 + $0x164c] ss:$16 sps:$4 sm:$0xff]   ;;  %v8704_v42 = vld [vmem:[#allocation5 + $0x1648] ss:$16 sps:$4 sm:$0xff]  }
 0x31f   :  { %5984 = vmatpush1.bf16.msra.mxu1 %v8632_v47  ;;  %5960 = vmatprep.subr.bf16.mxu0 %v8637_v23  ;;  %v8709_v47 = vld [vmem:[#allocation5 + $0x152c] ss:$16 sps:$4 sm:$0xff]   ;;  %v8707_v23 = vld [vmem:[#allocation5 + $0x1528] ss:$16 sps:$4 sm:$0xff]  }
 0x320   :  { %v5692_v11 = vpop.f32.mrf.mxu1  ;;  %5985 = vmatprep.subr.bf16.mxu1 %v8640_v22  ;;  %v8712_v43 = vld [vmem:[#allocation5 + $0x162c] ss:$16 sps:$4 sm:$0xff]   ;;  %v8710_v22 = vld [vmem:[#allocation5 + $0x1628] ss:$16 sps:$4 sm:$0xff]  }
 0x321   :  { %v8718_v38 = vld [vmem:[#allocation5 + $0x160c] ss:$16 sps:$4 sm:$0xff]  }
 0x322   :  { %5961 = vmatpush2.bf16.msra.mxu0 %v8635_v61  ;;  %v8713_v61 = vld [vmem:[#allocation5 + $0x1508] ss:$16 sps:$4 sm:$0xff]   ;;  %v8721_v11 = vld [vmem:[#allocation5 + $0x17ec] ss:$16 sps:$4 sm:$0xff]  }
 0x323   :  { %5986 = vmatpush1.bf16.msra.mxu1 %v8638_v46  ;;  %5962 = vmatprep.subr.bf16.mxu0 %v8643_v48  ;;  %v8716_v46 = vld [vmem:[#allocation5 + $0x1608] ss:$16 sps:$4 sm:$0xff]   ;;  %v8724_v48 = vld [vmem:[#allocation5 + $0x18ec] ss:$16 sps:$4 sm:$0xff]  }
 0x324   :  { %5987 = vmatprep.subr.bf16.mxu1 %v8646_v49  ;;  %v8719_v49 = vld [vmem:[#allocation5 + $0x17e8] ss:$16 sps:$4 sm:$0xff]  }
 0x326   :  { %5963 = vmatpush2.bf16.msra.mxu0 %v8641_v50  ;;  %v8722_v50 = vld [vmem:[#allocation5 + $0x18e8] ss:$16 sps:$4 sm:$0xff]  }
 0x327   :  { %5988 = vmatpush1.bf16.msra.mxu1 %v8644_v52  ;;  %5964 = vmatprep.subr.bf16.mxu0 %v8649_v54  ;;  %v8727_v52 = vld [vmem:[#allocation5 + $0x17cc] ss:$16 sps:$4 sm:$0xff]  }
 0x328   :  { %5989 = vmatprep.subr.bf16.mxu1 %v8652_v53  ;;  %v8730_v54 = vld [vmem:[#allocation5 + $0x18cc] ss:$16 sps:$4 sm:$0xff]  }
 0x32a   :  { %5965 = vmatpush2.bf16.msra.mxu0 %v8647_v9 }
 0x32b   :  { %5990 = vmatpush1.bf16.msra.mxu1 %v8650_v55  ;;  %5966 = vmatprep.subr.bf16.mxu0 %v8655_v57  ;;  %v8725_v55 = vld [vmem:[#allocation5 + $0x17c8] ss:$16 sps:$4 sm:$0xff]  }
 0x32c   :  { %5991 = vmatprep.subr.bf16.mxu1 %v8658_v44  ;;  %v8728_v57 = vld [vmem:[#allocation5 + $0x18c8] ss:$16 sps:$4 sm:$0xff]  }
 0x32e   :  { %5967 = vmatpush2.bf16.msra.mxu0 %v8653_v56  ;;  %v8733_v56 = vld [vmem:[#allocation5 + $0x17ac] ss:$16 sps:$4 sm:$0xff]  }
 0x32f   :  { %5992 = vmatpush1.bf16.msra.mxu1 %v8656_v59  ;;  %5968 = vmatprep.subr.bf16.mxu0 %v8661_v60  ;;  %v8736_v59 = vld [vmem:[#allocation5 + $0x18ac] ss:$16 sps:$4 sm:$0xff]  }
 0x330   :  { %5993 = vmatprep.subr.bf16.mxu1 %v8664_v17 }
 0x332   :  { %5969 = vmatpush2.bf16.msra.mxu0 %v8659_v5  ;;  %v8734_v5 = vld [vmem:[#allocation5 + $0x18a8] ss:$16 sps:$4 sm:$0xff]  }
 0x333   :  { %5994 = vmatpush1.bf16.msra.mxu1 %v8662_v8  ;;  %5970 = vmatprep.subr.bf16.mxu0 %v8667_v1  ;;  %v8739_v1 = vld [vmem:[#allocation5 + $0x178c] ss:$16 sps:$4 sm:$0xff]  }
 0x334   :  { %5995 = vmatprep.subr.bf16.mxu1 %v8670_v10  ;;  %v8742_v10 = vld [vmem:[#allocation5 + $0x188c] ss:$16 sps:$4 sm:$0xff]  }
 0x336   :  { %5971 = vmatpush2.bf16.msra.mxu0 %v8665_v3  ;;  %v8737_v3 = vld [vmem:[#allocation5 + $0x1788] ss:$16 sps:$4 sm:$0xff]  }
 0x337   :  { %5996 = vmatpush1.bf16.msra.mxu1 %v8668_v25  ;;  %6022 = vmatprep.subr.bf16.mxu0 %v8676_v16  ;;  %v8740_v25 = vld [vmem:[#allocation5 + $0x1888] ss:$16 sps:$4 sm:$0xff]   ;;  %v8748_v16 = vld [vmem:[#allocation5 + $0x186c] ss:$16 sps:$4 sm:$0xff]  }
 0x338   :  { %5997 = vmatprep.subr.bf16.mxu1 %v8673_v12  ;;  %v8745_v12 = vld [vmem:[#allocation5 + $0x176c] ss:$16 sps:$4 sm:$0xff]  }
 0x339   :  { %v5728_v14 = vpop.f32.mrf.mxu0  ;;  %5973 = vmatmul.mubr.bf16.vlgmr.msra.gmra.mxu0 %v9171_v62  ;;  %v8683_v62 = vld [vmem:[#allocation5 + $0x15a8] ss:$16 sps:$4 sm:$0xff]  }
 0x33a   :  { %v9272_v15 = vadd.f32 %v5728_v14, %v9264_v41  ;;  %6023 = vmatpush1.bf16.msra.mxu0 %v8674_v58  ;;  %6054 = vmatprep.mubr.bf16.mxu0 %v9179_v2  ;;  %v8695_v2 = vld [vmem:[#allocation5 + $0x1568] ss:$16 sps:$4 sm:$0xff]   ;;  %v8751_v58 = vld [vmem:[#allocation5 + $0x174c] ss:$16 sps:$4 sm:$0xff]  }
 0x33b   :  { %5998 = vmatpush2.bf16.msra.mxu1 %v8671_v20  ;;  %v5730_v27 = vpop.f32.mrf.mxu0  ;;  %6024 = vmatprep.subr.bf16.mxu0 %v8682_v40  ;;  %v8701_v41 = vld [vmem:[#allocation5 + $0x1548] ss:$16 sps:$4 sm:$0xff]  }
 0x33c   :  { %5999 = vmatprep.subr.bf16.mxu1 %v8679_v13  ;;  %v9275_v7 = vadd.f32 %v5730_v27, %v9267_v45  ;;  %v8715_v45 = vld [vmem:[#allocation5 + $0x150c] ss:$16 sps:$4 sm:$0xff]   ;;  %v8746_v20 = vld [vmem:[#allocation5 + $0x1868] ss:$16 sps:$4 sm:$0xff]  }
 0x33d   :  { %v5732_v18 = vpop.f32.mrf.mxu0  ;;  %v8754_v13 = vld [vmem:[#allocation5 + $0x184c] ss:$16 sps:$4 sm:$0xff]   ;;  %v8749_v40 = vld [vmem:[#allocation5 + $0x1748] ss:$16 sps:$4 sm:$0xff]  }
 0x33e   :  { %6025 = vmatpush1.bf16.msra.mxu0 %v8680_v0  ;;  %v8752_v14 = vld [vmem:[#allocation5 + $0x1848] ss:$16 sps:$4 sm:$0xff]  }
 0x33f   :  { %6000 = vmatpush2.bf16.msra.mxu1 %v8677_v21  ;;  %v5733_v6 = vpop.f32.mrf.mxu0  ;;  %6026 = vmatprep.subr.bf16.mxu0 %v8688_v24  ;;  %v8760_v21 = vld [vmem:[#allocation5 + $0x182c] ss:$16 sps:$4 sm:$0xff]   ;;  %v8755_v0 = vld [vmem:[#allocation5 + $0x1728] ss:$16 sps:$4 sm:$0xff]  }
 0x340   :  { %6001 = vmatprep.subr.bf16.mxu1 %v8685_v32  ;;  %v8758_v27 = vld [vmem:[#allocation5 + $0x1828] ss:$16 sps:$4 sm:$0xff]   ;;  %v8763_v32 = vld [vmem:[#allocation5 + $0x170c] ss:$16 sps:$4 sm:$0xff]  }
 0x341   :  { %v8766_v24 = vld [vmem:[#allocation5 + $0x180c] ss:$16 sps:$4 sm:$0xff]   ;;  %v8764_v18 = vld [vmem:[#allocation5 + $0x1808] ss:$16 sps:$4 sm:$0xff]  }
 0x342   :  { %6027 = vmatpush1.bf16.msra.mxu0 %v8686_v35  ;;  %v6105_v35 = vmax.f32 %v9243_v34, 0.0  ;;  %v8768_v6 = vld [vmem:[#allocation8 + $0x38] sm:$0xff]  }
 0x343   :  { %6002 = vmatpush2.bf16.msra.mxu1 %v8683_v62  ;;  %6028 = vmatprep.subr.bf16.mxu0 %v8694_v37  ;;  %v8767_v62 = vld [vmem:[#allocation8 + $0x78] sm:$0xff]  }
 0x344   :  { %6003 = vmatprep.subr.bf16.mxu1 %v8691_v19  ;;  %v8769_v19 = vld [vmem:[#allocation8 + $0x70] sm:$0xff]   ;;  %v6109_v37 = vpack.c.bf16 %v6105_v35, %v6105_v35  ;;  %v8802_v35 = vld [vmem:[#allocation11 + $0x20] sm:$0xff]  }
 0x346   :  { %6029 = vmatpush1.bf16.msra.mxu0 %v8692_v31  ;;  %v8808_v31 = vld [vmem:[#allocation2 + $0x60] ss:$0 sps:$4 sm:$0xff]  }
 0x347   :  { %6004 = vmatpush2.bf16.msra.mxu1 %v8689_v33  ;;  %6030 = vmatprep.subr.bf16.mxu0 %v8700_v39  ;;  %v8770_v39 = vld [vmem:[#allocation8 + $0x30] sm:$0xff]  }
 0x348   :  { %6005 = vmatprep.subr.bf16.mxu1 %v8697_v28 }
 0x34a   :  { %6031 = vmatpush1.bf16.msra.mxu0 %v8698_v30  ;;  %v8771_v30 = vld [vmem:[#allocation8 + $0x68] sm:$0xff]  }
 0x34b   :  { %6006 = vmatpush2.bf16.msra.mxu1 %v8695_v2  ;;  %6032 = vmatprep.subr.bf16.mxu0 %v8706_v36  ;;  %v8772_v36 = vld [vmem:[#allocation8 + $0x28] sm:$0xff]  }
 0x34c   :  { %6007 = vmatprep.subr.bf16.mxu1 %v8703_v51 }
 0x34e   :  { %6033 = vmatpush1.bf16.msra.mxu0 %v8704_v42  ;;  %v8773_v42 = vld [vmem:[#allocation8 + $0x60] sm:$0xff]  }
 0x34f   :  { %6008 = vmatpush2.bf16.msra.mxu1 %v8701_v41  ;;  %6034 = vmatprep.subr.bf16.mxu0 %v8712_v43  ;;  %v8776_v43 = vld [vmem:[#allocation8 + $0x18] sm:$0xff]  }
 0x350   :  { %6009 = vmatprep.subr.bf16.mxu1 %v8709_v47  ;;  %v8775_v47 = vld [vmem:[#allocation8 + $0x58] sm:$0xff]  }
 0x352   :  { %6035 = vmatpush1.bf16.msra.mxu0 %v8710_v22  ;;  %v8778_v22 = vld [vmem:[#allocation8 + $0x10] sm:$0xff]  }
 0x353   :  { %6010 = vmatpush2.bf16.msra.mxu1 %v8707_v23  ;;  %6036 = vmatprep.subr.bf16.mxu0 %v8718_v38  ;;  %v8777_v23 = vld [vmem:[#allocation8 + $0x50] sm:$0xff]   ;;  %v8780_v38 = vld [vmem:[#allocation8 + $0x8] sm:$0xff]  }
 0x354   :  { %6011 = vmatprep.subr.bf16.mxu1 %v8715_v45  ;;  %v8779_v45 = vld [vmem:[#allocation8 + $0x48] sm:$0xff]  }
 0x356   :  { %6037 = vmatpush1.bf16.msra.mxu0 %v8716_v46  ;;  %v8782_v46 = vld [vmem:[#allocation8] sm:$0xff]  }
 0x357   :  { %6012 = vmatpush2.bf16.msra.mxu1 %v8713_v61  ;;  %6038 = vmatprep.subr.bf16.mxu0 %v8721_v11  ;;  %v8781_v61 = vld [vmem:[#allocation8 + $0x40] sm:$0xff]   ;;  %v6104_v11 = vmax.f32 %v9240_v29, 0.0  ;;  %v8788_v29 = vld [vmem:[#allocation8 + $0xa8] sm:$0xff]  }
 0x358   :  { %6063 = vmatprep.subr.bf16.mxu1 %v8724_v48 }
 0x359   :  { %v6108_v48 = vpack.c.bf16 %v6104_v11, %v6104_v11 }
 0x35a   :  { %v5769_v53 = vpop.f32.mrf.mxu1  ;;  %6014 = vmatmul.mubr.bf16.vlgmr.msra.gmra.mxu1 %v9193_v63  ;;  %6039 = vmatpush2.bf16.msra.mxu0 %v8719_v49  ;;  %v8731_v63 = vld [vmem:[#allocation5 + $0x17a8] ss:$16 sps:$4 sm:$0xff]  }
 0x35b   :  { %v9280_v9 = vadd.f32 %v5769_v53, %v9272_v15  ;;  %6064 = vmatpush1.bf16.msra.mxu1 %v8722_v50  ;;  %6040 = vmatprep.subr.bf16.mxu0 %v8727_v52  ;;  %v8757_v15 = vld [vmem:[#allocation5 + $0x172c] ss:$16 sps:$4 sm:$0xff]  }
 0x35c   :  { %v5771_v44 = vpop.f32.mrf.mxu1  ;;  %6065 = vmatprep.subr.bf16.mxu1 %v8730_v54  ;;  %6095 = vmatprep.mubr.bf16.mxu1 %v8990_v26  ;;  %v8743_v26 = vld [vmem:[#allocation5 + $0x1768] ss:$16 sps:$4 sm:$0xff]  }
 0x35d   :  { %v9283_v60 = vadd.f32 %v5771_v44, %v9275_v7  ;;  %v8761_v7 = vld [vmem:[#allocation5 + $0x1708] ss:$16 sps:$4 sm:$0xff]  }
 0x35e   :  { %v5773_v17 = vpop.f32.mrf.mxu1  ;;  %6041 = vmatpush2.bf16.msra.mxu0 %v8725_v55  ;;  %v8783_v55 = vld [vmem:[#allocation8 + $0xf8] sm:$0xff]   ;;  %v8785_v44 = vld [vmem:[#allocation8 + $0xf0] sm:$0xff]  }
 0x35f   :  { %6066 = vmatpush1.bf16.msra.mxu1 %v8728_v57  ;;  %6042 = vmatprep.subr.bf16.mxu0 %v8733_v56  ;;  %v8784_v57 = vld [vmem:[#allocation8 + $0xb8] sm:$0xff]   ;;  %v8786_v56 = vld [vmem:[#allocation8 + $0xb0] sm:$0xff]   ;;  %v8790_v17 = vld [vmem:[#allocation8 + $0xa0] sm:$0xff]  }
 0x360   :  { %v5774_v8 = vpop.f32.mrf.mxu1  ;;  %6067 = vmatprep.subr.bf16.mxu1 %v8736_v59  ;;  %v8787_v59 = vld [vmem:[#allocation8 + $0xe8] sm:$0xff]  }
 0x361   :  { %v8793_v8 = vld [vmem:[#allocation8 + $0xd0] sm:$0xff]  }
 0x362   :  { %6043 = vmatpush2.bf16.msra.mxu0 %v8731_v63  ;;  %v8791_v63 = vld [vmem:[#allocation8 + $0xd8] sm:$0xff]  }
 0x363   :  { %6068 = vmatpush1.bf16.msra.mxu1 %v8734_v5  ;;  %6044 = vmatprep.subr.bf16.mxu0 %v8739_v1  ;;  %v8792_v5 = vld [vmem:[#allocation8 + $0x98] sm:$0xff]   ;;  %v8794_v1 = vld [vmem:[#allocation8 + $0x90] sm:$0xff]  }
 0x364   :  { %6069 = vmatprep.subr.bf16.mxu1 %v8742_v10 }
 0x366   :  { %6045 = vmatpush2.bf16.msra.mxu0 %v8737_v3 }
 0x367   :  { %6070 = vmatpush1.bf16.msra.mxu1 %v8740_v25  ;;  %6046 = vmatprep.subr.bf16.mxu0 %v8745_v12  ;;  %v8795_v12 = vld [vmem:[#allocation8 + $0xc8] sm:$0xff]  }
 0x368   :  { %6071 = vmatprep.subr.bf16.mxu1 %v8748_v16 }
 0x36a   :  { %6047 = vmatpush2.bf16.msra.mxu0 %v8743_v26  ;;  %v8796_v26 = vld [vmem:[#allocation8 + $0x88] sm:$0xff]  }
 0x36b   :  { %6072 = vmatpush1.bf16.msra.mxu1 %v8746_v20  ;;  %6048 = vmatprep.subr.bf16.mxu0 %v8751_v58 }
 0x36c   :  { %6073 = vmatprep.subr.bf16.mxu1 %v8754_v13  ;;  %v8797_v13 = vld [vmem:[#allocation8 + $0xc0] sm:$0xff]  }
 0x36e   :  { %6049 = vmatpush2.bf16.msra.mxu0 %v8749_v40  ;;  %v8798_v40 = vld [vmem:[#allocation8 + $0x80] sm:$0xff]  }
 0x36f   :  { %6074 = vmatpush1.bf16.msra.mxu1 %v8752_v14  ;;  %6050 = vmatprep.subr.bf16.mxu0 %v8757_v15 }
 0x370   :  { %6075 = vmatprep.subr.bf16.mxu1 %v8760_v21 }
 0x372   :  { %6051 = vmatpush2.bf16.msra.mxu0 %v8755_v0 }
 0x373   :  { %6076 = vmatpush1.bf16.msra.mxu1 %v8758_v27  ;;  %6052 = vmatprep.subr.bf16.mxu0 %v8763_v32 }
 0x374   :  { %6077 = vmatprep.subr.bf16.mxu1 %v8766_v24  ;;  %v8799_v24 = vld [vmem:[#allocation11 + $0x38] sm:$0xff]  }
 0x376   :  { %6053 = vmatpush2.bf16.msra.mxu0 %v8761_v7  ;;  %v8991_v7 = vmov 0.0  }
 0x377   :  { %6078 = vmatpush1.bf16.msra.mxu1 %v8764_v18  ;;  %7454 = vmatprep.subr.bf16.mxu0 %v8767_v62  ;;  %v8800_v18 = vld [vmem:[#allocation11 + $0x30] sm:$0xff]   ;;  %v8801_v62 = vld [vmem:[#allocation11 + $0x28] sm:$0xff]  }
 0x378   :  { %7476 = vmatprep.subr.bf16.mxu1 %v8783_v55 }
 0x379   :  { %v5810_v33 = vpop.f32.mrf.mxu0  ;;  %6055 = vmatmul.mubr.bf16.vlgmr.msra.gmra.mxu0 %v9197_v4  ;;  %v8774_v4 = vld [vmem:[#allocation8 + $0x20] sm:$0xff]  }
 0x37a   :  { %6096 = vmatmul.mubr.bf16.vlgmr.msra.gmra.mxu1 %v8808_v31  ;;  %v5811_v28 = vadd.f32 %v5810_v33, %v9280_v9  ;;  %7455 = vmatpush3.bf16.msra.mxu0 %v8768_v6  ;;  %v8803_v6 = vld [vmem:[#allocation11 + $0x18] sm:$0xff]  }
 0x37b   :  { %6407 = vmatprep.mubr.bf16.mxu0 %v6109_v37  ;;  %v5812_v2 = vpop.f32.mrf.mxu0  ;;  %7456 = vmatprep.subr.bf16.mxu0 %v8769_v19 }
 0x37c   :  { %v5813_v34 = vadd.f32 %v5812_v2, %v9283_v60  ;;  %7477 = vmatpush3.bf16.msra.mxu1 %v8784_v57  ;;  %v8789_v60 = vld [vmem:[#allocation8 + $0xe0] sm:$0xff]  }
 0x37d   :  { %v5814_v51 = vpop.f32.mrf.mxu0  ;;  %7478 = vmatprep.subr.bf16.mxu1 %v8785_v44 }
 0x37e   :  { %7457 = vmatpush3.bf16.msra.mxu0 %v8770_v39 }
 0x37f   :  { %v5815_v41 = vpop.f32.mrf.mxu0  ;;  %7458 = vmatprep.subr.bf16.mxu0 %v8771_v30 }
 0x380   :  { %7479 = vmatpush3.bf16.msra.mxu1 %v8786_v56  ;;  %v8804_v56 = vld [vmem:[#allocation11 + $0x10] sm:$0xff]  }
 0x381   :  { %7480 = vmatprep.subr.bf16.mxu1 %v8787_v59  ;;  %v8805_v59 = vld [vmem:[#allocation11 + $0x8] sm:$0xff]  }
 0x382   :  { %7459 = vmatpush3.bf16.msra.mxu0 %v8772_v36 }
 0x383   :  { %7460 = vmatprep.subr.bf16.mxu0 %v8773_v42 }
 0x384   :  { %7481 = vmatpush3.bf16.msra.mxu1 %v8788_v29  ;;  %v8806_v29 = vld [vmem:[#allocation11] sm:$0xff]  }
 0x385   :  { %7482 = vmatprep.subr.bf16.mxu1 %v8789_v60  ;;  %v7412_v60 = vld [vmem:[#allocation10] ss:$0 sm:$0xff] }
 0x386   :  { %7461 = vmatpush3.bf16.msra.mxu0 %v8774_v4 }
 0x387   :  { %7462 = vmatprep.subr.bf16.mxu0 %v8775_v47 }
 0x388   :  { %7483 = vmatpush3.bf16.msra.mxu1 %v8790_v17 }
 0x389   :  { %7484 = vmatprep.subr.bf16.mxu1 %v8791_v63 }
 0x38a   :  { %7463 = vmatpush3.bf16.msra.mxu0 %v8776_v43 }
 0x38b   :  { %7464 = vmatprep.subr.bf16.mxu0 %v8777_v23 }
 0x38c   :  { %7485 = vmatpush3.bf16.msra.mxu1 %v8792_v5 }
 0x38d   :  { %7486 = vmatprep.subr.bf16.mxu1 %v8793_v8 }
 0x38e   :  { %7465 = vmatpush3.bf16.msra.mxu0 %v8778_v22 }
 0x38f   :  { %7466 = vmatprep.subr.bf16.mxu0 %v8779_v45 }
 0x390   :  { %7487 = vmatpush3.bf16.msra.mxu1 %v8794_v1 }
 0x391   :  { %7488 = vmatprep.subr.bf16.mxu1 %v8795_v12 }
 0x392   :  { %7467 = vmatpush3.bf16.msra.mxu0 %v8780_v38 }
 0x393   :  { %7468 = vmatprep.subr.bf16.mxu0 %v8781_v61 }
 0x394   :  { %7489 = vmatpush3.bf16.msra.mxu1 %v8796_v26 }
 0x395   :  { %7490 = vmatprep.subr.bf16.mxu1 %v8797_v13 }
 0x396   :  { %7469 = vmatpush3.bf16.msra.mxu0 %v8782_v46 }
 0x397   :  { %7507 = vmatprep.subr.bf16.mxu0 %v8991_v7 }
 0x398   :  { %7491 = vmatpush3.bf16.msra.mxu1 %v8798_v40 }
 0x399   :  { %6408 = vmatmul.mubr.bf16.vlgmr.msra.gmra.mxu0 %v6108_v48 }
 0x39a   :  { %v5851_v49 = vpop.f32.mrf.mxu1  ;;  %7508 = vmatpush3.bf16.msra.mxu0 %v8799_v24  ;;  %7523 = vmatprep.mubr.msk.bf16.mxu0 %vm8992_vm0, %v8991_v7 }
 0x39b   :  { %v5852_v50 = vadd.f32 %v5851_v49, %v5811_v28  ;;  %7509 = vmatprep.subr.bf16.mxu0 %v8991_v7 }
 0x39c   :  { %v5853_v52 = vpop.f32.mrf.mxu1 }
 0x39d   :  { %v5854_v54 = vadd.f32 %v5853_v52, %v5813_v34 }
 0x39e   :  { %v5855_v53 = vpop.f32.mrf.mxu1  ;;  %7510 = vmatpush3.bf16.msra.mxu0 %v8800_v18 }
 0x39f   :  { %7511 = vmatprep.subr.bf16.mxu0 %v8991_v7 }
 0x3a0   :  { %v5856_v9 = vpop.f32.mrf.mxu1 }
 0x3a2   :  { %7512 = vmatpush3.bf16.msra.mxu0 %v8801_v62 }
 0x3a3   :  { %7513 = vmatprep.subr.bf16.mxu0 %v8991_v7 }
 0x3a6   :  { %7514 = vmatpush3.bf16.msra.mxu0 %v8802_v35 }
 0x3a7   :  { %7515 = vmatprep.subr.bf16.mxu0 %v8991_v7 }
 0x3aa   :  { %7516 = vmatpush3.bf16.msra.mxu0 %v8803_v6 }
 0x3ab   :  { %7517 = vmatprep.subr.bf16.mxu0 %v8991_v7 }
 0x3ae   :  { %7518 = vmatpush3.bf16.msra.mxu0 %v8804_v56 }
 0x3af   :  { %7519 = vmatprep.subr.bf16.mxu0 %v8991_v7 }
 0x3b2   :  { %7520 = vmatpush3.bf16.msra.mxu0 %v8805_v59 }
 0x3b3   :  { %7521 = vmatprep.subr.bf16.mxu0 %v8991_v7 }
 0x3b6   :  { %7522 = vmatpush3.bf16.msra.mxu0 %v8806_v29 }
 0x3b9   :  { %v5892_v10 = vpop.f32.mrf.mxu0 }
 0x3ba   :  { %v5893_v3 = vadd.f32 %v5892_v10, %v5852_v50 }
 0x3bb   :  { %v5894_v25 = vpop.f32.mrf.mxu0 }
 0x3bc   :  { %v5895_v16 = vadd.f32 %v5894_v25, %v5854_v54 }
 0x3bd   :  { %v5896_v20 = vpop.f32.mrf.mxu0 }
 0x3bf   :  { %v5897_v58 = vpop.f32.mrf.mxu0 }
 0x3da   :  { %v5933_v14 = vpop.f32.mrf.mxu1 }
 0x3db   :  { %v5934_v15 = vadd.f32 %v5933_v14, %v5893_v3 }
 0x3dc   :  { %v5935_v21 = vpop.f32.mrf.mxu1 }
 0x3dd   :  { %v5936_v0 = vadd.f32 %v5935_v21, %v5895_v16  ;;  %v7445_v16 = vld [vmem:[#allocation13] ss:$0 sm:$0xff] }
 0x3de   :  { %v5937_v27 = vpop.f32.mrf.mxu1 }
 0x3e0   :  { %v5938_v32 = vpop.f32.mrf.mxu1 }
 0x3f9   :  { %v5974_v19 = vpop.f32.mrf.mxu0 }
 0x3fa   :  { %v5975_v34 = vadd.f32 %v5974_v19, %v5934_v15 }
 0x3fb   :  { %v5976_v37 = vpop.f32.mrf.mxu0 }
 0x3fc   :  { %v5977_v51 = vadd.f32 %v5976_v37, %v5936_v0 }
 0x3fd   :  { %v5978_v33 = vpop.f32.mrf.mxu0 }
 0x3ff   :  { %v5979_v31 = vpop.f32.mrf.mxu0 }
 0x41a   :  { %v6015_v28 = vpop.f32.mrf.mxu1 }
 0x41b   :  { %v6016_v36 = vadd.f32 %v6015_v28, %v5975_v34 }
 0x41c   :  { %v6017_v39 = vpop.f32.mrf.mxu1 }
 0x41d   :  { %v6018_v4 = vadd.f32 %v6017_v39, %v5977_v51 }
 0x41e   :  { %v6019_v2 = vpop.f32.mrf.mxu1 }
 0x420   :  { %v6020_v30 = vpop.f32.mrf.mxu1 }
 0x439   :  { %v6056_v41 = vpop.f32.mrf.mxu0 }
 0x43a   :  { %v6097_v42 = vpop.f32.mrf.mxu1  ;;  %v6057_v47 = vadd.f32 %v6056_v41, %v6016_v36 }
 0x43b   :  { %v6058_v43 = vpop.f32.mrf.mxu0 }
 0x43c   :  { %v6099_v23 = vpop.f32.mrf.mxu1  ;;  %v6098_v22 = vadd.f32 %v6097_v42, %v6057_v47  ;;  %v6059_v45 = vadd.f32 %v6058_v43, %v6018_v4 }
 0x43d   :  { %v6060_v38 = vpop.f32.mrf.mxu0 }
 0x43e   :  { %v6101_v61 = vpop.f32.mrf.mxu1  ;;  %v6100_v46 = vadd.f32 %v6099_v23, %v6059_v45  ;;  %v6106_v11 = vmax.f32 %v6098_v22, 0.0 }
 0x43f   :  { %v6061_v48 = vpop.f32.mrf.mxu0 }
 0x440   :  { %v6102_v49 = vpop.f32.mrf.mxu1  ;;  %v6107_v50 = vmax.f32 %v6100_v46, 0.0  ;;  %v6110_v54 = vpack.c.bf16 %v6106_v11, %v6106_v11 }
 0x442   :  { %v6111_v52 = vpack.c.bf16 %v6107_v50, %v6107_v50 }
 0x444   :  { %6447 = vmatprep.mubr.bf16.mxu1 %v6111_v52 }
 0x445   :  { %6448 = vmatmul.mubr.bf16.vlgmr.msra.gmra.mxu1 %v6110_v54 }
 0x459   :  { %v7470_v53 = vpop.f32.mrf.mxu0 }
 0x45b   :  { %v7471_v9 = vpop.f32.mrf.mxu0 }
 0x45c   :  { %v7472_v55 = vadd.f32 %v7471_v9, %v7470_v53 }
 0x45d   :  { %v7473_v57 = vpop.f32.mrf.mxu0 }
 0x45e   :  { %v6410_v5 = vadd.f32 %v7472_v55, %v7412_v60 }
 0x45f   :  { %v7474_v44 = vpop.f32.mrf.mxu0 }
 0x505   :  { %v7492_v17 = vpop.f32.mrf.mxu1 }
 0x507   :  { %v7493_v63 = vpop.f32.mrf.mxu1 }
 0x508   :  { %v7494_v8 = vadd.f32 %v7493_v63, %v7492_v17 }
 0x509   :  { %v7495_v1 = vpop.f32.mrf.mxu1 }
 0x50a   :  { %v6450_v10 = vadd.f32 %v7494_v8, %v6410_v5 }
 0x50b   :  { %v7496_v3 = vpop.f32.mrf.mxu1 }
 0x50c   :  { %v6455_v25 = vmax.f32 %v6450_v10, 0.0 }
 0x50e   :  { %v6456_v12 = vpack.c.bf16 %v6455_v25, %v6455_v25 }
 0x510   :  { %7524 = vmatmul.mubr.bf16.vlgmr.msra.gmra.mxu0 %v6456_v12 }
 0x5d0   :  { %v6562_v26 = vpop.f32.mrf.mxu0 }
 0x5d1   :  { %v6563_v20 = vadd.f32 %v7445_v16, %v6562_v26 }
 0x5d2   :  { %v7525_v58 = vpop.f32.mrf.mxu0 }
 0x5d3   :  { %6568 = vst [vmem:[#allocation14] sm:$0xff] %v6563_v20 }
 0x5d4   :  { %v6565_v13 = vpop.f32.mrf.mxu0 }
 0x5d5   :  { %8960 = shalt.err (!%p8957_p11)
}
 0x5d6   :  { %6578 = dma.vmem_to_hbm [thread:$0]  %s6576_s6, 128, %s9301_s7, [#allocation4]   ;;  %v7526_v40 = vpop.f32.mrf.mxu0 }
 0x5d7   :  { %8977 = dma.done.wait [#allocation4], 128  }
 0x5d8   :  { %8978 = vsyncadd [#allocation4], 4294967168 }
 0x5d9   :  { %6582 = vsyncpa [#allocation3], 1 }
 0x5da   :  { %6583 = vsyncpa [#allocation6], 1 }
 0x5db   :  { %6584 = vsyncpa [#allocation9], 1 }
 0x5dc   :  { %6585 = vsyncpa [#allocation12], 1 }
 0x5dd   :  { %6586 = vsyncpa [#allocation4], 1 }

</bundles_post_ra>
